<compile_context>
chip_gen: v6e
topology: v6e:2x2x1
jax: 0.10.0
libtpu: 0.0.40
codegen_flags: <defaults>
</compile_context>

<pallas_src>
import math
import functools

import jax
import jax.numpy as jnp
from jax.experimental import pallas as pl
from jax.experimental.pallas import tpu as pltpu  # noqa: F401  (TPU backend)

# ----------------------------- small config -----------------------------
BATCH = 2
NUM_CHANNEL = 3
PATCH_SIZE = 4
PATCH_LEN = 1
N_PATCH = 8
HIDDEN = 128
NUM_HEADS = 4
HEAD_DIM = HIDDEN // NUM_HEADS
INTERMEDIATE = 256
NUM_LAYERS = 2
EPS = 1e-6

PATCH_W = PATCH_SIZE * PATCH_LEN                    # conv kernel width == stride
PATCH_DIM = NUM_CHANNEL * PATCH_SIZE * PATCH_W      # 48
PATCH_DIM_PAD = ((PATCH_DIM + 127) // 128) * 128    # pad to a full 128-lane tile
IMG_H = PATCH_SIZE                                  # single text-line image
IMG_W = PATCH_W * N_PATCH


# ----------------------------- fused Pallas kernel -----------------------------
def fused_forward_kernel(
        x_ref, w_in_ref,
        ln1_ref, w_attn_ref, wo_ref,
        ln2_ref, w_gu_ref, wd_ref,
        cos_ref, sin_ref, bias_ref, sel_ref,
        normw_ref, hw0_ref, hw1_ref, hb0_ref, hb1_ref, mask_ref,
        acc_ref, loss_ref,
        *, num_layers, num_heads, hidden, intermediate, bp, eps):
    # patch embedding: fused (pixel*2 - 1) + strided Conv2d as a matmul.
    # Padded pixel lanes become -1 but hit exactly-zero weight rows -> no contribution.
    x = x_ref[...] * 2.0 - 1.0                                    # [BP, PAD]
    h = jnp.dot(x, w_in_ref[...], preferred_element_type=jnp.float32)  # [BP, H]

    cos = cos_ref[...]           # [BP, H] cos table tiled over heads/batch
    sin_sg = sin_ref[...]        # [BP, H] sin table with rotate-half sign baked in
    bias = bias_ref[...]         # [num_heads*BP, BP] causal + batch-block bias, pre-tiled
    sels = [sel_ref[hd] for hd in range(num_heads)]   # hoisted [1, H] lane masks

    def rmsnorm(t, w):
        var = jnp.mean(t * t, axis=-1, keepdims=True)
        return t * jax.lax.rsqrt(var + eps) * w

    for l in range(num_layers):
        # ------------------ self attention ------------------
        hn = rmsnorm(h, ln1_ref[l])
        # fused q|k|v|q@rot|k@rot projection; RoPE rotation and 1/sqrt(head_dim)
        # are folded into the weights at init -> a single wide MXU matmul.
        qkv = jnp.dot(hn, w_attn_ref[l], preferred_element_type=jnp.float32)  # [BP, 5H]
        q_lin = qkv[:, 0 * hidden:1 * hidden]
        k_lin = qkv[:, 1 * hidden:2 * hidden]
        v = qkv[:, 2 * hidden:3 * hidden]
        q_rot = qkv[:, 3 * hidden:4 * hidden]
        k_rot = qkv[:, 4 * hidden:5 * hidden]
        q = q_lin * cos + q_rot * sin_sg        # RoPE, pure VPU (scale pre-folded)
        k = k_lin * cos + k_rot * sin_sg

        # Head-stacked attention: mask q's lanes per head and stack along sublanes,
        # so ONE matmul computes all per-head score blocks at once.
        qstack = jnp.concatenate([q * sels[hd] for hd in range(num_heads)],
                                 axis=0)                           # [H*BP, H]
        s = jax.lax.dot_general(qstack, k, (((1,), (1,)), ((), ())),
                                preferred_element_type=jnp.float32) + bias  # [H*BP, BP]
        s_max = jnp.max(s, axis=-1, keepdims=True)
        e = jnp.exp(s - s_max)
        p = e * pl.reciprocal(jnp.sum(e, axis=-1, keepdims=True), approx=True)
        blk = jnp.dot(p, v, preferred_element_type=jnp.float32)    # [H*BP, H]
        # masking v's columns commutes with the matmul -> exact per-head context.
        ctx = blk[0:bp, :] * sels[0]
        for hd in range(1, num_heads):
            ctx = ctx + blk[hd * bp:(hd + 1) * bp, :] * sels[hd]
        h = h + jnp.dot(ctx, wo_ref[l], preferred_element_type=jnp.float32)

        # ------------------ SwiGLU MLP ------------------
        hn2 = rmsnorm(h, ln2_ref[l])
        gu = jnp.dot(hn2, w_gu_ref[l], preferred_element_type=jnp.float32)  # [BP, 2I]
        g = gu[:, :intermediate]
        u = gu[:, intermediate:]
        h = h + jnp.dot(g * jax.nn.sigmoid(g) * u, wd_ref[l],
                        preferred_element_type=jnp.float32)

    # -------- final RMSNorm + Linear(hidden, 2) head + masked CE (target=1) --------
    hf = rmsnorm(h, normw_ref[...])
    l0 = jnp.sum(hf * hw0_ref[...], axis=-1, keepdims=True) + hb0_ref[...]
    l1 = jnp.sum(hf * hw1_ref[...], axis=-1, keepdims=True) + hb1_ref[...]
    m = jnp.maximum(l0, l1)
    lse = m + jnp.log(jnp.exp(l0 - m) + jnp.exp(l1 - m))
    loss_i = lse - l1                                              # CE, target == 1
    correct = (l1 > l0).astype(jnp.float32)                        # argmax == target
    mask = mask_ref[...]                                           # [BP, 1]
    inv_denom = pl.reciprocal(jnp.sum(mask, keepdims=True) + 1e-8, approx=True)
    loss_ref[...] = jnp.sum(loss_i * mask, keepdims=True) * inv_denom
    acc_ref[...] = jnp.sum(correct * mask, keepdims=True) * inv_denom


def llama_forward_fused(params, patches_pad, bias_tiled, cos_f, sin_f, sel,
                        mask_col, *, bp):
    kern = functools.partial(fused_forward_kernel,
                             num_layers=NUM_LAYERS, num_heads=NUM_HEADS,
                             hidden=HIDDEN, intermediate=INTERMEDIATE,
                             bp=bp, eps=EPS)
    acc, loss = pl.pallas_call(
        kern,
        out_shape=(jax.ShapeDtypeStruct((1, 1), jnp.float32),
                   jax.ShapeDtypeStruct((1, 1), jnp.float32)),
    )(patches_pad, params['w_in_t'],
      params['ln1'], params['w_attn'], params['wo_t'],
      params['ln2'], params['w_gu'], params['wd_t'],
      cos_f, sin_f, bias_tiled, sel,
      params['norm_w'], params['head_w0'], params['head_w1'],
      params['head_b0'], params['head_b1'], mask_col)
    return acc[0, 0], loss[0, 0]


# ----------------------------- glue / tables -----------------------------
def rope_tables(n_patch, batch):
    inv_freq = 1.0 / (10000.0 ** (jnp.arange(0, HEAD_DIM, 2,
                                              dtype=jnp.float32) / HEAD_DIM))
    t = jnp.arange(n_patch, dtype=jnp.float32)
    freqs = jnp.outer(t, inv_freq)                                 # [P, 16]
    cos = jnp.concatenate([jnp.cos(freqs), jnp.cos(freqs)], axis=-1)      # [P, 32]
    sin_sg = jnp.concatenate([-jnp.sin(freqs), jnp.sin(freqs)], axis=-1)  # [P, 32]
    cos_full = jnp.tile(cos, (batch, NUM_HEADS))                   # [B*P, 128]
    sin_full = jnp.tile(sin_sg, (batch, NUM_HEADS))                # [B*P, 128]
    return cos_full, sin_full


def rotate_half_matrix():
    # per-head half-swap permutation; only used at init (folded into weights)
    i = jnp.arange(HIDDEN)
    grp = i // HEAD_DIM
    pos = i % HEAD_DIM
    swapped = (pos + HEAD_DIM // 2) % HEAD_DIM
    r = (grp[:, None] == grp[None, :]) & (swapped[:, None] == pos[None, :])
    return r.astype(jnp.float32)                                   # [128, 128]


def attention_bias(batch, n_patch):
    idx = jnp.arange(batch * n_patch)
    b = idx // n_patch
    p = idx % n_patch
    valid = (b[:, None] == b[None, :]) & (p[None, :] <= p[:, None])
    bias = jnp.where(valid, 0.0, -1e9).astype(jnp.float32)         # [BP, BP]
    return jnp.tile(bias, (NUM_HEADS, 1))                          # [H*BP, BP]


def head_lane_masks():
    lane = jnp.arange(HIDDEN)
    sel = (lane[None, :] // HEAD_DIM ==
           jnp.arange(NUM_HEADS)[:, None]).astype(jnp.float32)     # [H, 128]
    return sel.reshape(NUM_HEADS, 1, HIDDEN)


def init_params(key):
    def nrm(k, shape, scale=0.02):
        return scale * jax.random.normal(k, shape, dtype=jnp.float32)

    rot = rotate_half_matrix()
    attn_scale = 1.0 / math.sqrt(HEAD_DIM)

    keys = jax.random.split(key, 2 + NUM_LAYERS)
    params = {}
    # in_proj: Conv2d(num_channel, hidden, (ph, pw), stride=pw, bias=False)
    w_in = nrm(keys[0], (HIDDEN, NUM_CHANNEL, PATCH_SIZE, PATCH_W))
    w_in_t = w_in.reshape(HIDDEN, PATCH_DIM).T                     # [patch_dim, H]
    params['w_in_t'] = jnp.pad(w_in_t,
                               ((0, PATCH_DIM_PAD - PATCH_DIM), (0, 0)))

    ln1, w_attn, wo, ln2, w_gu, wd = ([] for _ in range(6))
    for i in range(NUM_LAYERS):
        lk = jax.random.split(keys[2 + i], 7)
        wq_t = nrm(lk[0], (HIDDEN, HIDDEN)).T
        wk_t = nrm(lk[1], (HIDDEN, HIDDEN)).T
        wv_t = nrm(lk[2], (HIDDEN, HIDDEN)).T
        wo_t = nrm(lk[3], (HIDDEN, HIDDEN)).T
        wg_t = nrm(lk[4], (INTERMEDIATE, HIDDEN)).T
        wu_t = nrm(lk[5], (INTERMEDIATE, HIDDEN)).T
        wd_t = nrm(lk[6], (HIDDEN, INTERMEDIATE)).T
        ln1.append(jnp.ones((1, HIDDEN), jnp.float32))
        ln2.append(jnp.ones((1, HIDDEN), jnp.float32))
        # fused q|k|v|q@rot|k@rot with RoPE rotation and 1/sqrt(head_dim) folded in
        w_attn.append(jnp.concatenate(
            [wq_t * attn_scale, wk_t, wv_t,
             jnp.dot(wq_t, rot) * attn_scale, jnp.dot(wk_t, rot)], axis=1))
        wo.append(wo_t)
        w_gu.append(jnp.concatenate([wg_t, wu_t], axis=1))          # gate|up fused
        wd.append(wd_t)
    params['ln1'] = jnp.stack(ln1)           # [L, 1, H]
    params['w_attn'] = jnp.stack(w_attn)     # [L, H, 5H]
    params['wo_t'] = jnp.stack(wo)           # [L, H, H]
    params['ln2'] = jnp.stack(ln2)
    params['w_gu'] = jnp.stack(w_gu)         # [L, H, 2I]
    params['wd_t'] = jnp.stack(wd)           # [L, I, H]

    hk = jax.random.split(keys[1], 2)
    params['norm_w'] = jnp.ones((1, HIDDEN), jnp.float32)
    head_w = nrm(hk[0], (2, HIDDEN))                               # Linear(hidden, 2)
    params['head_w0'] = head_w[0:1, :]
    params['head_w1'] = head_w[1:2, :]
    params['head_b0'] = jnp.zeros((1, 1), jnp.float32)
    params['head_b1'] = jnp.zeros((1, 1), jnp.float32)
    return params


@functools.partial(jax.jit, static_argnames=("target", "only_real"))
def llama_discriminator_forward(params, image, attn_mask, target=1,
                                only_real=True):
    """Discriminator.forward, `target == 1 and only_real` branch."""
    # TODO(synk): cache-based fake-patch sampling branch (random.sample + cache_at)
    #             is not reproduced here.
    assert target == 1 and only_real

    B, C, Hh, W = image.shape
    n_patch = W // PATCH_W
    bp = B * n_patch
    # patchify, matching Conv2d kernel (ph, pw) with stride pw (glue reshape only)
    patches = image.reshape(B, C, PATCH_SIZE, n_patch, PATCH_W)
    patches = jnp.transpose(patches, (0, 3, 1, 2, 4)).reshape(bp, PATCH_DIM)
    patches = jnp.pad(patches, ((0, 0), (0, PATCH_DIM_PAD - PATCH_DIM)))

    cos_f, sin_f = rope_tables(n_patch, B)
    bias_tiled = attention_bias(B, n_patch)
    sel = head_lane_masks()
    mask_col = attn_mask.astype(jnp.float32).reshape(bp, 1)

    return llama_forward_fused(params, patches, bias_tiled, cos_f, sin_f, sel,
                               mask_col, bp=bp)


if __name__ == "__main__":
    key = jax.random.PRNGKey(0)
    pkey, ikey = jax.random.split(key)
    params = init_params(pkey)

    # real.value: pixel values in [0, 1], NCHW
    image = jax.random.uniform(ikey, (BATCH, NUM_CHANNEL, IMG_H, IMG_W),
                               dtype=jnp.float32)
    lengths = jnp.array([N_PATCH, N_PATCH - 2])
    attn_mask = (jnp.arange(N_PATCH)[None, :] < lengths[:, None]).astype(jnp.int32)

    acc, loss = llama_discriminator_forward(params, image, attn_mask,
                                            target=1, only_real=True)
    jax.block_until_ready((acc, loss))
    print("KERNEL_OK")
</pallas_src>

<mosaic_0001>
module attributes {stable_mosaic.version = 11 : i64} {
  func.func @fused_forward_kernel(%arg0: memref<16x128xf32, #tpu.memory_space<vmem>>, %arg1: memref<128x128xf32, #tpu.memory_space<vmem>>, %arg2: memref<2x1x128xf32, #tpu.memory_space<vmem>>, %arg3: memref<2x128x640xf32, #tpu.memory_space<vmem>>, %arg4: memref<2x128x128xf32, #tpu.memory_space<vmem>>, %arg5: memref<2x1x128xf32, #tpu.memory_space<vmem>>, %arg6: memref<2x128x512xf32, #tpu.memory_space<vmem>>, %arg7: memref<2x256x128xf32, #tpu.memory_space<vmem>>, %arg8: memref<16x128xf32, #tpu.memory_space<vmem>>, %arg9: memref<16x128xf32, #tpu.memory_space<vmem>>, %arg10: memref<64x16xf32, #tpu.memory_space<vmem>>, %arg11: memref<4x1x128xf32, #tpu.memory_space<vmem>>, %arg12: memref<1x128xf32, #tpu.memory_space<vmem>>, %arg13: memref<1x128xf32, #tpu.memory_space<vmem>>, %arg14: memref<1x128xf32, #tpu.memory_space<vmem>>, %arg15: memref<1x1xf32, #tpu.memory_space<vmem>>, %arg16: memref<1x1xf32, #tpu.memory_space<vmem>>, %arg17: memref<16x1xf32, #tpu.memory_space<vmem>>, %arg18: memref<1x1xf32, #tpu.memory_space<vmem>>, %arg19: memref<1x1xf32, #tpu.memory_space<vmem>>) attributes {dimension_semantics = [], scalar_prefetch = 0 : i64, scratch_operands = 0 : i64, tpu.core_type = #tpu.core_type<tc>} {
    %c0 = arith.constant 0 : index
    %c0_0 = arith.constant 0 : index
    %0 = vector.load %arg0[%c0, %c0_0] : memref<16x128xf32, #tpu.memory_space<vmem>>, vector<16x128xf32>
    %cst = arith.constant 2.000000e+00 : f32
    %1 = vector.broadcast %cst : f32 to vector<16x128xf32>
    %2 = arith.mulf %0, %1 : vector<16x128xf32>
    %cst_1 = arith.constant 1.000000e+00 : f32
    %3 = vector.broadcast %cst_1 : f32 to vector<16x128xf32>
    %4 = arith.subf %2, %3 : vector<16x128xf32>
    %c0_2 = arith.constant 0 : index
    %c0_3 = arith.constant 0 : index
    %5 = vector.load %arg1[%c0_2, %c0_3] : memref<128x128xf32, #tpu.memory_space<vmem>>, vector<128x128xf32>
    %cst_4 = arith.constant dense<0.000000e+00> : vector<16x128xf32>
    %6 = tpu.matmul %4, %5, %cst_4 {dimension_numbers = #tpu.dot_dimension_numbers<[1], [0], [0], [1], [0, 0, 1, 1], [], []>} : vector<16x128xf32>, vector<128x128xf32>, vector<16x128xf32> -> vector<16x128xf32>
    %c0_5 = arith.constant 0 : index
    %c0_6 = arith.constant 0 : index
    %7 = vector.load %arg8[%c0_5, %c0_6] : memref<16x128xf32, #tpu.memory_space<vmem>>, vector<16x128xf32>
    %c0_7 = arith.constant 0 : index
    %c0_8 = arith.constant 0 : index
    %8 = vector.load %arg9[%c0_7, %c0_8] : memref<16x128xf32, #tpu.memory_space<vmem>>, vector<16x128xf32>
    %c0_9 = arith.constant 0 : index
    %c0_10 = arith.constant 0 : index
    %9 = vector.load %arg10[%c0_9, %c0_10] : memref<64x16xf32, #tpu.memory_space<vmem>>, vector<64x16xf32>
    %c0_11 = arith.constant 0 : index
    %c0_12 = arith.constant 0 : index
    %c0_13 = arith.constant 0 : index
    %10 = vector.load %arg11[%c0_11, %c0_12, %c0_13] : memref<4x1x128xf32, #tpu.memory_space<vmem>>, vector<1x1x128xf32>
    %11 = vector.shape_cast %10 : vector<1x1x128xf32> to vector<1x128xf32>
    %c1 = arith.constant 1 : index
    %c0_14 = arith.constant 0 : index
    %c0_15 = arith.constant 0 : index
    %12 = vector.load %arg11[%c1, %c0_14, %c0_15] : memref<4x1x128xf32, #tpu.memory_space<vmem>>, vector<1x1x128xf32>
    %13 = vector.shape_cast %12 : vector<1x1x128xf32> to vector<1x128xf32>
    %c2 = arith.constant 2 : index
    %c0_16 = arith.constant 0 : index
    %c0_17 = arith.constant 0 : index
    %14 = vector.load %arg11[%c2, %c0_16, %c0_17] : memref<4x1x128xf32, #tpu.memory_space<vmem>>, vector<1x1x128xf32>
    %15 = vector.shape_cast %14 : vector<1x1x128xf32> to vector<1x128xf32>
    %c3 = arith.constant 3 : index
    %c0_18 = arith.constant 0 : index
    %c0_19 = arith.constant 0 : index
    %16 = vector.load %arg11[%c3, %c0_18, %c0_19] : memref<4x1x128xf32, #tpu.memory_space<vmem>>, vector<1x1x128xf32>
    %17 = vector.shape_cast %16 : vector<1x1x128xf32> to vector<1x128xf32>
    %c0_20 = arith.constant 0 : index
    %c0_21 = arith.constant 0 : index
    %c0_22 = arith.constant 0 : index
    %18 = vector.load %arg2[%c0_20, %c0_21, %c0_22] : memref<2x1x128xf32, #tpu.memory_space<vmem>>, vector<1x1x128xf32>
    %19 = vector.shape_cast %18 : vector<1x1x128xf32> to vector<1x128xf32>
    %20 = arith.mulf %6, %6 : vector<16x128xf32>
    %cst_23 = arith.constant dense<0.000000e+00> : vector<16xf32>
    %21 = vector.multi_reduction <add>, %20, %cst_23 [1] : vector<16x128xf32> to vector<16xf32>
    %22 = vector.shape_cast %21 : vector<16xf32> to vector<16x1xf32>
    %cst_24 = arith.constant 1.280000e+02 : f32
    %23 = vector.broadcast %cst_24 : f32 to vector<16x1xf32>
    %24 = arith.divf %22, %23 : vector<16x1xf32>
    %cst_25 = arith.constant 9.99999997E-7 : f32
    %25 = vector.broadcast %cst_25 : f32 to vector<16x1xf32>
    %26 = arith.addf %24, %25 : vector<16x1xf32>
    %27 = math.rsqrt %26 : vector<16x1xf32>
    %28 = vector.broadcast %27 : vector<16x1xf32> to vector<16x128xf32>
    %29 = arith.mulf %6, %28 : vector<16x128xf32>
    %30 = vector.broadcast %19 : vector<1x128xf32> to vector<16x128xf32>
    %31 = arith.mulf %29, %30 : vector<16x128xf32>
    %c0_26 = arith.constant 0 : index
    %c0_27 = arith.constant 0 : index
    %c0_28 = arith.constant 0 : index
    %32 = vector.load %arg3[%c0_26, %c0_27, %c0_28] : memref<2x128x640xf32, #tpu.memory_space<vmem>>, vector<1x128x640xf32>
    %33 = vector.shape_cast %32 : vector<1x128x640xf32> to vector<128x640xf32>
    %cst_29 = arith.constant dense<0.000000e+00> : vector<16x640xf32>
    %34 = tpu.matmul %31, %33, %cst_29 {dimension_numbers = #tpu.dot_dimension_numbers<[1], [0], [0], [1], [0, 0, 1, 1], [], []>} : vector<16x128xf32>, vector<128x640xf32>, vector<16x640xf32> -> vector<16x640xf32>
    %35 = vector.extract_strided_slice %34 {offsets = [0, 0], sizes = [16, 128], strides = [1, 1]} : vector<16x640xf32> to vector<16x128xf32>
    %36 = vector.extract_strided_slice %34 {offsets = [0, 128], sizes = [16, 128], strides = [1, 1]} : vector<16x640xf32> to vector<16x128xf32>
    %37 = vector.extract_strided_slice %34 {offsets = [0, 256], sizes = [16, 128], strides = [1, 1]} : vector<16x640xf32> to vector<16x128xf32>
    %38 = vector.extract_strided_slice %34 {offsets = [0, 384], sizes = [16, 128], strides = [1, 1]} : vector<16x640xf32> to vector<16x128xf32>
    %39 = vector.extract_strided_slice %34 {offsets = [0, 512], sizes = [16, 128], strides = [1, 1]} : vector<16x640xf32> to vector<16x128xf32>
    %40 = arith.mulf %35, %7 : vector<16x128xf32>
    %41 = arith.mulf %38, %8 : vector<16x128xf32>
    %42 = arith.addf %40, %41 : vector<16x128xf32>
    %43 = arith.mulf %36, %7 : vector<16x128xf32>
    %44 = arith.mulf %39, %8 : vector<16x128xf32>
    %45 = arith.addf %43, %44 : vector<16x128xf32>
    %46 = vector.broadcast %11 : vector<1x128xf32> to vector<16x128xf32>
    %47 = arith.mulf %42, %46 : vector<16x128xf32>
    %48 = vector.broadcast %13 : vector<1x128xf32> to vector<16x128xf32>
    %49 = arith.mulf %42, %48 : vector<16x128xf32>
    %50 = vector.broadcast %15 : vector<1x128xf32> to vector<16x128xf32>
    %51 = arith.mulf %42, %50 : vector<16x128xf32>
    %52 = vector.broadcast %17 : vector<1x128xf32> to vector<16x128xf32>
    %53 = arith.mulf %42, %52 : vector<16x128xf32>
    %54 = tpu.concatenate %47, %49, %51, %53 in 0 : vector<16x128xf32>, vector<16x128xf32>, vector<16x128xf32>, vector<16x128xf32> -> vector<64x128xf32>
    %cst_30 = arith.constant dense<0.000000e+00> : vector<64x16xf32>
    %55 = tpu.matmul %54, %45, %cst_30 {dimension_numbers = #tpu.dot_dimension_numbers<[1], [1], [0], [0], [0, 0, 1, 0], [], []>} : vector<64x128xf32>, vector<16x128xf32>, vector<64x16xf32> -> vector<64x16xf32>
    %56 = arith.addf %55, %9 : vector<64x16xf32>
    %cst_31 = arith.constant dense<0xFF800000> : vector<64xf32>
    %57 = vector.multi_reduction <maximumf>, %56, %cst_31 [1] : vector<64x16xf32> to vector<64xf32>
    %58 = vector.shape_cast %57 : vector<64xf32> to vector<64x1xf32>
    %59 = vector.broadcast %58 : vector<64x1xf32> to vector<64x16xf32>
    %60 = arith.subf %56, %59 : vector<64x16xf32>
    %61 = math.exp %60 : vector<64x16xf32>
    %cst_32 = arith.constant dense<0.000000e+00> : vector<64xf32>
    %62 = vector.multi_reduction <add>, %61, %cst_32 [1] : vector<64x16xf32> to vector<64xf32>
    %63 = vector.shape_cast %62 : vector<64xf32> to vector<64x1xf32>
    %64 = tpu.reciprocal %63 {approx = true} : vector<64x1xf32> -> vector<64x1xf32>
    %65 = vector.broadcast %64 : vector<64x1xf32> to vector<64x16xf32>
    %66 = arith.mulf %61, %65 : vector<64x16xf32>
    %cst_33 = arith.constant dense<0.000000e+00> : vector<64x128xf32>
    %67 = tpu.matmul %66, %37, %cst_33 {dimension_numbers = #tpu.dot_dimension_numbers<[1], [0], [0], [1], [0, 0, 1, 1], [], []>} : vector<64x16xf32>, vector<16x128xf32>, vector<64x128xf32> -> vector<64x128xf32>
    %68 = vector.extract_strided_slice %67 {offsets = [0, 0], sizes = [16, 128], strides = [1, 1]} : vector<64x128xf32> to vector<16x128xf32>
    %69 = vector.broadcast %11 : vector<1x128xf32> to vector<16x128xf32>
    %70 = arith.mulf %68, %69 : vector<16x128xf32>
    %71 = vector.extract_strided_slice %67 {offsets = [16, 0], sizes = [16, 128], strides = [1, 1]} : vector<64x128xf32> to vector<16x128xf32>
    %72 = vector.broadcast %13 : vector<1x128xf32> to vector<16x128xf32>
    %73 = arith.mulf %71, %72 : vector<16x128xf32>
    %74 = arith.addf %70, %73 : vector<16x128xf32>
    %75 = vector.extract_strided_slice %67 {offsets = [32, 0], sizes = [16, 128], strides = [1, 1]} : vector<64x128xf32> to vector<16x128xf32>
    %76 = vector.broadcast %15 : vector<1x128xf32> to vector<16x128xf32>
    %77 = arith.mulf %75, %76 : vector<16x128xf32>
    %78 = arith.addf %74, %77 : vector<16x128xf32>
    %79 = vector.extract_strided_slice %67 {offsets = [48, 0], sizes = [16, 128], strides = [1, 1]} : vector<64x128xf32> to vector<16x128xf32>
    %80 = vector.broadcast %17 : vector<1x128xf32> to vector<16x128xf32>
    %81 = arith.mulf %79, %80 : vector<16x128xf32>
    %82 = arith.addf %78, %81 : vector<16x128xf32>
    %c0_34 = arith.constant 0 : index
    %c0_35 = arith.constant 0 : index
    %c0_36 = arith.constant 0 : index
    %83 = vector.load %arg4[%c0_34, %c0_35, %c0_36] : memref<2x128x128xf32, #tpu.memory_space<vmem>>, vector<1x128x128xf32>
    %84 = vector.shape_cast %83 : vector<1x128x128xf32> to vector<128x128xf32>
    %cst_37 = arith.constant dense<0.000000e+00> : vector<16x128xf32>
    %85 = tpu.matmul %82, %84, %cst_37 {dimension_numbers = #tpu.dot_dimension_numbers<[1], [0], [0], [1], [0, 0, 1, 1], [], []>} : vector<16x128xf32>, vector<128x128xf32>, vector<16x128xf32> -> vector<16x128xf32>
    %86 = arith.addf %6, %85 : vector<16x128xf32>
    %c0_38 = arith.constant 0 : index
    %c0_39 = arith.constant 0 : index
    %c0_40 = arith.constant 0 : index
    %87 = vector.load %arg5[%c0_38, %c0_39, %c0_40] : memref<2x1x128xf32, #tpu.memory_space<vmem>>, vector<1x1x128xf32>
    %88 = vector.shape_cast %87 : vector<1x1x128xf32> to vector<1x128xf32>
    %89 = arith.mulf %86, %86 : vector<16x128xf32>
    %cst_41 = arith.constant dense<0.000000e+00> : vector<16xf32>
    %90 = vector.multi_reduction <add>, %89, %cst_41 [1] : vector<16x128xf32> to vector<16xf32>
    %91 = vector.shape_cast %90 : vector<16xf32> to vector<16x1xf32>
    %cst_42 = arith.constant 1.280000e+02 : f32
    %92 = vector.broadcast %cst_42 : f32 to vector<16x1xf32>
    %93 = arith.divf %91, %92 : vector<16x1xf32>
    %cst_43 = arith.constant 9.99999997E-7 : f32
    %94 = vector.broadcast %cst_43 : f32 to vector<16x1xf32>
    %95 = arith.addf %93, %94 : vector<16x1xf32>
    %96 = math.rsqrt %95 : vector<16x1xf32>
    %97 = vector.broadcast %96 : vector<16x1xf32> to vector<16x128xf32>
    %98 = arith.mulf %86, %97 : vector<16x128xf32>
    %99 = vector.broadcast %88 : vector<1x128xf32> to vector<16x128xf32>
    %100 = arith.mulf %98, %99 : vector<16x128xf32>
    %c0_44 = arith.constant 0 : index
    %c0_45 = arith.constant 0 : index
    %c0_46 = arith.constant 0 : index
    %101 = vector.load %arg6[%c0_44, %c0_45, %c0_46] : memref<2x128x512xf32, #tpu.memory_space<vmem>>, vector<1x128x512xf32>
    %102 = vector.shape_cast %101 : vector<1x128x512xf32> to vector<128x512xf32>
    %cst_47 = arith.constant dense<0.000000e+00> : vector<16x512xf32>
    %103 = tpu.matmul %100, %102, %cst_47 {dimension_numbers = #tpu.dot_dimension_numbers<[1], [0], [0], [1], [0, 0, 1, 1], [], []>} : vector<16x128xf32>, vector<128x512xf32>, vector<16x512xf32> -> vector<16x512xf32>
    %104 = vector.extract_strided_slice %103 {offsets = [0, 0], sizes = [16, 256], strides = [1, 1]} : vector<16x512xf32> to vector<16x256xf32>
    %105 = vector.extract_strided_slice %103 {offsets = [0, 256], sizes = [16, 256], strides = [1, 1]} : vector<16x512xf32> to vector<16x256xf32>
    %106 = arith.negf %104 : vector<16x256xf32>
    %107 = math.exp %106 : vector<16x256xf32>
    %cst_48 = arith.constant 1.000000e+00 : f32
    %108 = vector.broadcast %cst_48 : f32 to vector<16x256xf32>
    %109 = arith.addf %108, %107 : vector<16x256xf32>
    %110 = arith.divf %108, %109 : vector<16x256xf32>
    %111 = arith.mulf %104, %110 : vector<16x256xf32>
    %112 = arith.mulf %111, %105 : vector<16x256xf32>
    %c0_49 = arith.constant 0 : index
    %c0_50 = arith.constant 0 : index
    %c0_51 = arith.constant 0 : index
    %113 = vector.load %arg7[%c0_49, %c0_50, %c0_51] : memref<2x256x128xf32, #tpu.memory_space<vmem>>, vector<1x256x128xf32>
    %114 = vector.shape_cast %113 : vector<1x256x128xf32> to vector<256x128xf32>
    %cst_52 = arith.constant dense<0.000000e+00> : vector<16x128xf32>
    %115 = tpu.matmul %112, %114, %cst_52 {dimension_numbers = #tpu.dot_dimension_numbers<[1], [0], [0], [1], [0, 0, 1, 1], [], []>} : vector<16x256xf32>, vector<256x128xf32>, vector<16x128xf32> -> vector<16x128xf32>
    %116 = arith.addf %86, %115 : vector<16x128xf32>
    %c1_53 = arith.constant 1 : index
    %c0_54 = arith.constant 0 : index
    %c0_55 = arith.constant 0 : index
    %117 = vector.load %arg2[%c1_53, %c0_54, %c0_55] : memref<2x1x128xf32, #tpu.memory_space<vmem>>, vector<1x1x128xf32>
    %118 = vector.shape_cast %117 : vector<1x1x128xf32> to vector<1x128xf32>
    %119 = arith.mulf %116, %116 : vector<16x128xf32>
    %cst_56 = arith.constant dense<0.000000e+00> : vector<16xf32>
    %120 = vector.multi_reduction <add>, %119, %cst_56 [1] : vector<16x128xf32> to vector<16xf32>
    %121 = vector.shape_cast %120 : vector<16xf32> to vector<16x1xf32>
    %cst_57 = arith.constant 1.280000e+02 : f32
    %122 = vector.broadcast %cst_57 : f32 to vector<16x1xf32>
    %123 = arith.divf %121, %122 : vector<16x1xf32>
    %cst_58 = arith.constant 9.99999997E-7 : f32
    %124 = vector.broadcast %cst_58 : f32 to vector<16x1xf32>
    %125 = arith.addf %123, %124 : vector<16x1xf32>
    %126 = math.rsqrt %125 : vector<16x1xf32>
    %127 = vector.broadcast %126 : vector<16x1xf32> to vector<16x128xf32>
    %128 = arith.mulf %116, %127 : vector<16x128xf32>
    %129 = vector.broadcast %118 : vector<1x128xf32> to vector<16x128xf32>
    %130 = arith.mulf %128, %129 : vector<16x128xf32>
    %c1_59 = arith.constant 1 : index
    %c0_60 = arith.constant 0 : index
    %c0_61 = arith.constant 0 : index
    %131 = vector.load %arg3[%c1_59, %c0_60, %c0_61] : memref<2x128x640xf32, #tpu.memory_space<vmem>>, vector<1x128x640xf32>
    %132 = vector.shape_cast %131 : vector<1x128x640xf32> to vector<128x640xf32>
    %cst_62 = arith.constant dense<0.000000e+00> : vector<16x640xf32>
    %133 = tpu.matmul %130, %132, %cst_62 {dimension_numbers = #tpu.dot_dimension_numbers<[1], [0], [0], [1], [0, 0, 1, 1], [], []>} : vector<16x128xf32>, vector<128x640xf32>, vector<16x640xf32> -> vector<16x640xf32>
    %134 = vector.extract_strided_slice %133 {offsets = [0, 0], sizes = [16, 128], strides = [1, 1]} : vector<16x640xf32> to vector<16x128xf32>
    %135 = vector.extract_strided_slice %133 {offsets = [0, 128], sizes = [16, 128], strides = [1, 1]} : vector<16x640xf32> to vector<16x128xf32>
    %136 = vector.extract_strided_slice %133 {offsets = [0, 256], sizes = [16, 128], strides = [1, 1]} : vector<16x640xf32> to vector<16x128xf32>
    %137 = vector.extract_strided_slice %133 {offsets = [0, 384], sizes = [16, 128], strides = [1, 1]} : vector<16x640xf32> to vector<16x128xf32>
    %138 = vector.extract_strided_slice %133 {offsets = [0, 512], sizes = [16, 128], strides = [1, 1]} : vector<16x640xf32> to vector<16x128xf32>
    %139 = arith.mulf %134, %7 : vector<16x128xf32>
    %140 = arith.mulf %137, %8 : vector<16x128xf32>
    %141 = arith.addf %139, %140 : vector<16x128xf32>
    %142 = arith.mulf %135, %7 : vector<16x128xf32>
    %143 = arith.mulf %138, %8 : vector<16x128xf32>
    %144 = arith.addf %142, %143 : vector<16x128xf32>
    %145 = vector.broadcast %11 : vector<1x128xf32> to vector<16x128xf32>
    %146 = arith.mulf %141, %145 : vector<16x128xf32>
    %147 = vector.broadcast %13 : vector<1x128xf32> to vector<16x128xf32>
    %148 = arith.mulf %141, %147 : vector<16x128xf32>
    %149 = vector.broadcast %15 : vector<1x128xf32> to vector<16x128xf32>
    %150 = arith.mulf %141, %149 : vector<16x128xf32>
    %151 = vector.broadcast %17 : vector<1x128xf32> to vector<16x128xf32>
    %152 = arith.mulf %141, %151 : vector<16x128xf32>
    %153 = tpu.concatenate %146, %148, %150, %152 in 0 : vector<16x128xf32>, vector<16x128xf32>, vector<16x128xf32>, vector<16x128xf32> -> vector<64x128xf32>
    %cst_63 = arith.constant dense<0.000000e+00> : vector<64x16xf32>
    %154 = tpu.matmul %153, %144, %cst_63 {dimension_numbers = #tpu.dot_dimension_numbers<[1], [1], [0], [0], [0, 0, 1, 0], [], []>} : vector<64x128xf32>, vector<16x128xf32>, vector<64x16xf32> -> vector<64x16xf32>
    %155 = arith.addf %154, %9 : vector<64x16xf32>
    %cst_64 = arith.constant dense<0xFF800000> : vector<64xf32>
    %156 = vector.multi_reduction <maximumf>, %155, %cst_64 [1] : vector<64x16xf32> to vector<64xf32>
    %157 = vector.shape_cast %156 : vector<64xf32> to vector<64x1xf32>
    %158 = vector.broadcast %157 : vector<64x1xf32> to vector<64x16xf32>
    %159 = arith.subf %155, %158 : vector<64x16xf32>
    %160 = math.exp %159 : vector<64x16xf32>
    %cst_65 = arith.constant dense<0.000000e+00> : vector<64xf32>
    %161 = vector.multi_reduction <add>, %160, %cst_65 [1] : vector<64x16xf32> to vector<64xf32>
    %162 = vector.shape_cast %161 : vector<64xf32> to vector<64x1xf32>
    %163 = tpu.reciprocal %162 {approx = true} : vector<64x1xf32> -> vector<64x1xf32>
    %164 = vector.broadcast %163 : vector<64x1xf32> to vector<64x16xf32>
    %165 = arith.mulf %160, %164 : vector<64x16xf32>
    %cst_66 = arith.constant dense<0.000000e+00> : vector<64x128xf32>
    %166 = tpu.matmul %165, %136, %cst_66 {dimension_numbers = #tpu.dot_dimension_numbers<[1], [0], [0], [1], [0, 0, 1, 1], [], []>} : vector<64x16xf32>, vector<16x128xf32>, vector<64x128xf32> -> vector<64x128xf32>
    %167 = vector.extract_strided_slice %166 {offsets = [0, 0], sizes = [16, 128], strides = [1, 1]} : vector<64x128xf32> to vector<16x128xf32>
    %168 = vector.broadcast %11 : vector<1x128xf32> to vector<16x128xf32>
    %169 = arith.mulf %167, %168 : vector<16x128xf32>
    %170 = vector.extract_strided_slice %166 {offsets = [16, 0], sizes = [16, 128], strides = [1, 1]} : vector<64x128xf32> to vector<16x128xf32>
    %171 = vector.broadcast %13 : vector<1x128xf32> to vector<16x128xf32>
    %172 = arith.mulf %170, %171 : vector<16x128xf32>
    %173 = arith.addf %169, %172 : vector<16x128xf32>
    %174 = vector.extract_strided_slice %166 {offsets = [32, 0], sizes = [16, 128], strides = [1, 1]} : vector<64x128xf32> to vector<16x128xf32>
    %175 = vector.broadcast %15 : vector<1x128xf32> to vector<16x128xf32>
    %176 = arith.mulf %174, %175 : vector<16x128xf32>
    %177 = arith.addf %173, %176 : vector<16x128xf32>
    %178 = vector.extract_strided_slice %166 {offsets = [48, 0], sizes = [16, 128], strides = [1, 1]} : vector<64x128xf32> to vector<16x128xf32>
    %179 = vector.broadcast %17 : vector<1x128xf32> to vector<16x128xf32>
    %180 = arith.mulf %178, %179 : vector<16x128xf32>
    %181 = arith.addf %177, %180 : vector<16x128xf32>
    %c1_67 = arith.constant 1 : index
    %c0_68 = arith.constant 0 : index
    %c0_69 = arith.constant 0 : index
    %182 = vector.load %arg4[%c1_67, %c0_68, %c0_69] : memref<2x128x128xf32, #tpu.memory_space<vmem>>, vector<1x128x128xf32>
    %183 = vector.shape_cast %182 : vector<1x128x128xf32> to vector<128x128xf32>
    %cst_70 = arith.constant dense<0.000000e+00> : vector<16x128xf32>
    %184 = tpu.matmul %181, %183, %cst_70 {dimension_numbers = #tpu.dot_dimension_numbers<[1], [0], [0], [1], [0, 0, 1, 1], [], []>} : vector<16x128xf32>, vector<128x128xf32>, vector<16x128xf32> -> vector<16x128xf32>
    %185 = arith.addf %116, %184 : vector<16x128xf32>
    %c1_71 = arith.constant 1 : index
    %c0_72 = arith.constant 0 : index
    %c0_73 = arith.constant 0 : index
    %186 = vector.load %arg5[%c1_71, %c0_72, %c0_73] : memref<2x1x128xf32, #tpu.memory_space<vmem>>, vector<1x1x128xf32>
    %187 = vector.shape_cast %186 : vector<1x1x128xf32> to vector<1x128xf32>
    %188 = arith.mulf %185, %185 : vector<16x128xf32>
    %cst_74 = arith.constant dense<0.000000e+00> : vector<16xf32>
    %189 = vector.multi_reduction <add>, %188, %cst_74 [1] : vector<16x128xf32> to vector<16xf32>
    %190 = vector.shape_cast %189 : vector<16xf32> to vector<16x1xf32>
    %cst_75 = arith.constant 1.280000e+02 : f32
    %191 = vector.broadcast %cst_75 : f32 to vector<16x1xf32>
    %192 = arith.divf %190, %191 : vector<16x1xf32>
    %cst_76 = arith.constant 9.99999997E-7 : f32
    %193 = vector.broadcast %cst_76 : f32 to vector<16x1xf32>
    %194 = arith.addf %192, %193 : vector<16x1xf32>
    %195 = math.rsqrt %194 : vector<16x1xf32>
    %196 = vector.broadcast %195 : vector<16x1xf32> to vector<16x128xf32>
    %197 = arith.mulf %185, %196 : vector<16x128xf32>
    %198 = vector.broadcast %187 : vector<1x128xf32> to vector<16x128xf32>
    %199 = arith.mulf %197, %198 : vector<16x128xf32>
    %c1_77 = arith.constant 1 : index
    %c0_78 = arith.constant 0 : index
    %c0_79 = arith.constant 0 : index
    %200 = vector.load %arg6[%c1_77, %c0_78, %c0_79] : memref<2x128x512xf32, #tpu.memory_space<vmem>>, vector<1x128x512xf32>
    %201 = vector.shape_cast %200 : vector<1x128x512xf32> to vector<128x512xf32>
    %cst_80 = arith.constant dense<0.000000e+00> : vector<16x512xf32>
    %202 = tpu.matmul %199, %201, %cst_80 {dimension_numbers = #tpu.dot_dimension_numbers<[1], [0], [0], [1], [0, 0, 1, 1], [], []>} : vector<16x128xf32>, vector<128x512xf32>, vector<16x512xf32> -> vector<16x512xf32>
    %203 = vector.extract_strided_slice %202 {offsets = [0, 0], sizes = [16, 256], strides = [1, 1]} : vector<16x512xf32> to vector<16x256xf32>
    %204 = vector.extract_strided_slice %202 {offsets = [0, 256], sizes = [16, 256], strides = [1, 1]} : vector<16x512xf32> to vector<16x256xf32>
    %205 = arith.negf %203 : vector<16x256xf32>
    %206 = math.exp %205 : vector<16x256xf32>
    %cst_81 = arith.constant 1.000000e+00 : f32
    %207 = vector.broadcast %cst_81 : f32 to vector<16x256xf32>
    %208 = arith.addf %207, %206 : vector<16x256xf32>
    %209 = arith.divf %207, %208 : vector<16x256xf32>
    %210 = arith.mulf %203, %209 : vector<16x256xf32>
    %211 = arith.mulf %210, %204 : vector<16x256xf32>
    %c1_82 = arith.constant 1 : index
    %c0_83 = arith.constant 0 : index
    %c0_84 = arith.constant 0 : index
    %212 = vector.load %arg7[%c1_82, %c0_83, %c0_84] : memref<2x256x128xf32, #tpu.memory_space<vmem>>, vector<1x256x128xf32>
    %213 = vector.shape_cast %212 : vector<1x256x128xf32> to vector<256x128xf32>
    %cst_85 = arith.constant dense<0.000000e+00> : vector<16x128xf32>
    %214 = tpu.matmul %211, %213, %cst_85 {dimension_numbers = #tpu.dot_dimension_numbers<[1], [0], [0], [1], [0, 0, 1, 1], [], []>} : vector<16x256xf32>, vector<256x128xf32>, vector<16x128xf32> -> vector<16x128xf32>
    %215 = arith.addf %185, %214 : vector<16x128xf32>
    %c0_86 = arith.constant 0 : index
    %c0_87 = arith.constant 0 : index
    %216 = vector.load %arg12[%c0_86, %c0_87] : memref<1x128xf32, #tpu.memory_space<vmem>>, vector<1x128xf32>
    %217 = arith.mulf %215, %215 : vector<16x128xf32>
    %cst_88 = arith.constant dense<0.000000e+00> : vector<16xf32>
    %218 = vector.multi_reduction <add>, %217, %cst_88 [1] : vector<16x128xf32> to vector<16xf32>
    %219 = vector.shape_cast %218 : vector<16xf32> to vector<16x1xf32>
    %cst_89 = arith.constant 1.280000e+02 : f32
    %220 = vector.broadcast %cst_89 : f32 to vector<16x1xf32>
    %221 = arith.divf %219, %220 : vector<16x1xf32>
    %cst_90 = arith.constant 9.99999997E-7 : f32
    %222 = vector.broadcast %cst_90 : f32 to vector<16x1xf32>
    %223 = arith.addf %221, %222 : vector<16x1xf32>
    %224 = math.rsqrt %223 : vector<16x1xf32>
    %225 = vector.broadcast %224 : vector<16x1xf32> to vector<16x128xf32>
    %226 = arith.mulf %215, %225 : vector<16x128xf32>
    %227 = vector.broadcast %216 : vector<1x128xf32> to vector<16x128xf32>
    %228 = arith.mulf %226, %227 : vector<16x128xf32>
    %c0_91 = arith.constant 0 : index
    %c0_92 = arith.constant 0 : index
    %229 = vector.load %arg13[%c0_91, %c0_92] : memref<1x128xf32, #tpu.memory_space<vmem>>, vector<1x128xf32>
    %230 = vector.broadcast %229 : vector<1x128xf32> to vector<16x128xf32>
    %231 = arith.mulf %228, %230 : vector<16x128xf32>
    %cst_93 = arith.constant dense<0.000000e+00> : vector<16xf32>
    %232 = vector.multi_reduction <add>, %231, %cst_93 [1] : vector<16x128xf32> to vector<16xf32>
    %233 = vector.shape_cast %232 : vector<16xf32> to vector<16x1xf32>
    %c0_94 = arith.constant 0 : index
    %c0_95 = arith.constant 0 : index
    %234 = vector.load %arg15[%c0_94, %c0_95] : memref<1x1xf32, #tpu.memory_space<vmem>>, vector<1x1xf32>
    %235 = vector.broadcast %234 : vector<1x1xf32> to vector<16x1xf32>
    %236 = arith.addf %233, %235 : vector<16x1xf32>
    %c0_96 = arith.constant 0 : index
    %c0_97 = arith.constant 0 : index
    %237 = vector.load %arg14[%c0_96, %c0_97] : memref<1x128xf32, #tpu.memory_space<vmem>>, vector<1x128xf32>
    %238 = vector.broadcast %237 : vector<1x128xf32> to vector<16x128xf32>
    %239 = arith.mulf %228, %238 : vector<16x128xf32>
    %cst_98 = arith.constant dense<0.000000e+00> : vector<16xf32>
    %240 = vector.multi_reduction <add>, %239, %cst_98 [1] : vector<16x128xf32> to vector<16xf32>
    %241 = vector.shape_cast %240 : vector<16xf32> to vector<16x1xf32>
    %c0_99 = arith.constant 0 : index
    %c0_100 = arith.constant 0 : index
    %242 = vector.load %arg16[%c0_99, %c0_100] : memref<1x1xf32, #tpu.memory_space<vmem>>, vector<1x1xf32>
    %243 = vector.broadcast %242 : vector<1x1xf32> to vector<16x1xf32>
    %244 = arith.addf %241, %243 : vector<16x1xf32>
    %245 = arith.maximumf %236, %244 : vector<16x1xf32>
    %246 = arith.subf %236, %245 : vector<16x1xf32>
    %247 = math.exp %246 : vector<16x1xf32>
    %248 = arith.subf %244, %245 : vector<16x1xf32>
    %249 = math.exp %248 : vector<16x1xf32>
    %250 = arith.addf %247, %249 : vector<16x1xf32>
    %251 = math.log %250 : vector<16x1xf32>
    %252 = arith.addf %245, %251 : vector<16x1xf32>
    %253 = arith.subf %252, %244 : vector<16x1xf32>
    %254 = arith.cmpf ogt, %244, %236 : vector<16x1xf32>
    %255 = arith.extui %254 : vector<16x1xi1> to vector<16x1xi32>
    %256 = arith.sitofp %255 : vector<16x1xi32> to vector<16x1xf32>
    %c0_101 = arith.constant 0 : index
    %c0_102 = arith.constant 0 : index
    %257 = vector.load %arg17[%c0_101, %c0_102] : memref<16x1xf32, #tpu.memory_space<vmem>>, vector<16x1xf32>
    %258 = vector.shape_cast %257 : vector<16x1xf32> to vector<1x16x1xf32>
    %cst_103 = arith.constant dense<0.000000e+00> : vector<1xf32>
    %259 = vector.multi_reduction <add>, %258, %cst_103 [1, 2] : vector<1x16x1xf32> to vector<1xf32>
    %260 = vector.shape_cast %259 : vector<1xf32> to vector<1x1x1xf32>
    %261 = vector.extract %260[0, 0, 0] : f32 from vector<1x1x1xf32>
    %262 = vector.broadcast %261 : f32 to vector<1x1xf32>
    %cst_104 = arith.constant 9.99999993E-9 : f32
    %263 = vector.broadcast %cst_104 : f32 to vector<1x1xf32>
    %264 = arith.addf %262, %263 : vector<1x1xf32>
    %265 = tpu.reciprocal %264 {approx = true} : vector<1x1xf32> -> vector<1x1xf32>
    %266 = arith.mulf %253, %257 : vector<16x1xf32>
    %267 = vector.shape_cast %266 : vector<16x1xf32> to vector<1x16x1xf32>
    %cst_105 = arith.constant dense<0.000000e+00> : vector<1xf32>
    %268 = vector.multi_reduction <add>, %267, %cst_105 [1, 2] : vector<1x16x1xf32> to vector<1xf32>
    %269 = vector.shape_cast %268 : vector<1xf32> to vector<1x1x1xf32>
    %270 = vector.extract %269[0, 0, 0] : f32 from vector<1x1x1xf32>
    %271 = vector.broadcast %270 : f32 to vector<1x1xf32>
    %272 = arith.mulf %271, %265 : vector<1x1xf32>
    %c0_106 = arith.constant 0 : index
    %c0_107 = arith.constant 0 : index
    %273 = vector.load %arg19[%c0_106, %c0_107] : memref<1x1xf32, #tpu.memory_space<vmem>>, vector<1x1xf32>
    tpu.vector_store %arg19[%c0_106, %c0_107], %272 {strides = array<i32>} : memref<1x1xf32, #tpu.memory_space<vmem>>, vector<1x1xf32>,
    %274 = arith.mulf %256, %257 : vector<16x1xf32>
    %275 = vector.shape_cast %274 : vector<16x1xf32> to vector<1x16x1xf32>
    %cst_108 = arith.constant dense<0.000000e+00> : vector<1xf32>
    %276 = vector.multi_reduction <add>, %275, %cst_108 [1, 2] : vector<1x16x1xf32> to vector<1xf32>
    %277 = vector.shape_cast %276 : vector<1xf32> to vector<1x1x1xf32>
    %278 = vector.extract %277[0, 0, 0] : f32 from vector<1x1x1xf32>
    %279 = vector.broadcast %278 : f32 to vector<1x1xf32>
    %280 = arith.mulf %279, %265 : vector<1x1xf32>
    %c0_109 = arith.constant 0 : index
    %c0_110 = arith.constant 0 : index
    %281 = vector.load %arg18[%c0_109, %c0_110] : memref<1x1xf32, #tpu.memory_space<vmem>>, vector<1x1xf32>
    tpu.vector_store %arg18[%c0_109, %c0_110], %280 {strides = array<i32>} : memref<1x1xf32, #tpu.memory_space<vmem>>, vector<1x1xf32>,
    return
  }
}

</mosaic_0001>

<bundles_post_ra>
// kernel: tile.18
= control target key start
LH: loop header
LB: loop body
LE: loop exit
PB: predicated region body
PF: predicated region fallthrough
CT: control target
= control target key end

     0   :  { %s154_s0 = inlined_call_operand.vmem [shape: f32[8,32], index: 0, kind: input, shape index: {}]   ;;  %s155_s1 = inlined_call_operand.vmem [shape: f32[2,8,4,32], index: 1, kind: output, shape index: {}]  }
   0x1   :  { %v4_v0 = vld [vmem:[%s154_s0] ss:$0 sm:$0xff]  ;;  %v51_v1 = vld [vmem:[%s154_s0 + $0x1] ss:$0 sm:$0xff]  ;;  %v54_v2 = vld [vmem:[%s154_s0 + $0x2] ss:$0 sm:$0xff] }
   0x2   :  { %5 = vst [vmem:[%s155_s1] sm:$0xf] %v4_v0  ;;  %50 = vst [vmem:[%s155_s1 + $0x20] sm:$0xf] %v4_v0  ;;  %v57_v3 = vld [vmem:[%s154_s0 + $0x3] ss:$0 sm:$0xff] }
   0x3   :  { %52 = vst [vmem:[%s155_s1 + $0x4] sm:$0xf] %v51_v1  ;;  %53 = vst [vmem:[%s155_s1 + $0x24] sm:$0xf] %v51_v1  ;;  %v60_v4 = vld [vmem:[%s154_s0 + $0x4] ss:$0 sm:$0xff] }
   0x4   :  { %55 = vst [vmem:[%s155_s1 + $0x8] sm:$0xf] %v54_v2  ;;  %56 = vst [vmem:[%s155_s1 + $0x28] sm:$0xf] %v54_v2  ;;  %v63_v5 = vld [vmem:[%s154_s0 + $0x5] ss:$0 sm:$0xff] }
   0x5   :  { %58 = vst [vmem:[%s155_s1 + $0xc] sm:$0xf] %v57_v3  ;;  %59 = vst [vmem:[%s155_s1 + $0x2c] sm:$0xf] %v57_v3  ;;  %v66_v6 = vld [vmem:[%s154_s0 + $0x6] ss:$0 sm:$0xff] }
   0x6   :  { %61 = vst [vmem:[%s155_s1 + $0x10] sm:$0xf] %v60_v4  ;;  %62 = vst [vmem:[%s155_s1 + $0x30] sm:$0xf] %v60_v4  ;;  %v69_v7 = vld [vmem:[%s154_s0 + $0x7] ss:$0 sm:$0xff] }
   0x7   :  { %64 = vst [vmem:[%s155_s1 + $0x14] sm:$0xf] %v63_v5  ;;  %65 = vst [vmem:[%s155_s1 + $0x34] sm:$0xf] %v63_v5 }
   0x8   :  { %67 = vst [vmem:[%s155_s1 + $0x18] sm:$0xf] %v66_v6  ;;  %68 = vst [vmem:[%s155_s1 + $0x38] sm:$0xf] %v66_v6 }
   0x9   :  { %70 = vst [vmem:[%s155_s1 + $0x1c] sm:$0xf] %v69_v7  ;;  %71 = vst [vmem:[%s155_s1 + $0x3c] sm:$0xf] %v69_v7 }

// kernel: tile.19
= control target key start
LH: loop header
LB: loop body
LE: loop exit
PB: predicated region body
PF: predicated region fallthrough
CT: control target
= control target key end

     0   :  { %vm83_vm0 = vcmask 1047556   ;;  %vm85_vm1 = vcmask 261120   ;;  %s196_s9 = smov 96   ;;  %s197_s14 = smov 32   ;;  %vm104_vm2 = vcmask 1048320   ;;  %vm125_vm3 = vcmask 785920   ;;  %s290_s0 = inlined_call_operand.vmem [shape: f32[2,8,4,32], index: 0, kind: input, shape index: {}]   ;;  %s291_s1 = inlined_call_operand.vmem [shape: f32[16,128], index: 1, kind: output, shape index: {}]  }
   0x1   :  { %v181_v0 = vld [vmem:[%s290_s0 + $0x1c] sm:$0xf]  ;;  %v182_v1 = vld [vmem:[%s290_s0 + $0x18] sm:$0xf]  ;;  %v183_v2 = vld [vmem:[%s290_s0 + $0x14] sm:$0xf] }
   0x2   :  { %49 = vst [vmem:[#allocation0 + $0x38] sm:$0xf] %v181_v0  ;;  %54 = vst [vmem:[#allocation0 + $0x30] sm:$0xf] %v182_v1  ;;  %v184_v3 = vld [vmem:[%s290_s0 + $0x10] sm:$0xf] }
   0x3   :  { %59 = vst [vmem:[#allocation0 + $0x28] sm:$0xf] %v183_v2  ;;  %v185_v4 = vld [vmem:[%s290_s0 + $0xc] sm:$0xf]  ;;  %v186_v5 = vld [vmem:[%s290_s0 + $0x8] sm:$0xf] }
   0x4   :  { %64 = vst [vmem:[#allocation0 + $0x20] sm:$0xf] %v184_v3  ;;  %69 = vst [vmem:[#allocation0 + $0x18] sm:$0xf] %v185_v4  ;;  %v187_v6 = vld [vmem:[%s290_s0 + $0x4] sm:$0xf] }
   0x5   :  { %74 = vst [vmem:[#allocation0 + $0x10] sm:$0xf] %v186_v5  ;;  %v79_v7 = vld [vmem:[%s290_s0] sm:$0xf]  ;;  %78 = vst [vmem:[#allocation0 + $0x8] sm:$0xf] %v187_v6 }
   0x6   :  { %80 = vst [vmem:[#allocation0] sm:$0xf] %v79_v7  ;;  %v173_v8 = vld [vmem:[%s290_s0 + $0x3c] sm:$0xf]  ;;  %v174_v9 = vld [vmem:[%s290_s0 + $0x38] sm:$0xf] }
   0x7   :  { %9 = vst [vmem:[#allocation0 + $0x78] sm:$0xf] %v173_v8  ;;  %14 = vst [vmem:[#allocation0 + $0x70] sm:$0xf] %v174_v9  ;;  %v175_v10 = vld [vmem:[%s290_s0 + $0x34] sm:$0xf] }
   0x8   :  { %v176_v11 = vld [vmem:[%s290_s0 + $0x30] sm:$0xf]  ;;  %v177_v12 = vld [vmem:[%s290_s0 + $0x2c] sm:$0xf]  ;;  %19 = vst [vmem:[#allocation0 + $0x68] sm:$0xf] %v175_v10 }
   0x9   :  { %24 = vst [vmem:[#allocation0 + $0x60] sm:$0xf] %v176_v11  ;;  %29 = vst [vmem:[#allocation0 + $0x58] sm:$0xf] %v177_v12  ;;  %v178_v13 = vld [vmem:[%s290_s0 + $0x28] sm:$0xf] }
   0xa   :  { %v179_v14 = vld [vmem:[%s290_s0 + $0x24] sm:$0xf]  ;;  %v180_v15 = vld [vmem:[%s290_s0 + $0x20] sm:$0xf]  ;;  %34 = vst [vmem:[#allocation0 + $0x50] sm:$0xf] %v178_v13 }
   0xb   :  { %39 = vst [vmem:[#allocation0 + $0x48] sm:$0xf] %v179_v14  ;;  %44 = vst [vmem:[#allocation0 + $0x40] sm:$0xf] %v180_v15  ;;  %s195_s0 = smov 64   ;;  %vm146_vm4 = vcmask 523520  }
   0xc   :  { %v120_v16 = vld [vmem:[#allocation0 + $0x2] ss:$8 sm:$0xf0]   ;;  %v99_v17 = vld [vmem:[#allocation0 + $0x3] ss:$8 sm:$0xf0]  }
   0xd   :  { %v118_v18 = vld [vmem:[#allocation0 + $0x2] ss:$8 sm:$0xf]   ;;  %v97_v19 = vld [vmem:[#allocation0 + $0x3] ss:$8 sm:$0xf]  }
   0xe   :  { %v122_v20 = vsel %vm83_vm0, %v120_v16, %v118_v18  ;;  %v101_v21 = vsel %vm83_vm0, %v99_v17, %v97_v19  ;;  %v139_v24 = vld [vmem:[#allocation0 + $0x1] ss:$8 sm:$0xf]   ;;  %v81_v32 = vld [vmem:[#allocation0] ss:$8 sm:$0xf]  }
   0xf   :  { %123 = vrot.lane.b32.xlu1 %v122_v20, %s195_s0  ;;  %102 = vrot.lane.b32.xlu0 %v101_v21, %s196_s9  ;;  %v141_v25 = vld [vmem:[#allocation0 + $0x1] ss:$8 sm:$0xf0]   ;;  %v82_v33 = vld [vmem:[#allocation0] ss:$8 sm:$0xf0]  }
  0x10   :  { %v130_v22 = vld [vmem:[#allocation0 + $0x42] ss:$8 sm:$0xf0]   ;;  %v109_v23 = vld [vmem:[#allocation0 + $0x43] ss:$8 sm:$0xf0]   ;;  %v84_v34 = vsel %vm83_vm0, %v82_v33, %v81_v32  ;;  %v143_v38 = vsel %vm83_vm0, %v141_v25, %v139_v24 }
  0x11   :  { %v151_v31 = vld [vmem:[#allocation0 + $0x41] ss:$8 sm:$0xf0]   ;;  %v90_v36 = vld [vmem:[#allocation0 + $0x40] ss:$8 sm:$0xf0]  }
  0x12   :  { %v128_v26 = vld [vmem:[#allocation0 + $0x42] ss:$8 sm:$0xf]   ;;  %v107_v27 = vld [vmem:[#allocation0 + $0x43] ss:$8 sm:$0xf]  }
  0x13   :  { %v132_v28 = vsel %vm83_vm0, %v130_v22, %v128_v26  ;;  %v111_v29 = vsel %vm83_vm0, %v109_v23, %v107_v27  ;;  %v149_v30 = vld [vmem:[#allocation0 + $0x41] ss:$8 sm:$0xf]   ;;  %v88_v35 = vld [vmem:[#allocation0 + $0x40] ss:$8 sm:$0xf]  }
  0x14   :  { %133 = vrot.lane.b32.xlu1 %v132_v28, %s195_s0  ;;  %112 = vrot.lane.b32.xlu0 %v111_v29, %s196_s9  ;;  %v153_v37 = vsel %vm83_vm0, %v151_v31, %v149_v30  ;;  %86 = vst.msk [vmem:[%s291_s1] sm:$0xff] %vm85_vm1, %v84_v34   ;;  %v92_v39 = vsel %vm83_vm0, %v90_v36, %v88_v35 }
  0x15   :  { %188 = vst.msk [vmem:[%s291_s1 + $0x8] sm:$0xff] %vm85_vm1, %v92_v39  }
  0x18   :  { %154 = vrot.lane.b32.xlu1 %v153_v37, %s197_s14  ;;  %144 = vrot.lane.b32.xlu0 %v143_v38, %s197_s14 }
  0x81   :  { %v124_v40 = vpop.permute.xlu1 %123   ;;  %v103_v41 = vpop.permute.xlu0 %102  }
  0x82   :  { %105 = vst.msk [vmem:[%s291_s1] sm:$0xff] %vm104_vm2, %v103_v41  }
  0x83   :  { %126 = vst.msk [vmem:[%s291_s1] sm:$0xff] %vm125_vm3, %v124_v40  }
  0x86   :  { %v134_v42 = vpop.permute.xlu1 %133   ;;  %v113_v43 = vpop.permute.xlu0 %112  }
  0x87   :  { %189 = vst.msk [vmem:[%s291_s1 + $0x8] sm:$0xff] %vm104_vm2, %v113_v43  }
  0x88   :  { %190 = vst.msk [vmem:[%s291_s1 + $0x8] sm:$0xff] %vm125_vm3, %v134_v42  }
  0x8a   :  { %v155_v44 = vpop.permute.xlu1 %154   ;;  %v145_v45 = vpop.permute.xlu0 %144  }
  0x8b   :  { %191 = vst.msk [vmem:[%s291_s1 + $0x8] sm:$0xff] %vm146_vm4, %v155_v44   ;;  %147 = vst.msk [vmem:[%s291_s1] sm:$0xff] %vm146_vm4, %v145_v45  }

// kernel: llama_discriminator_forward.1
= control target key start
LH: loop header
LB: loop body
LE: loop exit
PB: predicated region body
PF: predicated region fallthrough
CT: control target
= control target key end

     0   :  { %s4633_s0 = inlined_call_operand.vmem [shape: f32[16,128], index: 0, kind: input, shape index: {}]   ;;  %s4634_s1 = inlined_call_operand.hbm [shape: f32[128,128], index: 1, kind: input, shape index: {}]   ;;  %s4635_s2 = inlined_call_operand.vmem [shape: f32[2,1,128], index: 2, kind: input, shape index: {}]   ;;  %s4636_s3 = inlined_call_operand.vmem [shape: f32[2,128,640], index: 3, kind: input, shape index: {}]   ;;  %s4637_s4 = inlined_call_operand.hbm [shape: f32[2,128,128], index: 4, kind: input, shape index: {}]   ;;  %s4638_s5 = inlined_call_operand.vmem [shape: f32[2,1,128], index: 5, kind: input, shape index: {}]   ;;  %s4639_s6 = inlined_call_operand.hbm [shape: f32[2,128,512], index: 6, kind: input, shape index: {}]   ;;  %s4640_s7 = inlined_call_operand.hbm [shape: f32[2,256,128], index: 7, kind: input, shape index: {}]   ;;  %s4641_s8 = inlined_call_operand.vmem [shape: f32[16,128], index: 8, kind: input, shape index: {}]   ;;  %s4642_s9 = inlined_call_operand.vmem [shape: f32[16,128], index: 9, kind: input, shape index: {}]   ;;  %s4643_s10 = inlined_call_operand.vmem [shape: f32[64,16], index: 10, kind: input, shape index: {}]   ;;  %s4644_s11 = inlined_call_operand.vmem [shape: f32[4,1,128], index: 11, kind: input, shape index: {}]   ;;  %s4645_s12 = inlined_call_operand.vmem [shape: f32[1,128], index: 12, kind: input, shape index: {}]   ;;  %s4646_s13 = inlined_call_operand.hbm [shape: f32[1,128], index: 13, kind: input, shape index: {}]   ;;  %s4647_s14 = inlined_call_operand.hbm [shape: f32[1,128], index: 14, kind: input, shape index: {}]   ;;  %s4648_s15 = inlined_call_operand.<no memory space> [shape: f32[1,1], index: 15, kind: input, shape index: {}]   ;;  %s4649_s17 = inlined_call_operand.vmem [shape: f32[16,1], index: 17, kind: input, shape index: {}]   ;;  %s4650_s18 = inlined_call_operand.hbm [shape: f32[1,1], index: 18, kind: output, shape index: {0}]   ;;  %s4651_s19 = inlined_call_operand.hbm [shape: f32[1,1], index: 19, kind: output, shape index: {1}]   ;;  %s4652_s16 = inlined_call_operand.<no memory space> [shape: f32[1,1], index: 16, kind: input, shape index: {}]  }
   0x1   :  { %4656 = sst [smem:[#allocation24_spill]] %s4633_s0  ;;  %v25_v0 = vstv %s4648_s15  ;;  %v27_v1 = vstv %s4652_s16 }
   0x2   :  { %4657 = sst [smem:[#allocation25_spill]] %s4634_s1  ;;  %26 = vst [vmem:[#allocation2] sm:$0x1] %v25_v0  ;;  %28 = vst [vmem:[#allocation3] sm:$0x1] %v27_v1 }
   0x3   :  { %4658 = sst [smem:[#allocation26_spill]] %s4635_s2 }
   0x4   :  { %4659 = sst [smem:[#allocation27_spill]] %s4636_s3 }
   0x5   :  { %29 = vsyncpa [#allocation5], 0 }
   0x6   :  { %30 = vsyncpa [#allocation8], 0 }
   0x7   :  { %31 = vsyncpa [#allocation11], 0 }
   0x8   :  { %32 = vsyncpa [#allocation14], 0 }
   0x9   :  { %33 = vsyncpa [#allocation6], 0 }
   0xa   :  { %34 = vsyncpa [#allocation17], 0  ;;  %s3709_s1 = smov [#allocation7]   ;;  %s3710_s2 = smov [#allocation10]  }
   0xb   :  { %s58_s22 = sshll.u32 %s3709_s1, 4  ;;  %s84_s23 = sshll.u32 %s3710_s2, 4  ;;  %s59_s22 = int_to_ptr.vmem [resolvable:$true] %s58_s22  ;;  %s85_s23 = int_to_ptr.vmem [resolvable:$true] %s84_s23 }
   0xc   :  { %s3545_s24 = scalar_lea.vmem %s59_s22, 4096  ;;  %p3550_p1 = scmp.lt.s32.totalorder %s59_s22, %s59_s22 }
   0xd   :  { %p3546_p0 = scmp.ne.s32.totalorder %s59_s22, %s3545_s24  ;;  %p3551_p2 = scmp.lt.s32.totalorder %s3545_s24, %s3545_s24 }
   0xf   :  { %p3552_p3 = por %p3551_p2, %p3550_p1 }
  0x11   :  { %p3553_p4 = pnand %p3552_p3, %p3546_p0 }
  0x13   :  { %3556 = shalt.err (!%p3553_p4)
}
  0x14   :  { %s3711_s15 = smov 128   ;;  %s3712_s16 = smov 8  }
  0x15   :  { %64 = dma.hbm_to_vmem [thread:$0]  %s4637_s4, 4096, %s59_s22, [#allocation8], %s3711_s15, %s3711_s15, %s3712_s16  }
  0x16   :  { %s3565_s26 = scalar_lea.vmem %s85_s23, 8192  ;;  %p3570_p6 = scmp.lt.s32.totalorder %s85_s23, %s85_s23 }
  0x17   :  { %p3566_p5 = scmp.ne.s32.totalorder %s85_s23, %s3565_s26  ;;  %p3571_p7 = scmp.lt.s32.totalorder %s3565_s26, %s3565_s26 }
  0x19   :  { %p3572_p8 = por %p3571_p7, %p3570_p6 }
  0x1b   :  { %p3573_p9 = pnand %p3572_p8, %p3566_p5 }
  0x1d   :  { %3576 = shalt.err (!%p3573_p9)
}
  0x1e   :  { %90 = dma.hbm_to_vmem [thread:$0]  %s4640_s7, 8192, %s85_s23, [#allocation11], %s3711_s15, %s3711_s15, %s3712_s16  }
  0x1f   :  { %s3713_s29 = smov [#allocation4]   ;;  %s3714_s30 = smov [#allocation9]  }
  0x20   :  { %s42_s0 = sshll.u32 %s3713_s29, 4  ;;  %s72_s20 = sshll.u32 %s3714_s30, 4  ;;  %s43_s0 = int_to_ptr.vmem [resolvable:$true] %s42_s0  ;;  %s73_s20 = int_to_ptr.vmem [resolvable:$true] %s72_s20 }
  0x21   :  { %s3585_s21 = scalar_lea.vmem %s43_s0, 2048  ;;  %p3590_p11 = scmp.lt.s32.totalorder %s43_s0, %s43_s0 }
  0x22   :  { %p3586_p10 = scmp.ne.s32.totalorder %s43_s0, %s3585_s21  ;;  %p3591_p12 = scmp.lt.s32.totalorder %s3585_s21, %s3585_s21 }
  0x24   :  { %p3592_p13 = por %p3591_p12, %p3590_p11 }
  0x26   :  { %p3593_p0 = pnand %p3592_p13, %p3586_p10 }
  0x28   :  { %3596 = shalt.err (!%p3593_p0)
}
  0x29   :  { %s4660_s22 = sld [smem:[#allocation25_spill]]  ;;  %s3605_s2 = scalar_lea.vmem %s73_s20, 16384 }
  0x2a   :  { %p3606_p1 = scmp.ne.s32.totalorder %s73_s20, %s3605_s2  ;;  %p3610_p2 = scmp.lt.s32.totalorder %s73_s20, %s73_s20 }
  0x2b   :  { %p3611_p3 = scmp.lt.s32.totalorder %s3605_s2, %s3605_s2 }
  0x2d   :  { %p3612_p4 = por %p3611_p3, %p3610_p2 }
  0x2f   :  { %48 = dma.hbm_to_vmem [thread:$0]  %s4660_s22, 2048, %s43_s0, [#allocation5], %s3711_s15, %s3711_s15, %s3712_s16  }
  0x30   :  { %p3613_p5 = pnand %p3612_p4, %p3606_p1 }
  0x32   :  { %3616 = shalt.err (!%p3613_p5)
}
  0x33   :  { %s3715_s7 = smov 512   ;;  %s3716_s23 = smov 32  }
  0x34   :  { %78 = dma.hbm_to_vmem [thread:$0]  %s4639_s6, 16384, %s73_s20, [#allocation8], %s3715_s7, %s3715_s7, %s3716_s23  }
  0x35   :  { %s3717_s3 = smov [#allocation12]   ;;  %s3718_s27 = smov [#allocation13]  }
  0x36   :  { %s107_s26 = sshll.u32 %s3717_s3, 4  ;;  %s117_s28 = sshll.u32 %s3718_s27, 4  ;;  %s108_s26 = int_to_ptr.vmem [resolvable:$true] %s107_s26  ;;  %s118_s28 = int_to_ptr.vmem [resolvable:$true] %s117_s28 }
  0x37   :  { %s3625_s15 = scalar_lea.vmem %s108_s26, 16  ;;  %s3629_s16 = scalar_lea.vmem %s108_s26, 32 }
  0x38   :  { %p3626_p6 = scmp.ne.s32.totalorder %s108_s26, %s3625_s15  ;;  %p3630_p7 = scmp.lt.s32.totalorder %s108_s26, %s108_s26 }
  0x39   :  { %p3631_p8 = scmp.lt.s32.totalorder %s3629_s16, %s3625_s15 }
  0x3b   :  { %p3632_p9 = por %p3631_p8, %p3630_p7 }
  0x3d   :  { %p3633_p10 = pnand %p3632_p9, %p3626_p6 }
  0x3f   :  { %3636 = shalt.err (!%p3633_p10)
}
  0x40   :  { %110 = dma.hbm_to_vmem [thread:$0]  %s4646_s13, 16, %s108_s26, [#allocation11]  }
  0x41   :  { %s3645_s30 = scalar_lea.vmem %s118_s28, 16  ;;  %s3649_s6 = scalar_lea.vmem %s118_s28, 32 }
  0x42   :  { %p3646_p11 = scmp.ne.s32.totalorder %s118_s28, %s3645_s30  ;;  %p3650_p12 = scmp.lt.s32.totalorder %s118_s28, %s118_s28 }
  0x43   :  { %p3651_p13 = scmp.lt.s32.totalorder %s3649_s6, %s3645_s30 }
  0x45   :  { %p3652_p0 = por %p3651_p13, %p3650_p12 }
  0x47   :  { %p3653_p1 = pnand %p3652_p0, %p3646_p11 }
  0x49   :  { %3656 = shalt.err (!%p3653_p1)
}
  0x4a   :  { %120 = dma.hbm_to_vmem [thread:$0]  %s4647_s14, 16, %s118_s28, [#allocation14]  }
  0x4b   :  { %3697 = dma.done.wait [#allocation5], 2048  }
  0x4c   :  { %3698 = vsyncadd [#allocation5], 4294965248 }
  0x4d   :  { %3699 = dma.done.wait [#allocation8], 20480  }
  0x4e   :  { %3700 = vsyncadd [#allocation8], 4294946816 }
  0x4f   :  { %3701 = dma.done.wait [#allocation11], 8208  }
  0x50   :  { %3702 = vsyncadd [#allocation11], 4294959088 }
  0x51   :  { %3703 = dma.done.wait [#allocation14], 16  }
  0x52   :  { %3704 = vsyncadd [#allocation14], 4294967280  ;;  %v166_v2 = vld [vmem:[#allocation4 + $0x78] sm:$0xff]  ;;  %v165_v3 = vld [vmem:[#allocation4 + $0x70] sm:$0xff]  ;;  %s4661_s14 = sld [smem:[#allocation24_spill]]  ;;  %vm743_vm0 = vcmask 130048  }
  0x53   :  { %3133 = vmatprep.subr.mxu0 %v166_v2  ;;  %v164_v4 = vld [vmem:[#allocation4 + $0x68] sm:$0xff]  ;;  %v163_v5 = vld [vmem:[#allocation4 + $0x60] sm:$0xff]  ;;  %v162_v7 = vld [vmem:[#allocation4 + $0x58] sm:$0xff]  ;;  %s4662_s23 = sld [smem:[#allocation27_spill]]  ;;  %vm2718_vm1 = vcmask 7168   ;;  %s3721_s24 = smov [#allocation15]  }
  0x54   :  { %3134 = vmatpush3.msra.mxu0 %v166_v2  ;;  %v161_v9 = vld [vmem:[#allocation4 + $0x50] sm:$0xff]  ;;  %v160_v11 = vld [vmem:[#allocation4 + $0x48] sm:$0xff]  ;;  %v159_v12 = vld [vmem:[#allocation4 + $0x40] sm:$0xff]  ;;  %s4663_s27 = sld [smem:[#allocation26_spill]]  ;;  %s2775_s25 = sshll.u32 %s3721_s24, 4  ;;  %vm2750_vm4 = vcmask 0   ;;  %s2776_s25 = int_to_ptr.vmem [resolvable:$true] %s2775_s25 }
  0x55   :  { %3135 = vmatprep.subr.mxu0 %v165_v3  ;;  %v158_v13 = vld [vmem:[#allocation4 + $0x38] sm:$0xff]  ;;  %v157_v14 = vld [vmem:[#allocation4 + $0x30] sm:$0xff]  ;;  %v156_v15 = vld [vmem:[#allocation4 + $0x28] sm:$0xff] }
  0x56   :  { %3136 = vmatpush3.msra.mxu0 %v165_v3  ;;  %v155_v16 = vld [vmem:[#allocation4 + $0x20] sm:$0xff]  ;;  %v154_v17 = vld [vmem:[#allocation4 + $0x18] sm:$0xff]  ;;  %v153_v19 = vld [vmem:[#allocation4 + $0x10] sm:$0xff] }
  0x57   :  { %3137 = vmatprep.subr.mxu0 %v164_v4  ;;  %v152_v21 = vld [vmem:[#allocation4 + $0x8] sm:$0xff]  ;;  %v151_v22 = vld [vmem:[#allocation4] sm:$0xff] }
  0x58   :  { %v145_v6 = vld [vmem:[%s4661_s14] sm:$0xff]  ;;  %3138 = vmatpush3.msra.mxu0 %v164_v4  ;;  %v146_v18 = vld [vmem:[%s4661_s14 + $0x8] sm:$0xff] }
  0x59   :  { %v147_v8 = vmul.f32 2.0, %v145_v6  ;;  %3139 = vmatprep.subr.mxu0 %v163_v5  ;;  %v148_v20 = vmul.f32 2.0, %v146_v18  ;;  %v361_v24 = vld [vmem:[%s4662_s23 + $0x260] sm:$0xff]  ;;  %v360_v25 = vld [vmem:[%s4662_s23 + $0x258] sm:$0xff]  ;;  %v363_v26 = vld [vmem:[%s4662_s23 + $0x270] sm:$0xff] }
  0x5a   :  { %3140 = vmatpush3.msra.mxu0 %v163_v5  ;;  %365 = vmatprep.subr.mxu1 %v361_v24  ;;  %v356_v27 = vld [vmem:[%s4662_s23 + $0x238] sm:$0xff]  ;;  %v362_v28 = vld [vmem:[%s4662_s23 + $0x268] sm:$0xff]  ;;  %v355_v29 = vld [vmem:[%s4662_s23 + $0x230] sm:$0xff] }
  0x5b   :  { %v2801_v10 = vadd.f32 -1.0, %v147_v8  ;;  %3141 = vmatprep.subr.mxu0 %v162_v7  ;;  %v2802_v23 = vadd.f32 -1.0, %v148_v20  ;;  %366 = vmatpush1.msra.mxu1 %v360_v25  ;;  %v358_v30 = vld [vmem:[%s4662_s23 + $0x248] sm:$0xff]  ;;  %v351_v31 = vld [vmem:[%s4662_s23 + $0x210] sm:$0xff]  ;;  %v357_v32 = vld [vmem:[%s4662_s23 + $0x240] sm:$0xff] }
  0x5c   :  { %3142 = vmatpush3.msra.mxu0 %v162_v7  ;;  %367 = vmatprep.subr.mxu1 %v356_v27  ;;  %v350_v33 = vld [vmem:[%s4662_s23 + $0x208] sm:$0xff]  ;;  %v353_v34 = vld [vmem:[%s4662_s23 + $0x220] sm:$0xff]  ;;  %v352_v36 = vld [vmem:[%s4662_s23 + $0x218] sm:$0xff] }
  0x5d   :  { %3165 = vmatprep.mubr.f32.mxu0 %v2801_v10  ;;  %3143 = vmatprep.subr.mxu0 %v161_v9  ;;  %v346_v35 = vld [vmem:[%s4662_s23 + $0x1e8] sm:$0xff]  ;;  %v348_v37 = vld [vmem:[%s4662_s23 + $0x1f8] sm:$0xff]  ;;  %v345_v38 = vld [vmem:[%s4662_s23 + $0x1e0] sm:$0xff] }
  0x5e   :  { %3144 = vmatpush3.msra.mxu0 %v161_v9  ;;  %368 = vmatpush1.msra.mxu1 %v355_v29  ;;  %v347_v39 = vld [vmem:[%s4662_s23 + $0x1f0] sm:$0xff]  ;;  %v341_v40 = vld [vmem:[%s4662_s23 + $0x1c0] sm:$0xff]  ;;  %v340_v42 = vld [vmem:[%s4662_s23 + $0x1b8] sm:$0xff]  ;;  %v3719_v29 = vmov 0.0  }
  0x5f   :  { %3145 = vmatprep.subr.mxu0 %v160_v11  ;;  %369 = vmatprep.subr.mxu1 %v351_v31  ;;  %v343_v41 = vld [vmem:[%s4662_s23 + $0x1d0] sm:$0xff]  ;;  %v342_v43 = vld [vmem:[%s4662_s23 + $0x1c8] sm:$0xff]  ;;  %v336_v44 = vld [vmem:[%s4662_s23 + $0x198] sm:$0xff] }
  0x60   :  { %3146 = vmatpush3.msra.mxu0 %v160_v11  ;;  %370 = vmatpush1.msra.mxu1 %v350_v33  ;;  %v335_v49 = vld [vmem:[%s4662_s23 + $0x190] sm:$0xff]  ;;  %v338_v50 = vld [vmem:[%s4662_s23 + $0x1a8] sm:$0xff]  ;;  %v337_v52 = vld [vmem:[%s4662_s23 + $0x1a0] sm:$0xff] }
  0x61   :  { %3147 = vmatprep.subr.mxu0 %v159_v12  ;;  %371 = vmatprep.subr.mxu1 %v346_v35  ;;  %v331_v51 = vld [vmem:[%s4662_s23 + $0x170] sm:$0xff]  ;;  %v330_v53 = vld [vmem:[%s4662_s23 + $0x168] sm:$0xff]  ;;  %v333_v54 = vld [vmem:[%s4662_s23 + $0x180] sm:$0xff] }
  0x62   :  { %3148 = vmatpush3.msra.mxu0 %v159_v12  ;;  %372 = vmatpush1.msra.mxu1 %v345_v38  ;;  %v326_v55 = vld [vmem:[%s4662_s23 + $0x148] sm:$0xff]  ;;  %v332_v56 = vld [vmem:[%s4662_s23 + $0x178] sm:$0xff]  ;;  %v325_v57 = vld [vmem:[%s4662_s23 + $0x140] sm:$0xff] }
  0x63   :  { %3149 = vmatprep.subr.mxu0 %v158_v13  ;;  %373 = vmatprep.subr.mxu1 %v341_v40  ;;  %v328_v58 = vld [vmem:[%s4662_s23 + $0x158] sm:$0xff]  ;;  %v321_v59 = vld [vmem:[%s4662_s23 + $0x120] sm:$0xff]  ;;  %v327_v60 = vld [vmem:[%s4662_s23 + $0x150] sm:$0xff] }
  0x64   :  { %3150 = vmatpush3.msra.mxu0 %v158_v13  ;;  %374 = vmatpush1.msra.mxu1 %v340_v42  ;;  %v320_v61 = vld [vmem:[%s4662_s23 + $0x118] sm:$0xff]  ;;  %v323_v62 = vld [vmem:[%s4662_s23 + $0x130] sm:$0xff]  ;;  %v322_v0 = vld [vmem:[%s4662_s23 + $0x128] sm:$0xff] }
  0x65   :  { %3151 = vmatprep.subr.mxu0 %v157_v14  ;;  %375 = vmatprep.subr.mxu1 %v336_v44  ;;  %v316_v63 = vld [vmem:[%s4662_s23 + $0xf8] sm:$0xff]  ;;  %v315_v1 = vld [vmem:[%s4662_s23 + $0xf0] sm:$0xff]  ;;  %v318_v2 = vld [vmem:[%s4662_s23 + $0x108] sm:$0xff] }
  0x66   :  { %3152 = vmatpush3.msra.mxu0 %v157_v14  ;;  %376 = vmatpush1.msra.mxu1 %v335_v49  ;;  %v311_v3 = vld [vmem:[%s4662_s23 + $0xd0] sm:$0xff]  ;;  %v317_v4 = vld [vmem:[%s4662_s23 + $0x100] sm:$0xff]  ;;  %v310_v5 = vld [vmem:[%s4662_s23 + $0xc8] sm:$0xff] }
  0x67   :  { %3153 = vmatprep.subr.mxu0 %v156_v15  ;;  %377 = vmatprep.subr.mxu1 %v331_v51  ;;  %v313_v6 = vld [vmem:[%s4662_s23 + $0xe0] sm:$0xff]  ;;  %v306_v7 = vld [vmem:[%s4662_s23 + $0xa8] sm:$0xff]  ;;  %v312_v8 = vld [vmem:[%s4662_s23 + $0xd8] sm:$0xff] }
  0x68   :  { %3154 = vmatpush3.msra.mxu0 %v156_v15  ;;  %378 = vmatpush1.msra.mxu1 %v330_v53  ;;  %v305_v9 = vld [vmem:[%s4662_s23 + $0xa0] sm:$0xff]  ;;  %v308_v10 = vld [vmem:[%s4662_s23 + $0xb8] sm:$0xff]  ;;  %v307_v12 = vld [vmem:[%s4662_s23 + $0xb0] sm:$0xff] }
  0x69   :  { %3155 = vmatprep.subr.mxu0 %v155_v16  ;;  %379 = vmatprep.subr.mxu1 %v326_v55  ;;  %v301_v11 = vld [vmem:[%s4662_s23 + $0x80] sm:$0xff]  ;;  %v300_v13 = vld [vmem:[%s4662_s23 + $0x78] sm:$0xff]  ;;  %v303_v14 = vld [vmem:[%s4662_s23 + $0x90] sm:$0xff] }
  0x6a   :  { %3156 = vmatpush3.msra.mxu0 %v155_v16  ;;  %380 = vmatpush1.msra.mxu1 %v325_v57  ;;  %v296_v15 = vld [vmem:[%s4662_s23 + $0x58] sm:$0xff]  ;;  %v302_v16 = vld [vmem:[%s4662_s23 + $0x88] sm:$0xff]  ;;  %v297_v20 = vld [vmem:[%s4662_s23 + $0x60] sm:$0xff] }
  0x6b   :  { %3157 = vmatprep.subr.mxu0 %v154_v17  ;;  %381 = vmatprep.subr.mxu1 %v321_v59  ;;  %v298_v18 = vld [vmem:[%s4662_s23 + $0x68] sm:$0xff]  ;;  %v292_v24 = vld [vmem:[%s4662_s23 + $0x38] sm:$0xff]  ;;  %v285_v25 = vld [vmem:[%s4662_s23] sm:$0xff] }
  0x6c   :  { %3158 = vmatpush3.msra.mxu0 %v154_v17  ;;  %382 = vmatpush1.msra.mxu1 %v320_v61  ;;  %v295_v17 = vld [vmem:[%s4662_s23 + $0x50] sm:$0xff]  ;;  %v329_v51 = vld [vmem:[%s4662_s23 + $0x160] sm:$0xff] }
  0x6d   :  { %3159 = vmatprep.subr.mxu0 %v153_v19  ;;  %383 = vmatprep.subr.mxu1 %v316_v63  ;;  %v287_v27 = vld [vmem:[%s4662_s23 + $0x10] sm:$0xff]  ;;  %v309_v55 = vld [vmem:[%s4662_s23 + $0xc0] sm:$0xff] }
  0x6e   :  { %3160 = vmatpush3.msra.mxu0 %v153_v19  ;;  %384 = vmatpush1.msra.mxu1 %v315_v1  ;;  %v291_v19 = vld [vmem:[%s4662_s23 + $0x30] sm:$0xff]  ;;  %v289_v59 = vld [vmem:[%s4662_s23 + $0x20] sm:$0xff] }
  0x6f   :  { %3161 = vmatprep.subr.mxu0 %v152_v21  ;;  %385 = vmatprep.subr.mxu1 %v311_v3  ;;  %v339_v49 = vld [vmem:[%s4662_s23 + $0x1b0] sm:$0xff]  ;;  %v244_v63 = vld [vmem:[%s4642_s9] sm:$0xff] }
  0x70   :  { %3162 = vmatpush3.msra.mxu0 %v152_v21  ;;  %386 = vmatpush1.msra.mxu1 %v310_v5  ;;  %v290_v21 = vld [vmem:[%s4662_s23 + $0x28] sm:$0xff]  ;;  %v319_v53 = vld [vmem:[%s4662_s23 + $0x110] sm:$0xff]  ;;  %v4118_v3 = vld [vmem:[%s4644_s11] ss:$0 sm:$0xff] }
  0x71   :  { %3163 = vmatprep.subr.mxu0 %v151_v22  ;;  %387 = vmatprep.subr.mxu1 %v306_v7  ;;  %v299_v57 = vld [vmem:[%s4662_s23 + $0x70] sm:$0xff] }
  0x72   :  { %3164 = vmatpush3.msra.mxu0 %v151_v22  ;;  %388 = vmatpush1.msra.mxu1 %v305_v9  ;;  %v293_v22 = vld [vmem:[%s4662_s23 + $0x40] sm:$0xff] }
  0x73   :  { %3166 = vmatmul.mubr.f32.vlgmr.msra.gmra.mxu0 %v2802_v23  ;;  %442 = vmatprep.subr.mxu0 %v363_v26  ;;  %v286_v23 = vld [vmem:[%s4662_s23 + $0x8] sm:$0xff]  ;;  %v288_v26 = vld [vmem:[%s4662_s23 + $0x18] sm:$0xff] }
  0x74   :  { %443 = vmatpush1.msra.mxu0 %v362_v28  ;;  %389 = vmatprep.subr.mxu1 %v301_v11  ;;  %v364_v28 = vld [vmem:[%s4662_s23 + $0x278] sm:$0xff]  ;;  %v245_v11 = vld [vmem:[%s4642_s9 + $0x8] sm:$0xff] }
  0x75   :  { %444 = vmatprep.subr.mxu0 %v358_v30  ;;  %390 = vmatpush1.msra.mxu1 %v300_v13 }
  0x76   :  { %445 = vmatpush1.msra.mxu0 %v357_v32  ;;  %391 = vmatprep.subr.mxu1 %v296_v15 }
  0x77   :  { %446 = vmatprep.subr.mxu0 %v353_v34  ;;  %392 = vmatpush1.msra.mxu1 %v295_v17 }
  0x78   :  { %447 = vmatpush1.msra.mxu0 %v352_v36  ;;  %393 = vmatprep.subr.mxu1 %v291_v19 }
  0x79   :  { %448 = vmatprep.subr.mxu0 %v348_v37  ;;  %394 = vmatpush1.msra.mxu1 %v290_v21  ;;  %v2806_v37 = vld [vmem:[%s4663_s27] ss:$0 sm:$0xff] }
  0x7a   :  { %449 = vmatpush1.msra.mxu0 %v347_v39  ;;  %395 = vmatprep.subr.mxu1 %v286_v23 }
  0x7b   :  { %450 = vmatprep.subr.mxu0 %v343_v41  ;;  %396 = vmatpush1.msra.mxu1 %v285_v25  ;;  %v359_v41 = vld [vmem:[%s4662_s23 + $0x250] sm:$0xff] }
  0x7c   :  { %451 = vmatpush1.msra.mxu0 %v342_v43  ;;  %429 = vmatprep.mubr.f32.mxu1 %v3719_v29  ;;  %v354_v43 = vld [vmem:[%s4662_s23 + $0x228] sm:$0xff] }
  0x7d   :  { %452 = vmatprep.subr.mxu0 %v338_v50  ;;  %506 = vmatprep.mubr.f32.mxu0 %v3719_v29  ;;  %v334_v50 = vld [vmem:[%s4662_s23 + $0x188] sm:$0xff] }
  0x7e   :  { %453 = vmatpush1.msra.mxu0 %v337_v52  ;;  %3168 = vmatprep.subr.mxu1 %v364_v28  ;;  %v324_v52 = vld [vmem:[%s4662_s23 + $0x138] sm:$0xff] }
  0x7f   :  { %454 = vmatprep.subr.mxu0 %v333_v54  ;;  %v314_v54 = vld [vmem:[%s4662_s23 + $0xe8] sm:$0xff] }
  0x80   :  { %455 = vmatpush1.msra.mxu0 %v332_v56  ;;  %v304_v56 = vld [vmem:[%s4662_s23 + $0x98] sm:$0xff] }
  0x81   :  { %456 = vmatprep.subr.mxu0 %v328_v58  ;;  %v294_v58 = vld [vmem:[%s4662_s23 + $0x48] sm:$0xff] }
  0x82   :  { %457 = vmatpush1.msra.mxu0 %v327_v60  ;;  %v242_v60 = vld [vmem:[%s4641_s8] sm:$0xff] }
  0x83   :  { %458 = vmatprep.subr.mxu0 %v323_v62 }
  0x84   :  { %459 = vmatpush1.msra.mxu0 %v322_v0 }
  0x85   :  { %460 = vmatprep.subr.mxu0 %v318_v2 }
  0x86   :  { %461 = vmatpush1.msra.mxu0 %v317_v4 }
  0x87   :  { %462 = vmatprep.subr.mxu0 %v313_v6 }
  0x88   :  { %463 = vmatpush1.msra.mxu0 %v312_v8 }
  0x89   :  { %464 = vmatprep.subr.mxu0 %v308_v10  ;;  %v243_v10 = vld [vmem:[%s4641_s8 + $0x8] sm:$0xff] }
  0x8a   :  { %465 = vmatpush1.msra.mxu0 %v307_v12 }
  0x8b   :  { %466 = vmatprep.subr.mxu0 %v303_v14 }
  0x8c   :  { %467 = vmatpush1.msra.mxu0 %v302_v16 }
  0x8d   :  { %468 = vmatprep.subr.mxu0 %v298_v18 }
  0x8e   :  { %469 = vmatpush1.msra.mxu0 %v297_v20 }
  0x8f   :  { %470 = vmatprep.subr.mxu0 %v293_v22 }
  0x90   :  { %471 = vmatpush1.msra.mxu0 %v292_v24  ;;  %v4130_v24 = vld [vmem:[%s4644_s11 + $0x1] ss:$0 sm:$0xff] }
  0x91   :  { %472 = vmatprep.subr.mxu0 %v288_v26 }
  0x92   :  { %473 = vmatpush1.msra.mxu0 %v287_v27  ;;  %v4137_v27 = vld [vmem:[%s4644_s11 + $0x2] ss:$0 sm:$0xff] }
 0x133   :  { %v3915_v45 = vpop.f32.mrf.mxu0 }
 0x134   :  { %v263_v48 = vmul.f32 %v3915_v45, %v3915_v45 }
 0x135   :  { %v3917_v46 = vpop.f32.mrf.mxu0 }
 0x136   :  { %v262_v47 = vmul.f32 %v3917_v46, %v3917_v46 }
 0x138   :  { %264 = vadd.xlane.f32.xlu0 %v262_v47  ;;  %v349_v47 = vld [vmem:[%s4662_s23 + $0x200] sm:$0xff] }
 0x13c   :  { %266 = vadd.xlane.f32.xlu0 %v263_v48  ;;  %v344_v48 = vld [vmem:[%s4662_s23 + $0x1d8] sm:$0xff] }
 0x1c1   :  { %v265_v30 = vpop.xlane.xlu0 %264 }
 0x1c2   :  { %v269_v31 = vmul.f32 0.0078125, %v265_v30 }
 0x1c4   :  { %v271_v32 = vadd.f32 1e-06, %v269_v31  ;;  %v4144_v31 = vld [vmem:[%s4644_s11 + $0x3] ss:$0 sm:$0xff] }
 0x1c5   :  { %v267_v33 = vpop.xlane.xlu0 %266 }
 0x1c6   :  { %3391 = vrsqrt.f32 %v271_v32  ;;  %v270_v34 = vmul.f32 0.0078125, %v267_v33 }
 0x1c8   :  { %v272_v35 = vadd.f32 1e-06, %v270_v34 }
 0x1ca   :  { %3393 = vrsqrt.f32 %v272_v35 }
 0x1d3   :  { %v3392_v36 = vpop.eup %3391 }
 0x1d4   :  { %v275_v38 = vmul.f32 %v3392_v36, %v3917_v46  ;;  %v246_v36 = vld [vmem:[%s4643_s10] sm:$0xff] }
 0x1d6   :  { %v283_v39 = vmul.f32 %v2806_v37, %v275_v38 }
 0x1d7   :  { %v3394_v40 = vpop.eup %3393 }
 0x1d8   :  { %430 = vmatmul.mubr.f32.vlgmr.msra.gmra.mxu1 %v283_v39  ;;  %507 = vmatmul.mubr.f32.vlgmr.msra.gmra.mxu0 %v283_v39  ;;  %v276_v42 = vmul.f32 %v3394_v40, %v3915_v45 }
 0x1d9   :  { %3169 = vmatpush3.msra.mxu1 %v364_v28  ;;  %435 = vmatprep.mubr.f32.mxu1 %v3719_v29 }
 0x1da   :  { %3170 = vmatprep.subr.mxu1 %v359_v41  ;;  %512 = vmatprep.mubr.f32.mxu0 %v3719_v29  ;;  %v284_v44 = vmul.f32 %v2806_v37, %v276_v42  ;;  %v247_v37 = vld [vmem:[%s4643_s10 + $0x8] sm:$0xff] }
 0x1db   :  { %3171 = vmatpush3.msra.mxu1 %v359_v41  ;;  %v248_v41 = vld [vmem:[%s4643_s10 + $0x10] sm:$0xff] }
 0x1dc   :  { %3172 = vmatprep.subr.mxu1 %v354_v43  ;;  %436 = vmatmul.mubr.f32.gmra.mxu1 %v284_v44 }
 0x1dd   :  { %513 = vmatmul.mubr.f32.gmra.mxu0 %v284_v44  ;;  %3173 = vmatpush3.msra.mxu1 %v354_v43 }
 0x1de   :  { %3174 = vmatprep.subr.mxu1 %v349_v47  ;;  %3200 = vmatprep.mubr.f32.mxu1 %v283_v39 }
 0x1df   :  { %3175 = vmatpush3.msra.mxu1 %v349_v47 }
 0x1e0   :  { %3176 = vmatprep.subr.mxu1 %v344_v48 }
 0x1e1   :  { %3177 = vmatpush3.msra.mxu1 %v344_v48 }
 0x1e2   :  { %3178 = vmatprep.subr.mxu1 %v339_v49 }
 0x1e3   :  { %3179 = vmatpush3.msra.mxu1 %v339_v49 }
 0x1e4   :  { %3180 = vmatprep.subr.mxu1 %v334_v50 }
 0x1e5   :  { %3181 = vmatpush3.msra.mxu1 %v334_v50  ;;  %v250_v50 = vld [vmem:[%s4643_s10 + $0x20] sm:$0xff] }
 0x1e6   :  { %3182 = vmatprep.subr.mxu1 %v329_v51 }
 0x1e7   :  { %3183 = vmatpush3.msra.mxu1 %v329_v51 }
 0x1e8   :  { %3184 = vmatprep.subr.mxu1 %v324_v52 }
 0x1e9   :  { %3185 = vmatpush3.msra.mxu1 %v324_v52 }
 0x1ea   :  { %3186 = vmatprep.subr.mxu1 %v319_v53 }
 0x1eb   :  { %3187 = vmatpush3.msra.mxu1 %v319_v53 }
 0x1ec   :  { %3188 = vmatprep.subr.mxu1 %v314_v54 }
 0x1ed   :  { %3189 = vmatpush3.msra.mxu1 %v314_v54  ;;  %v251_v54 = vld [vmem:[%s4643_s10 + $0x28] sm:$0xff] }
 0x1ee   :  { %3190 = vmatprep.subr.mxu1 %v309_v55 }
 0x1ef   :  { %3191 = vmatpush3.msra.mxu1 %v309_v55 }
 0x1f0   :  { %3192 = vmatprep.subr.mxu1 %v304_v56 }
 0x1f1   :  { %3193 = vmatpush3.msra.mxu1 %v304_v56 }
 0x1f2   :  { %3194 = vmatprep.subr.mxu1 %v299_v57 }
 0x1f3   :  { %3195 = vmatpush3.msra.mxu1 %v299_v57 }
 0x1f4   :  { %3196 = vmatprep.subr.mxu1 %v294_v58 }
 0x1f5   :  { %3197 = vmatpush3.msra.mxu1 %v294_v58  ;;  %v252_v58 = vld [vmem:[%s4643_s10 + $0x30] sm:$0xff] }
 0x1f6   :  { %3198 = vmatprep.subr.mxu1 %v289_v59 }
 0x1f7   :  { %3199 = vmatpush3.msra.mxu1 %v289_v59 }
 0x1f8   :  { %3201 = vmatmul.mubr.f32.vlgmr.msra.gmra.mxu1 %v284_v44  ;;  %v249_v44 = vld [vmem:[%s4643_s10 + $0x18] sm:$0xff] }
 0x298   :  { %v431_v61 = vpop.f32.mrf.mxu1  ;;  %v508_v62 = vpop.f32.mrf.mxu0 }
 0x299   :  { %v594_v1 = vmul.f32 %v431_v61, %v242_v60 }
 0x29a   :  { %v510_v0 = vpop.f32.mrf.mxu0  ;;  %v433_v7 = vpop.f32.mrf.mxu1 }
 0x29b   :  { %v596_v2 = vmul.f32 %v510_v0, %v244_v63  ;;  %v600_v17 = vmul.f32 %v433_v7, %v242_v60 }
 0x29c   :  { %v437_v8 = vpop.f32.mrf.mxu1 }
 0x29d   :  { %v598_v4 = vadd.f32 %v596_v2, %v594_v1  ;;  %v514_v5 = vpop.f32.mrf.mxu0  ;;  %v595_v21 = vmul.f32 %v437_v8, %v243_v10 }
 0x29e   :  { %3219 = vmatprep.subr.mxu1 %v514_v5  ;;  %v439_v9 = vpop.f32.mrf.mxu1 }
 0x29f   :  { %3220 = vmatpush3.msra.mxu1 %v514_v5  ;;  %v612_v6 = vmul.f32 %v4118_v3, %v598_v4  ;;  %v516_v12 = vpop.f32.mrf.mxu0  ;;  %v601_v14 = vmul.f32 %v439_v9, %v243_v10  ;;  %v620_v26 = vmul.f32 %v4130_v24, %v598_v4  ;;  %v628_v30 = vmul.f32 %v4137_v27, %v598_v4 }
 0x2a0   :  { %3221 = vmatprep.subr.mxu1 %v508_v62  ;;  %v597_v18 = vmul.f32 %v516_v12, %v245_v11  ;;  %v636_v33 = vmul.f32 %v4144_v31, %v598_v4 }
 0x2a1   :  { %3222 = vmatpush3.msra.mxu1 %v508_v62  ;;  %3207 = vmatprep.mubr.f32.mxu0 %v612_v6  ;;  %v253_v62 = vld [vmem:[%s4643_s10 + $0x38] sm:$0xff] }
 0x2a2   :  { %v599_v23 = vadd.f32 %v597_v18, %v595_v21 }
 0x2a4   :  { %v613_v25 = vmul.f32 %v4118_v3, %v599_v23  ;;  %v621_v28 = vmul.f32 %v4130_v24, %v599_v23  ;;  %v629_v32 = vmul.f32 %v4137_v27, %v599_v23  ;;  %v637_v34 = vmul.f32 %v4144_v31, %v599_v23 }
 0x2b8   :  { %v3202_v13 = vpop.f32.mrf.mxu1 }
 0x2b9   :  { %v603_v15 = vmul.f32 %v3202_v13, %v245_v11 }
 0x2ba   :  { %v585_v16 = vpop.f32.mrf.mxu1 }
 0x2bb   :  { %v605_v19 = vadd.f32 %v603_v15, %v601_v14  ;;  %v602_v20 = vmul.f32 %v585_v16, %v244_v63 }
 0x2bd   :  { %v604_v22 = vadd.f32 %v602_v20, %v600_v17  ;;  %3203 = vmatprep.subr.mxu0 %v605_v19 }
 0x2be   :  { %3204 = vmatpush3.xpose.msra.mxu0 %v605_v19 }
 0x2bf   :  { %3205 = vmatprep.subr.mxu0 %v604_v22 }
 0x2c2   :  { %3206 = vmatpush3.xpose.msra.mxu0 %v604_v22 }
 0x2c5   :  { %3208 = vmatmul.mubr.f32.vlgmr.msra.gmra.mxu0 %v613_v25 }
 0x2c6   :  { %3210 = vmatprep.mubr.f32.mxu0 %v620_v26 }
 0x2c9   :  { %3211 = vmatmul.mubr.f32.gmra.mxu0 %v621_v28 }
 0x2ca   :  { %3213 = vmatprep.mubr.f32.mxu0 %v628_v30 }
 0x2cd   :  { %3214 = vmatmul.mubr.f32.gmra.mxu0 %v629_v32 }
 0x2ce   :  { %3216 = vmatprep.mubr.f32.mxu0 %v636_v33 }
 0x2d1   :  { %3217 = vmatmul.mubr.f32.gmra.mxu0 %v637_v34 }
 0x2d2   :  { %1219 = vmatprep.mubr.f32.mxu0 %v3719_v29 }
 0x385   :  { %v3209_v35 = vpop.f32.mrf.mxu0 }
 0x386   :  { %v710_v42 = vadd.f32 %v3209_v35, %v247_v37 }
 0x387   :  { %v704_v38 = vpop.f32.mrf.mxu0 }
 0x388   :  { %v705_v39 = vadd.f32 %v704_v38, %v246_v36  ;;  %v747_v53 = vsel %vm743_vm0, %v710_v42, -inf }
 0x389   :  { %v3212_v40 = vpop.f32.mrf.mxu0 }
 0x38a   :  { %v744_v43 = vsel %vm743_vm0, %v705_v39, -inf  ;;  %v720_v51 = vadd.f32 %v3212_v40, %v249_v44 }
 0x38b   :  { %v714_v47 = vpop.f32.mrf.mxu0  ;;  %745 = vmax.xlane.f32.xlu1 %v744_v43 }
 0x38c   :  { %v715_v48 = vadd.f32 %v714_v47, %v248_v41  ;;  %v753_v61 = vsel %vm743_vm0, %v720_v51, -inf }
 0x38d   :  { %v3215_v49 = vpop.f32.mrf.mxu0 }
 0x38e   :  { %v750_v52 = vsel %vm743_vm0, %v715_v48, -inf  ;;  %v730_v59 = vadd.f32 %v3215_v49, %v251_v54 }
 0x38f   :  { %v724_v55 = vpop.f32.mrf.mxu0  ;;  %751 = vmax.xlane.f32.xlu0 %v750_v52  ;;  %748 = vmax.xlane.f32.xlu1 %v747_v53  ;;  %v990_v52 = vld [vmem:[#allocation7 + $0x78] sm:$0xff] }
 0x390   :  { %v725_v56 = vadd.f32 %v724_v55, %v250_v50  ;;  %v759_v4 = vsel %vm743_vm0, %v730_v59, -inf  ;;  %3235 = vmatprep.subr.mxu1 %v990_v52 }
 0x391   :  { %v3218_v57 = vpop.f32.mrf.mxu0 }
 0x392   :  { %v756_v60 = vsel %vm743_vm0, %v725_v56, -inf  ;;  %v740_v1 = vadd.f32 %v3218_v57, %v253_v62 }
 0x393   :  { %v734_v63 = vpop.f32.mrf.mxu0  ;;  %757 = vmax.xlane.f32.xlu0 %v756_v60  ;;  %754 = vmax.xlane.f32.xlu1 %v753_v61 }
 0x394   :  { %v735_v0 = vadd.f32 %v734_v63, %v252_v58  ;;  %v765_v5 = vsel %vm743_vm0, %v740_v1, -inf }
 0x396   :  { %v762_v2 = vsel %vm743_vm0, %v735_v0, -inf }
 0x397   :  { %763 = vmax.xlane.f32.xlu0 %v762_v2  ;;  %760 = vmax.xlane.f32.xlu1 %v759_v4  ;;  %v989_v4 = vld [vmem:[#allocation7 + $0x70] sm:$0xff] }
 0x39b   :  { %766 = vmax.xlane.f32.xlu1 %v765_v5 }
 0x414   :  { %v746_v6 = vpop.xlane.xlu1 %745 }
 0x415   :  { %v768_v7 = vsub.f32 %v705_v39, %v746_v6 }
 0x417   :  { %v776_v8 = vmul.f32 1.442695, %v768_v7 }
 0x418   :  { %v752_v9 = vpop.xlane.xlu0 %751  ;;  %v749_v10 = vpop.xlane.xlu1 %748 }
 0x419   :  { %3395 = vpow2.f32 %v776_v8  ;;  %v770_v11 = vsub.f32 %v715_v48, %v752_v9  ;;  %v769_v12 = vsub.f32 %v710_v42, %v749_v10  ;;  %v988_v8 = vld [vmem:[#allocation7 + $0x68] sm:$0xff]  ;;  %v987_v10 = vld [vmem:[#allocation7 + $0x60] sm:$0xff] }
 0x41b   :  { %v780_v13 = vmul.f32 1.442695, %v770_v11  ;;  %v778_v14 = vmul.f32 1.442695, %v769_v12 }
 0x41c   :  { %v758_v15 = vpop.xlane.xlu0 %757  ;;  %v755_v16 = vpop.xlane.xlu1 %754 }
 0x41d   :  { %3397 = vpow2.f32 %v780_v13  ;;  %v772_v17 = vsub.f32 %v725_v56, %v758_v15  ;;  %v771_v18 = vsub.f32 %v720_v51, %v755_v16  ;;  %v985_v16 = vld [vmem:[#allocation7 + $0x50] sm:$0xff] }
 0x41e   :  { %3399 = vpow2.f32 %v778_v14  ;;  %v986_v14 = vld [vmem:[#allocation7 + $0x58] sm:$0xff] }
 0x41f   :  { %v784_v19 = vmul.f32 1.442695, %v772_v17  ;;  %v782_v20 = vmul.f32 1.442695, %v771_v18 }
 0x420   :  { %v764_v21 = vpop.xlane.xlu0 %763  ;;  %v761_v22 = vpop.xlane.xlu1 %760 }
 0x421   :  { %3401 = vpow2.f32 %v784_v19  ;;  %v774_v23 = vsub.f32 %v735_v0, %v764_v21  ;;  %v773_v25 = vsub.f32 %v730_v59, %v761_v22  ;;  %v984_v19 = vld [vmem:[#allocation7 + $0x48] sm:$0xff]  ;;  %v982_v21 = vld [vmem:[#allocation7 + $0x38] sm:$0xff]  ;;  %v981_v22 = vld [vmem:[#allocation7 + $0x30] sm:$0xff] }
 0x422   :  { %3403 = vpow2.f32 %v782_v20  ;;  %v983_v20 = vld [vmem:[#allocation7 + $0x40] sm:$0xff] }
 0x423   :  { %v788_v26 = vmul.f32 1.442695, %v774_v23  ;;  %v786_v28 = vmul.f32 1.442695, %v773_v25  ;;  %v980_v23 = vld [vmem:[#allocation7 + $0x28] sm:$0xff]  ;;  %v979_v25 = vld [vmem:[#allocation7 + $0x20] sm:$0xff] }
 0x424   :  { %v767_v30 = vpop.xlane.xlu1 %766 }
 0x425   :  { %3405 = vpow2.f32 %v788_v26  ;;  %v775_v32 = vsub.f32 %v740_v1, %v767_v30  ;;  %v978_v26 = vld [vmem:[#allocation7 + $0x18] sm:$0xff]  ;;  %v976_v30 = vld [vmem:[#allocation7 + $0x8] sm:$0xff] }
 0x426   :  { %v3396_v33 = vpop.eup %3395  ;;  %3407 = vpow2.f32 %v786_v28  ;;  %v977_v28 = vld [vmem:[#allocation7 + $0x10] sm:$0xff] }
 0x427   :  { %v790_v34 = vmul.f32 1.442695, %v775_v32  ;;  %v792_v35 = vsel %vm743_vm0, %v3396_v33, 0.0  ;;  %v975_v32 = vld [vmem:[#allocation7] sm:$0xff] }
 0x428   :  { %793 = vadd.xlane.f32.xlu0 %v792_v35 }
 0x429   :  { %3409 = vpow2.f32 %v790_v34 }
 0x42a   :  { %v3398_v36 = vpop.eup %3397 }
 0x42b   :  { %v3400_v37 = vpop.eup %3399  ;;  %v798_v38 = vsel %vm743_vm0, %v3398_v36, 0.0 }
 0x42c   :  { %799 = vadd.xlane.f32.xlu0 %v798_v38  ;;  %v795_v39 = vsel %vm743_vm0, %v3400_v37, 0.0 }
 0x42d   :  { %796 = vadd.xlane.f32.xlu1 %v795_v39 }
 0x42e   :  { %v3402_v40 = vpop.eup %3401 }
 0x42f   :  { %v3404_v41 = vpop.eup %3403  ;;  %v804_v42 = vsel %vm743_vm0, %v3402_v40, 0.0 }
 0x430   :  { %805 = vadd.xlane.f32.xlu0 %v804_v42  ;;  %v801_v43 = vsel %vm743_vm0, %v3404_v41, 0.0 }
 0x431   :  { %802 = vadd.xlane.f32.xlu1 %v801_v43 }
 0x432   :  { %v3406_v44 = vpop.eup %3405 }
 0x433   :  { %v3408_v47 = vpop.eup %3407  ;;  %v810_v48 = vsel %vm743_vm0, %v3406_v44, 0.0 }
 0x434   :  { %811 = vadd.xlane.f32.xlu0 %v810_v48  ;;  %v807_v49 = vsel %vm743_vm0, %v3408_v47, 0.0 }
 0x435   :  { %808 = vadd.xlane.f32.xlu1 %v807_v49 }
 0x436   :  { %v3410_v50 = vpop.eup %3409 }
 0x437   :  { %v813_v51 = vsel %vm743_vm0, %v3410_v50, 0.0 }
 0x439   :  { %814 = vadd.xlane.f32.xlu1 %v813_v51 }
 0x4b1   :  { %v794_v53 = vpop.xlane.xlu0 %793 }
 0x4b2   :  { %3411 = vrcp.f32 %v794_v53 }
 0x4b5   :  { %v800_v54 = vpop.xlane.xlu0 %799 }
 0x4b6   :  { %3413 = vrcp.f32 %v800_v54  ;;  %v797_v55 = vpop.xlane.xlu1 %796 }
 0x4b7   :  { %3415 = vrcp.f32 %v797_v55 }
 0x4b9   :  { %v806_v56 = vpop.xlane.xlu0 %805 }
 0x4ba   :  { %3417 = vrcp.f32 %v806_v56  ;;  %v803_v57 = vpop.xlane.xlu1 %802  ;;  %v1152_v56 = vld [vmem:[#allocation9 + $0x1e8] sm:$0xff] }
 0x4bb   :  { %3419 = vrcp.f32 %v803_v57  ;;  %v1151_v57 = vld [vmem:[#allocation9 + $0x1e0] sm:$0xff]  ;;  %1155 = vmatprep.subr.mxu0 %v1152_v56  ;;  %v1098_v56 = vld [vmem:[#allocation9 + $0x38] sm:$0xff] }
 0x4bc   :  { %1156 = vmatpush1.msra.mxu0 %v1151_v57  ;;  %v1097_v57 = vld [vmem:[#allocation9 + $0x30] sm:$0xff] }
 0x4bd   :  { %v812_v58 = vpop.xlane.xlu0 %811 }
 0x4be   :  { %3421 = vrcp.f32 %v812_v58  ;;  %v809_v59 = vpop.xlane.xlu1 %808  ;;  %v1148_v58 = vld [vmem:[#allocation9 + $0x1c8] sm:$0xff] }
 0x4bf   :  { %v3412_v60 = vpop.eup %3411  ;;  %3423 = vrcp.f32 %v809_v59  ;;  %v1150_v59 = vld [vmem:[#allocation9 + $0x1d8] sm:$0xff]  ;;  %1157 = vmatprep.subr.mxu0 %v1148_v58 }
 0x4c0   :  { %v824_v61 = vmul.f32 %v3412_v60, %v3396_v33  ;;  %v1147_v60 = vld [vmem:[#allocation9 + $0x1c0] sm:$0xff]  ;;  %v1094_v58 = vld [vmem:[#allocation9 + $0x18] sm:$0xff] }
 0x4c1   :  { %1158 = vmatpush1.msra.mxu0 %v1147_v60  ;;  %v1093_v60 = vld [vmem:[#allocation9 + $0x10] sm:$0xff] }
 0x4c2   :  { %v815_v62 = vpop.xlane.xlu1 %814  ;;  %3223 = vmatprep.mubr.msk.f32.mxu1 %vm743_vm0, %v824_v61  ;;  %v1149_v61 = vld [vmem:[#allocation9 + $0x1d0] sm:$0xff] }
 0x4c3   :  { %v3414_v63 = vpop.eup %3413  ;;  %3425 = vrcp.f32 %v815_v62  ;;  %v1146_v62 = vld [vmem:[#allocation9 + $0x1b8] sm:$0xff] }
 0x4c4   :  { %v3416_v0 = vpop.eup %3415  ;;  %v826_v1 = vmul.f32 %v3414_v63, %v3398_v36  ;;  %v1143_v63 = vld [vmem:[#allocation9 + $0x1a0] sm:$0xff] }
 0x4c5   :  { %v825_v2 = vmul.f32 %v3416_v0, %v3400_v37  ;;  %v1145_v0 = vld [vmem:[#allocation9 + $0x1b0] sm:$0xff] }
 0x4c7   :  { %v3418_v5 = vpop.eup %3417  ;;  %3224 = vmatmul.mubr.msk.f32.vlgmr.msra.gmra.mxu1 %vm743_vm0, %v825_v2  ;;  %v1142_v2 = vld [vmem:[#allocation9 + $0x198] sm:$0xff] }
 0x4c8   :  { %v3420_v6 = vpop.eup %3419  ;;  %3226 = vmatprep.mubr.msk.f32.mxu1 %vm743_vm0, %v826_v1  ;;  %v828_v7 = vmul.f32 %v3418_v5, %v3402_v40  ;;  %3236 = vmatpush3.msra.mxu1 %v990_v52  ;;  %v1140_v1 = vld [vmem:[#allocation9 + $0x188] sm:$0xff]  ;;  %v1141_v5 = vld [vmem:[#allocation9 + $0x190] sm:$0xff] }
 0x4c9   :  { %v827_v9 = vmul.f32 %v3420_v6, %v3404_v41  ;;  %3237 = vmatprep.subr.mxu1 %v989_v4 }
 0x4ca   :  { %3238 = vmatpush3.msra.mxu1 %v989_v4  ;;  %v1139_v4 = vld [vmem:[#allocation9 + $0x180] sm:$0xff] }
 0x4cb   :  { %v3422_v11 = vpop.eup %3421  ;;  %3227 = vmatmul.mubr.msk.f32.gmra.mxu1 %vm743_vm0, %v827_v9  ;;  %3239 = vmatprep.subr.mxu1 %v988_v8 }
 0x4cc   :  { %v3424_v12 = vpop.eup %3423  ;;  %3229 = vmatprep.mubr.msk.f32.mxu1 %vm743_vm0, %v828_v7  ;;  %v830_v13 = vmul.f32 %v3422_v11, %v3406_v44  ;;  %3240 = vmatpush3.msra.mxu1 %v988_v8 }
 0x4cd   :  { %v829_v15 = vmul.f32 %v3424_v12, %v3408_v47  ;;  %3241 = vmatprep.subr.mxu1 %v987_v10  ;;  %v1136_v12 = vld [vmem:[#allocation9 + $0x168] sm:$0xff] }
 0x4ce   :  { %3242 = vmatpush3.msra.mxu1 %v987_v10 }
 0x4cf   :  { %3230 = vmatmul.mubr.msk.f32.gmra.mxu1 %vm743_vm0, %v829_v15  ;;  %3243 = vmatprep.subr.mxu1 %v986_v14  ;;  %v1137_v15 = vld [vmem:[#allocation9 + $0x170] sm:$0xff] }
 0x4d0   :  { %v3426_v17 = vpop.eup %3425  ;;  %3232 = vmatprep.mubr.msk.f32.mxu1 %vm743_vm0, %v830_v13  ;;  %3244 = vmatpush3.msra.mxu1 %v986_v14  ;;  %v1138_v13 = vld [vmem:[#allocation9 + $0x178] sm:$0xff]  ;;  %v1135_v14 = vld [vmem:[#allocation9 + $0x160] sm:$0xff] }
 0x4d1   :  { %v831_v18 = vmul.f32 %v3426_v17, %v3410_v50  ;;  %3245 = vmatprep.subr.mxu1 %v985_v16  ;;  %v1133_v17 = vld [vmem:[#allocation9 + $0x150] sm:$0xff] }
 0x4d2   :  { %3246 = vmatpush3.msra.mxu1 %v985_v16  ;;  %v1134_v16 = vld [vmem:[#allocation9 + $0x158] sm:$0xff] }
 0x4d3   :  { %3233 = vmatmul.mubr.msk.f32.gmra.mxu1 %vm743_vm0, %v831_v18  ;;  %3247 = vmatprep.subr.mxu1 %v984_v19  ;;  %v1128_v18 = vld [vmem:[#allocation9 + $0x128] sm:$0xff] }
 0x4d4   :  { %3248 = vmatpush3.msra.mxu1 %v984_v19  ;;  %v1130_v19 = vld [vmem:[#allocation9 + $0x138] sm:$0xff] }
 0x4d5   :  { %3249 = vmatprep.subr.mxu1 %v983_v20 }
 0x4d6   :  { %3250 = vmatpush3.msra.mxu1 %v983_v20  ;;  %v1127_v20 = vld [vmem:[#allocation9 + $0x120] sm:$0xff] }
 0x4d7   :  { %3251 = vmatprep.subr.mxu1 %v982_v21 }
 0x4d8   :  { %3252 = vmatpush3.msra.mxu1 %v982_v21  ;;  %v1129_v21 = vld [vmem:[#allocation9 + $0x130] sm:$0xff] }
 0x4d9   :  { %3253 = vmatprep.subr.mxu1 %v981_v22 }
 0x4da   :  { %3254 = vmatpush3.msra.mxu1 %v981_v22  ;;  %v1124_v22 = vld [vmem:[#allocation9 + $0x108] sm:$0xff] }
 0x4db   :  { %3255 = vmatprep.subr.mxu1 %v980_v23 }
 0x4dc   :  { %3256 = vmatpush3.msra.mxu1 %v980_v23  ;;  %v1126_v23 = vld [vmem:[#allocation9 + $0x118] sm:$0xff] }
 0x4dd   :  { %3257 = vmatprep.subr.mxu1 %v979_v25 }
 0x4de   :  { %3258 = vmatpush3.msra.mxu1 %v979_v25  ;;  %v1123_v25 = vld [vmem:[#allocation9 + $0x100] sm:$0xff] }
 0x4df   :  { %3259 = vmatprep.subr.mxu1 %v978_v26 }
 0x4e0   :  { %3260 = vmatpush3.msra.mxu1 %v978_v26  ;;  %v1125_v26 = vld [vmem:[#allocation9 + $0x110] sm:$0xff] }
 0x4e1   :  { %3261 = vmatprep.subr.mxu1 %v977_v28 }
 0x4e2   :  { %3262 = vmatpush3.msra.mxu1 %v977_v28  ;;  %v1120_v28 = vld [vmem:[#allocation9 + $0xe8] sm:$0xff] }
 0x4e3   :  { %3263 = vmatprep.subr.mxu1 %v976_v30 }
 0x4e4   :  { %3264 = vmatpush3.msra.mxu1 %v976_v30  ;;  %v1122_v30 = vld [vmem:[#allocation9 + $0xf8] sm:$0xff] }
 0x4e5   :  { %3265 = vmatprep.subr.mxu1 %v975_v32 }
 0x4e6   :  { %3266 = vmatpush3.msra.mxu1 %v975_v32  ;;  %v1119_v32 = vld [vmem:[#allocation9 + $0xe0] sm:$0xff] }
 0x587   :  { %v3225_v33 = vpop.f32.mrf.mxu1 }
 0x588   :  { %v962_v43 = vmul.f32 %v3225_v33, %v4118_v3  ;;  %v1121_v33 = vld [vmem:[#allocation9 + $0xf0] sm:$0xff] }
 0x589   :  { %v922_v34 = vpop.f32.mrf.mxu1 }
 0x58a   :  { %v961_v41 = vmul.f32 %v4118_v3, %v922_v34  ;;  %v1154_v3 = vld [vmem:[#allocation9 + $0x1f8] sm:$0xff]  ;;  %v1116_v34 = vld [vmem:[#allocation9 + $0xc8] sm:$0xff] }
 0x58b   :  { %v3228_v35 = vpop.f32.mrf.mxu1  ;;  %1232 = vmatprep.subr.mxu1 %v1154_v3  ;;  %v1095_v3 = vld [vmem:[#allocation9 + $0x20] sm:$0xff] }
 0x58c   :  { %v964_v39 = vmul.f32 %v3228_v35, %v4130_v24  ;;  %v1118_v35 = vld [vmem:[#allocation9 + $0xd8] sm:$0xff] }
 0x58d   :  { %v932_v36 = vpop.f32.mrf.mxu1 }
 0x58e   :  { %v963_v38 = vmul.f32 %v4130_v24, %v932_v36  ;;  %v966_v49 = vadd.f32 %v964_v39, %v962_v43  ;;  %v1115_v36 = vld [vmem:[#allocation9 + $0xc0] sm:$0xff]  ;;  %v1114_v39 = vld [vmem:[#allocation9 + $0xb8] sm:$0xff] }
 0x58f   :  { %v3231_v37 = vpop.f32.mrf.mxu1  ;;  %v1110_v43 = vld [vmem:[#allocation9 + $0x98] sm:$0xff] }
 0x590   :  { %v968_v44 = vmul.f32 %v3231_v37, %v4137_v27  ;;  %v965_v48 = vadd.f32 %v963_v38, %v961_v41  ;;  %v1117_v37 = vld [vmem:[#allocation9 + $0xd0] sm:$0xff]  ;;  %v1112_v38 = vld [vmem:[#allocation9 + $0xa8] sm:$0xff] }
 0x591   :  { %v942_v40 = vpop.f32.mrf.mxu1  ;;  %v1113_v41 = vld [vmem:[#allocation9 + $0xb0] sm:$0xff] }
 0x592   :  { %v967_v42 = vmul.f32 %v4137_v27, %v942_v40  ;;  %v970_v54 = vadd.f32 %v968_v44, %v966_v49  ;;  %v1153_v27 = vld [vmem:[#allocation9 + $0x1f0] sm:$0xff]  ;;  %v1111_v40 = vld [vmem:[#allocation9 + $0xa0] sm:$0xff]  ;;  %v1106_v49 = vld [vmem:[#allocation9 + $0x78] sm:$0xff] }
 0x593   :  { %v3234_v47 = vpop.f32.mrf.mxu1  ;;  %v1107_v44 = vld [vmem:[#allocation9 + $0x80] sm:$0xff] }
 0x594   :  { %v972_v50 = vmul.f32 %v3234_v47, %v4144_v31  ;;  %v969_v52 = vadd.f32 %v967_v42, %v965_v48  ;;  %v1108_v42 = vld [vmem:[#allocation9 + $0x88] sm:$0xff]  ;;  %v1109_v47 = vld [vmem:[#allocation9 + $0x90] sm:$0xff] }
 0x595   :  { %v952_v51 = vpop.f32.mrf.mxu1  ;;  %v1104_v48 = vld [vmem:[#allocation9 + $0x68] sm:$0xff] }
 0x596   :  { %v971_v53 = vmul.f32 %v4144_v31, %v952_v51  ;;  %v974_v55 = vadd.f32 %v972_v50, %v970_v54  ;;  %v1144_v31 = vld [vmem:[#allocation9 + $0x1a8] sm:$0xff]  ;;  %v1103_v50 = vld [vmem:[#allocation9 + $0x60] sm:$0xff]  ;;  %v1105_v51 = vld [vmem:[#allocation9 + $0x70] sm:$0xff] }
 0x597   :  { %1159 = vmatprep.subr.mxu0 %v1144_v31  ;;  %v1099_v54 = vld [vmem:[#allocation9 + $0x40] sm:$0xff] }
 0x598   :  { %v973_v24 = vadd.f32 %v971_v53, %v969_v52  ;;  %1160 = vmatpush1.msra.mxu0 %v1143_v63  ;;  %v1100_v52 = vld [vmem:[#allocation9 + $0x48] sm:$0xff]  ;;  %v1102_v53 = vld [vmem:[#allocation9 + $0x58] sm:$0xff] }
 0x599   :  { %1161 = vmatprep.subr.mxu0 %v1140_v1 }
 0x59a   :  { %3267 = vmatprep.mubr.f32.mxu1 %v973_v24  ;;  %1162 = vmatpush1.msra.mxu0 %v1139_v4  ;;  %v1101_v24 = vld [vmem:[#allocation9 + $0x50] sm:$0xff] }
 0x59b   :  { %3268 = vmatmul.mubr.f32.vlgmr.msra.gmra.mxu1 %v974_v55  ;;  %1163 = vmatprep.subr.mxu0 %v1136_v12  ;;  %v1096_v55 = vld [vmem:[#allocation9 + $0x28] sm:$0xff]  ;;  %v1372_v12 = vld [vmem:[#allocation10 + $0xf8] sm:$0xff] }
 0x59c   :  { %1296 = vmatprep.mubr.f32.mxu1 %v3719_v29  ;;  %1233 = vmatpush1.msra.mxu1 %v1153_v27  ;;  %v1092_v27 = vld [vmem:[#allocation9 + $0x8] sm:$0xff] }
 0x59d   :  { %1234 = vmatprep.subr.mxu1 %v1150_v59  ;;  %1164 = vmatpush1.msra.mxu0 %v1135_v14  ;;  %v1091_v59 = vld [vmem:[#allocation9] sm:$0xff]  ;;  %v1371_v14 = vld [vmem:[#allocation10 + $0xf0] sm:$0xff] }
 0x59e   :  { %1235 = vmatpush1.msra.mxu1 %v1149_v61 }
 0x59f   :  { %1236 = vmatprep.subr.mxu1 %v1146_v62 }
 0x5a0   :  { %1237 = vmatpush1.msra.mxu1 %v1145_v0 }
 0x5a1   :  { %1238 = vmatprep.subr.mxu1 %v1142_v2 }
 0x5a2   :  { %1239 = vmatpush1.msra.mxu1 %v1141_v5 }
 0x5a3   :  { %1240 = vmatprep.subr.mxu1 %v1138_v13  ;;  %v1356_v13 = vld [vmem:[#allocation10 + $0x78] sm:$0xff] }
 0x5a4   :  { %1241 = vmatpush1.msra.mxu1 %v1137_v15  ;;  %v1355_v15 = vld [vmem:[#allocation10 + $0x70] sm:$0xff] }
 0x5a5   :  { %1242 = vmatprep.subr.mxu1 %v1134_v16  ;;  %v1354_v16 = vld [vmem:[#allocation10 + $0x68] sm:$0xff] }
 0x5a6   :  { %1243 = vmatpush1.msra.mxu1 %v1133_v17  ;;  %v1353_v17 = vld [vmem:[#allocation10 + $0x60] sm:$0xff] }
 0x5a7   :  { %1244 = vmatprep.subr.mxu1 %v1130_v19  ;;  %v1352_v19 = vld [vmem:[#allocation10 + $0x58] sm:$0xff] }
 0x5a8   :  { %1245 = vmatpush1.msra.mxu1 %v1129_v21  ;;  %v1351_v21 = vld [vmem:[#allocation10 + $0x50] sm:$0xff] }
 0x5a9   :  { %1246 = vmatprep.subr.mxu1 %v1126_v23  ;;  %v1350_v23 = vld [vmem:[#allocation10 + $0x48] sm:$0xff] }
 0x5aa   :  { %1247 = vmatpush1.msra.mxu1 %v1125_v26  ;;  %v1349_v26 = vld [vmem:[#allocation10 + $0x40] sm:$0xff] }
 0x5ab   :  { %1248 = vmatprep.subr.mxu1 %v1122_v30  ;;  %v1348_v30 = vld [vmem:[#allocation10 + $0x38] sm:$0xff] }
 0x5ac   :  { %1249 = vmatpush1.msra.mxu1 %v1121_v33  ;;  %v1347_v33 = vld [vmem:[#allocation10 + $0x30] sm:$0xff] }
 0x5ad   :  { %1250 = vmatprep.subr.mxu1 %v1118_v35  ;;  %v1346_v35 = vld [vmem:[#allocation10 + $0x28] sm:$0xff] }
 0x5ae   :  { %1251 = vmatpush1.msra.mxu1 %v1117_v37  ;;  %v1345_v37 = vld [vmem:[#allocation10 + $0x20] sm:$0xff] }
 0x5af   :  { %1252 = vmatprep.subr.mxu1 %v1114_v39  ;;  %v1344_v39 = vld [vmem:[#allocation10 + $0x18] sm:$0xff] }
 0x5b0   :  { %1253 = vmatpush1.msra.mxu1 %v1113_v41  ;;  %v1343_v41 = vld [vmem:[#allocation10 + $0x10] sm:$0xff] }
 0x5b1   :  { %1254 = vmatprep.subr.mxu1 %v1110_v43  ;;  %v1342_v43 = vld [vmem:[#allocation10 + $0x8] sm:$0xff] }
 0x5b2   :  { %1255 = vmatpush1.msra.mxu1 %v1109_v47  ;;  %v1341_v47 = vld [vmem:[#allocation10] sm:$0xff] }
 0x5b3   :  { %1256 = vmatprep.subr.mxu1 %v1106_v49 }
 0x5b4   :  { %1257 = vmatpush1.msra.mxu1 %v1105_v51 }
 0x5b5   :  { %1258 = vmatprep.subr.mxu1 %v1102_v53 }
 0x5b6   :  { %1259 = vmatpush1.msra.mxu1 %v1101_v24 }
 0x5b7   :  { %1260 = vmatprep.subr.mxu1 %v1098_v56 }
 0x5b8   :  { %1261 = vmatpush1.msra.mxu1 %v1097_v57 }
 0x5b9   :  { %1262 = vmatprep.subr.mxu1 %v1094_v58 }
 0x5ba   :  { %1263 = vmatpush1.msra.mxu1 %v1093_v60 }
 0x65b   :  { %v3269_v6 = vpop.f32.mrf.mxu1 }
 0x65c   :  { %v4208_v7 = vadd.f32 %v3269_v6, %v3915_v45  ;;  %v1132_v45 = vld [vmem:[#allocation9 + $0x148] sm:$0xff]  ;;  %v2819_v6 = vld [vmem:[%s4638_s5] ss:$0 sm:$0xff] }
 0x65d   :  { %v1057_v8 = vpop.f32.mrf.mxu1  ;;  %1165 = vmatprep.subr.mxu0 %v1132_v45  ;;  %v1370_v45 = vld [vmem:[#allocation10 + $0xe8] sm:$0xff] }
 0x65e   :  { %v4211_v9 = vadd.f32 %v1057_v8, %v3917_v46  ;;  %v1070_v10 = vmul.f32 %v4208_v7, %v4208_v7  ;;  %v1131_v46 = vld [vmem:[#allocation9 + $0x140] sm:$0xff] }
 0x65f   :  { %1166 = vmatpush1.msra.mxu0 %v1131_v46  ;;  %v1369_v46 = vld [vmem:[#allocation10 + $0xe0] sm:$0xff] }
 0x660   :  { %1073 = vadd.xlane.f32.xlu1 %v1070_v10  ;;  %v1069_v11 = vmul.f32 %v4211_v9, %v4211_v9  ;;  %1167 = vmatprep.subr.mxu0 %v1128_v18  ;;  %v1368_v18 = vld [vmem:[#allocation10 + $0xd8] sm:$0xff] }
 0x661   :  { %1168 = vmatpush1.msra.mxu0 %v1127_v20  ;;  %v1367_v20 = vld [vmem:[#allocation10 + $0xd0] sm:$0xff] }
 0x662   :  { %1071 = vadd.xlane.f32.xlu0 %v1069_v11  ;;  %1169 = vmatprep.subr.mxu0 %v1124_v22  ;;  %v1366_v22 = vld [vmem:[#allocation10 + $0xc8] sm:$0xff] }
 0x663   :  { %1170 = vmatpush1.msra.mxu0 %v1123_v25  ;;  %v1365_v25 = vld [vmem:[#allocation10 + $0xc0] sm:$0xff] }
 0x664   :  { %1171 = vmatprep.subr.mxu0 %v1120_v28  ;;  %v1364_v28 = vld [vmem:[#allocation10 + $0xb8] sm:$0xff] }
 0x665   :  { %1172 = vmatpush1.msra.mxu0 %v1119_v32  ;;  %v1363_v32 = vld [vmem:[#allocation10 + $0xb0] sm:$0xff] }
 0x666   :  { %1173 = vmatprep.subr.mxu0 %v1116_v34  ;;  %v1362_v34 = vld [vmem:[#allocation10 + $0xa8] sm:$0xff] }
 0x667   :  { %1174 = vmatpush1.msra.mxu0 %v1115_v36  ;;  %v1361_v36 = vld [vmem:[#allocation10 + $0xa0] sm:$0xff] }
 0x668   :  { %1175 = vmatprep.subr.mxu0 %v1112_v38  ;;  %v1360_v38 = vld [vmem:[#allocation10 + $0x98] sm:$0xff] }
 0x669   :  { %1176 = vmatpush1.msra.mxu0 %v1111_v40  ;;  %v1359_v40 = vld [vmem:[#allocation10 + $0x90] sm:$0xff] }
 0x66a   :  { %1177 = vmatprep.subr.mxu0 %v1108_v42  ;;  %v1358_v42 = vld [vmem:[#allocation10 + $0x88] sm:$0xff] }
 0x66b   :  { %1178 = vmatpush1.msra.mxu0 %v1107_v44  ;;  %v1357_v44 = vld [vmem:[#allocation10 + $0x80] sm:$0xff] }
 0x66c   :  { %1179 = vmatprep.subr.mxu0 %v1104_v48 }
 0x66d   :  { %1180 = vmatpush1.msra.mxu0 %v1103_v50 }
 0x66e   :  { %1181 = vmatprep.subr.mxu0 %v1100_v52 }
 0x66f   :  { %1182 = vmatpush1.msra.mxu0 %v1099_v54 }
 0x670   :  { %1183 = vmatprep.subr.mxu0 %v1096_v55 }
 0x671   :  { %1184 = vmatpush1.msra.mxu0 %v1095_v3 }
 0x672   :  { %1185 = vmatprep.subr.mxu0 %v1092_v27 }
 0x673   :  { %1186 = vmatpush1.msra.mxu0 %v1091_v59 }
 0x674   :  { %3001 = vmatprep.subr.mxu0 %v1372_v12 }
 0x6e9   :  { %v1074_v61 = vpop.xlane.xlu1 %1073 }
 0x6ea   :  { %v1076_v31 = vmul.f32 0.0078125, %v1074_v61 }
 0x6eb   :  { %v1072_v62 = vpop.xlane.xlu0 %1071 }
 0x6ec   :  { %v1078_v63 = vadd.f32 1e-06, %v1076_v31  ;;  %v1075_v0 = vmul.f32 0.0078125, %v1072_v62 }
 0x6ee   :  { %v1077_v1 = vadd.f32 1e-06, %v1075_v0  ;;  %3427 = vrsqrt.f32 %v1078_v63 }
 0x6f0   :  { %3429 = vrsqrt.f32 %v1077_v1 }
 0x6fb   :  { %v3428_v2 = vpop.eup %3427 }
 0x6fc   :  { %v1082_v10 = vmul.f32 %v3428_v2, %v4208_v7 }
 0x6fd   :  { %v3430_v4 = vpop.eup %3429 }
 0x6fe   :  { %v1081_v5 = vmul.f32 %v3430_v4, %v4211_v9  ;;  %v1090_v11 = vmul.f32 %v2819_v6, %v1082_v10 }
 0x700   :  { %v1089_v8 = vmul.f32 %v2819_v6, %v1081_v5 }
 0x702   :  { %1220 = vmatmul.mubr.f32.vlgmr.msra.gmra.mxu0 %v1089_v8  ;;  %1297 = vmatmul.mubr.f32.vlgmr.msra.gmra.mxu1 %v1089_v8 }
 0x703   :  { %1225 = vmatprep.mubr.f32.mxu0 %v3719_v29  ;;  %1302 = vmatprep.mubr.f32.mxu1 %v3719_v29 }
 0x704   :  { %3002 = vmatpush3.msra.mxu0 %v1356_v13 }
 0x705   :  { %3003 = vmatprep.subr.mxu0 %v1371_v14 }
 0x706   :  { %1226 = vmatmul.mubr.f32.gmra.mxu0 %v1090_v11  ;;  %1303 = vmatmul.mubr.f32.gmra.mxu1 %v1090_v11 }
 0x707   :  { %1619 = vmatprep.mubr.f32.mxu1 %v3719_v29  ;;  %3004 = vmatpush3.msra.mxu0 %v1355_v15  ;;  %v2902_v15 = vld [vmem:[%s4662_s23 + $0x4e0] sm:$0xff] }
 0x708   :  { %3005 = vmatprep.subr.mxu0 %v1370_v45  ;;  %v2901_v45 = vld [vmem:[%s4662_s23 + $0x4d8] sm:$0xff]  ;;  %1555 = vmatprep.subr.mxu1 %v2902_v15  ;;  %v2836_v15 = vld [vmem:[%s4662_s23 + $0x2d0] sm:$0xff] }
 0x709   :  { %3006 = vmatpush3.msra.mxu0 %v1354_v16  ;;  %v2904_v16 = vld [vmem:[%s4662_s23 + $0x4f0] sm:$0xff]  ;;  %1556 = vmatpush1.msra.mxu1 %v2901_v45  ;;  %v2839_v45 = vld [vmem:[%s4662_s23 + $0x2e8] sm:$0xff] }
 0x70a   :  { %3007 = vmatprep.subr.mxu0 %v1369_v46  ;;  %v2897_v46 = vld [vmem:[%s4662_s23 + $0x4b8] sm:$0xff] }
 0x70b   :  { %3008 = vmatpush3.msra.mxu0 %v1353_v17  ;;  %v2903_v17 = vld [vmem:[%s4662_s23 + $0x4e8] sm:$0xff]  ;;  %1557 = vmatprep.subr.mxu1 %v2897_v46  ;;  %v2838_v46 = vld [vmem:[%s4662_s23 + $0x2e0] sm:$0xff] }
 0x70c   :  { %3009 = vmatprep.subr.mxu0 %v1368_v18  ;;  %v2896_v18 = vld [vmem:[%s4662_s23 + $0x4b0] sm:$0xff] }
 0x70d   :  { %3010 = vmatpush3.msra.mxu0 %v1352_v19  ;;  %v2899_v19 = vld [vmem:[%s4662_s23 + $0x4c8] sm:$0xff]  ;;  %1558 = vmatpush1.msra.mxu1 %v2896_v18  ;;  %v2834_v18 = vld [vmem:[%s4662_s23 + $0x2c0] sm:$0xff] }
 0x70e   :  { %3011 = vmatprep.subr.mxu0 %v1367_v20  ;;  %v2892_v20 = vld [vmem:[%s4662_s23 + $0x490] sm:$0xff] }
 0x70f   :  { %3012 = vmatpush3.msra.mxu0 %v1351_v21  ;;  %v2898_v21 = vld [vmem:[%s4662_s23 + $0x4c0] sm:$0xff]  ;;  %1559 = vmatprep.subr.mxu1 %v2892_v20  ;;  %v2833_v20 = vld [vmem:[%s4662_s23 + $0x2b8] sm:$0xff] }
 0x710   :  { %3013 = vmatprep.subr.mxu0 %v1366_v22  ;;  %v2891_v22 = vld [vmem:[%s4662_s23 + $0x488] sm:$0xff] }
 0x711   :  { %3014 = vmatpush3.msra.mxu0 %v1350_v23  ;;  %v2894_v23 = vld [vmem:[%s4662_s23 + $0x4a0] sm:$0xff]  ;;  %1560 = vmatpush1.msra.mxu1 %v2891_v22  ;;  %v2829_v22 = vld [vmem:[%s4662_s23 + $0x298] sm:$0xff] }
 0x712   :  { %3015 = vmatprep.subr.mxu0 %v1365_v25  ;;  %v2887_v25 = vld [vmem:[%s4662_s23 + $0x468] sm:$0xff] }
 0x713   :  { %3016 = vmatpush3.msra.mxu0 %v1349_v26  ;;  %v2893_v26 = vld [vmem:[%s4662_s23 + $0x498] sm:$0xff]  ;;  %1561 = vmatprep.subr.mxu1 %v2887_v25 }
 0x714   :  { %3017 = vmatprep.subr.mxu0 %v1364_v28  ;;  %v2889_v28 = vld [vmem:[%s4662_s23 + $0x478] sm:$0xff] }
 0x715   :  { %3018 = vmatpush3.msra.mxu0 %v1348_v30  ;;  %v2886_v30 = vld [vmem:[%s4662_s23 + $0x460] sm:$0xff]  ;;  %v2905_v25 = vld [vmem:[%s4662_s23 + $0x4f8] sm:$0xff] }
 0x716   :  { %3019 = vmatprep.subr.mxu0 %v1363_v32  ;;  %v2888_v32 = vld [vmem:[%s4662_s23 + $0x470] sm:$0xff]  ;;  %1562 = vmatpush1.msra.mxu1 %v2886_v30 }
 0x717   :  { %3020 = vmatpush3.msra.mxu0 %v1347_v33  ;;  %v2882_v33 = vld [vmem:[%s4662_s23 + $0x440] sm:$0xff] }
 0x718   :  { %3021 = vmatprep.subr.mxu0 %v1362_v34  ;;  %v2884_v34 = vld [vmem:[%s4662_s23 + $0x450] sm:$0xff]  ;;  %1563 = vmatprep.subr.mxu1 %v2882_v33 }
 0x719   :  { %3022 = vmatpush3.msra.mxu0 %v1346_v35  ;;  %v2881_v35 = vld [vmem:[%s4662_s23 + $0x438] sm:$0xff] }
 0x71a   :  { %3023 = vmatprep.subr.mxu0 %v1361_v36  ;;  %v2883_v36 = vld [vmem:[%s4662_s23 + $0x448] sm:$0xff]  ;;  %1564 = vmatpush1.msra.mxu1 %v2881_v35 }
 0x71b   :  { %3024 = vmatpush3.msra.mxu0 %v1345_v37  ;;  %v2877_v37 = vld [vmem:[%s4662_s23 + $0x418] sm:$0xff] }
 0x71c   :  { %3025 = vmatprep.subr.mxu0 %v1360_v38  ;;  %1565 = vmatprep.subr.mxu1 %v2877_v37 }
 0x71d   :  { %3026 = vmatpush3.msra.mxu0 %v1344_v39 }
 0x71e   :  { %3027 = vmatprep.subr.mxu0 %v1359_v40 }
 0x71f   :  { %3028 = vmatpush3.msra.mxu0 %v1343_v41 }
 0x720   :  { %3029 = vmatprep.subr.mxu0 %v1358_v42 }
 0x721   :  { %3030 = vmatpush3.msra.mxu0 %v1342_v43 }
 0x722   :  { %3031 = vmatprep.subr.mxu0 %v1357_v44 }
 0x723   :  { %3032 = vmatpush3.msra.mxu0 %v1341_v47 }
 0x724   :  { %1632 = vmatprep.subr.mxu0 %v2904_v16  ;;  %v2832_v16 = vld [vmem:[%s4662_s23 + $0x2b0] sm:$0xff] }
 0x7c2   :  { %v1221_v48 = vpop.f32.mrf.mxu0  ;;  %v1298_v61 = vpop.f32.mrf.mxu1 }
 0x7c3   :  { %v2820_v49 = vmul.f32 -1.442695, %v1221_v48 }
 0x7c4   :  { %v1223_v50 = vpop.f32.mrf.mxu0  ;;  %v1300_v62 = vpop.f32.mrf.mxu1 }
 0x7c5   :  { %3431 = vpow2.f32 %v2820_v49  ;;  %v2821_v51 = vmul.f32 -1.442695, %v1223_v50 }
 0x7c6   :  { %v1227_v52 = vpop.f32.mrf.mxu0  ;;  %v1304_v4 = vpop.f32.mrf.mxu1 }
 0x7c7   :  { %3433 = vpow2.f32 %v2821_v51  ;;  %v2822_v53 = vmul.f32 -1.442695, %v1227_v52  ;;  %v2878_v51 = vld [vmem:[%s4662_s23 + $0x420] sm:$0xff] }
 0x7c8   :  { %v1229_v54 = vpop.f32.mrf.mxu0  ;;  %v1306_v12 = vpop.f32.mrf.mxu1 }
 0x7c9   :  { %3435 = vpow2.f32 %v2822_v53  ;;  %v2823_v24 = vmul.f32 -1.442695, %v1229_v54  ;;  %v2874_v53 = vld [vmem:[%s4662_s23 + $0x400] sm:$0xff] }
 0x7cb   :  { %3437 = vpow2.f32 %v2823_v24  ;;  %v2873_v24 = vld [vmem:[%s4662_s23 + $0x3f8] sm:$0xff] }
 0x7d2   :  { %v3432_v55 = vpop.eup %3431 }
 0x7d3   :  { %v1321_v56 = vadd.f32 1.0, %v3432_v55  ;;  %v2866_v55 = vld [vmem:[%s4662_s23 + $0x3c0] sm:$0xff] }
 0x7d4   :  { %v3434_v3 = vpop.eup %3433 }
 0x7d5   :  { %3439 = vrcp.f32 %v1321_v56  ;;  %v1322_v57 = vadd.f32 1.0, %v3434_v3  ;;  %v2869_v56 = vld [vmem:[%s4662_s23 + $0x3d8] sm:$0xff]  ;;  %v2862_v3 = vld [vmem:[%s4662_s23 + $0x3a0] sm:$0xff] }
 0x7d6   :  { %v3436_v27 = vpop.eup %3435 }
 0x7d7   :  { %3441 = vrcp.f32 %v1322_v57  ;;  %v1323_v58 = vadd.f32 1.0, %v3436_v27  ;;  %v2868_v57 = vld [vmem:[%s4662_s23 + $0x3d0] sm:$0xff]  ;;  %v2861_v27 = vld [vmem:[%s4662_s23 + $0x398] sm:$0xff] }
 0x7d8   :  { %v3438_v59 = vpop.eup %3437 }
 0x7d9   :  { %3443 = vrcp.f32 %v1323_v58  ;;  %v1324_v60 = vadd.f32 1.0, %v3438_v59  ;;  %v2864_v58 = vld [vmem:[%s4662_s23 + $0x3b0] sm:$0xff]  ;;  %v2857_v59 = vld [vmem:[%s4662_s23 + $0x378] sm:$0xff] }
 0x7db   :  { %3445 = vrcp.f32 %v1324_v60  ;;  %v2863_v60 = vld [vmem:[%s4662_s23 + $0x3a8] sm:$0xff] }
 0x7e2   :  { %v3440_v31 = vpop.eup %3439 }
 0x7e3   :  { %v1333_v0 = vmul.f32 %v3440_v31, %v1221_v48  ;;  %v2859_v31 = vld [vmem:[%s4662_s23 + $0x388] sm:$0xff] }
 0x7e4   :  { %v3442_v63 = vpop.eup %3441 }
 0x7e5   :  { %v1334_v1 = vmul.f32 %v3442_v63, %v1223_v50  ;;  %v1337_v8 = vmul.f32 %v1333_v0, %v1298_v61  ;;  %v2876_v50 = vld [vmem:[%s4662_s23 + $0x410] sm:$0xff]  ;;  %v2858_v63 = vld [vmem:[%s4662_s23 + $0x380] sm:$0xff]  ;;  %v2851_v0 = vld [vmem:[%s4662_s23 + $0x348] sm:$0xff] }
 0x7e6   :  { %v3444_v2 = vpop.eup %3443  ;;  %1566 = vmatpush1.msra.mxu1 %v2876_v50  ;;  %v2856_v61 = vld [vmem:[%s4662_s23 + $0x370] sm:$0xff] }
 0x7e7   :  { %v1338_v5 = vmul.f32 %v1334_v1, %v1300_v62  ;;  %v1335_v10 = vmul.f32 %v3444_v2, %v1227_v52  ;;  %v2871_v52 = vld [vmem:[%s4662_s23 + $0x3e8] sm:$0xff]  ;;  %v2852_v62 = vld [vmem:[%s4662_s23 + $0x350] sm:$0xff]  ;;  %v2854_v1 = vld [vmem:[%s4662_s23 + $0x360] sm:$0xff] }
 0x7e8   :  { %v3446_v6 = vpop.eup %3445  ;;  %v2847_v2 = vld [vmem:[%s4662_s23 + $0x328] sm:$0xff]  ;;  %v2880_v50 = vld [vmem:[%s4662_s23 + $0x430] sm:$0xff] }
 0x7e9   :  { %v1336_v11 = vmul.f32 %v3446_v6, %v1229_v54  ;;  %1437 = vmatprep.mubr.f32.mxu0 %v1338_v5  ;;  %v1339_v14 = vmul.f32 %v1335_v10, %v1304_v4  ;;  %v2867_v54 = vld [vmem:[%s4662_s23 + $0x3c8] sm:$0xff]  ;;  %v2853_v4 = vld [vmem:[%s4662_s23 + $0x358] sm:$0xff]  ;;  %v2846_v5 = vld [vmem:[%s4662_s23 + $0x320] sm:$0xff] }
 0x7ea   :  { %1438 = vmatmul.mubr.f32.vlgmr.msra.gmra.mxu0 %v1337_v8  ;;  %v2849_v6 = vld [vmem:[%s4662_s23 + $0x338] sm:$0xff]  ;;  %v2842_v8 = vld [vmem:[%s4662_s23 + $0x300] sm:$0xff]  ;;  %v2848_v10 = vld [vmem:[%s4662_s23 + $0x330] sm:$0xff] }
 0x7eb   :  { %v1340_v13 = vmul.f32 %v1336_v11, %v1306_v12  ;;  %1633 = vmatpush1.msra.mxu0 %v2903_v17  ;;  %v2841_v11 = vld [vmem:[%s4662_s23 + $0x2f8] sm:$0xff]  ;;  %v2844_v12 = vld [vmem:[%s4662_s23 + $0x310] sm:$0xff]  ;;  %v2831_v17 = vld [vmem:[%s4662_s23 + $0x2a8] sm:$0xff] }
 0x7ec   :  { %1634 = vmatprep.subr.mxu0 %v2899_v19  ;;  %v2827_v19 = vld [vmem:[%s4662_s23 + $0x288] sm:$0xff] }
 0x7ed   :  { %1442 = vmatprep.mubr.f32.mxu0 %v1340_v13  ;;  %1635 = vmatpush1.msra.mxu0 %v2898_v21  ;;  %v2837_v13 = vld [vmem:[%s4662_s23 + $0x2d8] sm:$0xff]  ;;  %v2826_v21 = vld [vmem:[%s4662_s23 + $0x280] sm:$0xff] }
 0x7ee   :  { %1443 = vmatmul.mubr.f32.gmra.mxu0 %v1339_v14  ;;  %1636 = vmatprep.subr.mxu0 %v2894_v23  ;;  %v2843_v14 = vld [vmem:[%s4662_s23 + $0x308] sm:$0xff]  ;;  %v2828_v23 = vld [vmem:[%s4662_s23 + $0x290] sm:$0xff] }
 0x7ef   :  { %1696 = vmatprep.mubr.f32.mxu0 %v3719_v29  ;;  %1637 = vmatpush1.msra.mxu0 %v2893_v26 }
 0x7f0   :  { %1638 = vmatprep.subr.mxu0 %v2889_v28 }
 0x7f1   :  { %1639 = vmatpush1.msra.mxu0 %v2888_v32 }
 0x7f2   :  { %1640 = vmatprep.subr.mxu0 %v2884_v34 }
 0x7f3   :  { %1641 = vmatpush1.msra.mxu0 %v2883_v36  ;;  %v2825_v36 = vld [vmem:[%s4663_s27 + $0x1] ss:$0 sm:$0xff] }
 0x8aa   :  { %v3033_v38 = vpop.f32.mrf.mxu0 }
 0x8ac   :  { %v3034_v39 = vpop.f32.mrf.mxu0 }
 0x8ad   :  { %v3035_v40 = vadd.f32 %v3034_v39, %v3033_v38 }
 0x8ae   :  { %v3036_v41 = vpop.f32.mrf.mxu0 }
 0x8af   :  { %v4290_v42 = vadd.f32 %v3035_v40, %v4211_v9  ;;  %v2879_v9 = vld [vmem:[%s4662_s23 + $0x428] sm:$0xff]  ;;  %v2900_v40 = vld [vmem:[%s4662_s23 + $0x4d0] sm:$0xff] }
 0x8b0   :  { %v3037_v43 = vpop.f32.mrf.mxu0  ;;  %1642 = vmatprep.subr.mxu0 %v2879_v9  ;;  %v2875_v9 = vld [vmem:[%s4662_s23 + $0x408] sm:$0xff] }
 0x8b1   :  { %v3038_v44 = vadd.f32 %v3037_v43, %v3036_v41  ;;  %v1452_v47 = vmul.f32 %v4290_v42, %v4290_v42  ;;  %1643 = vmatpush1.msra.mxu0 %v2878_v51  ;;  %v2895_v43 = vld [vmem:[%s4662_s23 + $0x4a8] sm:$0xff]  ;;  %v2865_v51 = vld [vmem:[%s4662_s23 + $0x3b8] sm:$0xff] }
 0x8b2   :  { %1644 = vmatprep.subr.mxu0 %v2874_v53  ;;  %v2855_v53 = vld [vmem:[%s4662_s23 + $0x368] sm:$0xff] }
 0x8b3   :  { %v4295_v48 = vadd.f32 %v3038_v44, %v4208_v7  ;;  %1454 = vadd.xlane.f32.xlu0 %v1452_v47  ;;  %v2872_v7 = vld [vmem:[%s4662_s23 + $0x3f0] sm:$0xff]  ;;  %1645 = vmatpush1.msra.mxu0 %v2873_v24  ;;  %v2890_v47 = vld [vmem:[%s4662_s23 + $0x480] sm:$0xff]  ;;  %v2845_v24 = vld [vmem:[%s4662_s23 + $0x318] sm:$0xff] }
 0x8b4   :  { %1567 = vmatprep.subr.mxu1 %v2872_v7  ;;  %1646 = vmatprep.subr.mxu0 %v2869_v56  ;;  %v2870_v7 = vld [vmem:[%s4662_s23 + $0x3e0] sm:$0xff]  ;;  %v2835_v56 = vld [vmem:[%s4662_s23 + $0x2c8] sm:$0xff] }
 0x8b5   :  { %v1453_v49 = vmul.f32 %v4295_v48, %v4295_v48  ;;  %1568 = vmatpush1.msra.mxu1 %v2871_v52  ;;  %1647 = vmatpush1.msra.mxu0 %v2868_v57  ;;  %v2860_v52 = vld [vmem:[%s4662_s23 + $0x390] sm:$0xff] }
 0x8b6   :  { %1569 = vmatprep.subr.mxu1 %v2867_v54  ;;  %1648 = vmatprep.subr.mxu0 %v2864_v58  ;;  %v2850_v54 = vld [vmem:[%s4662_s23 + $0x340] sm:$0xff] }
 0x8b7   :  { %1456 = vadd.xlane.f32.xlu1 %v1453_v49  ;;  %1570 = vmatpush1.msra.mxu1 %v2866_v55  ;;  %v2885_v49 = vld [vmem:[%s4662_s23 + $0x458] sm:$0xff]  ;;  %v2840_v55 = vld [vmem:[%s4662_s23 + $0x2f0] sm:$0xff] }
 0x8b8   :  { %1571 = vmatprep.subr.mxu1 %v2862_v3  ;;  %1649 = vmatpush1.msra.mxu0 %v2863_v60  ;;  %v2830_v3 = vld [vmem:[%s4662_s23 + $0x2a0] sm:$0xff] }
 0x8b9   :  { %1572 = vmatpush1.msra.mxu1 %v2861_v27  ;;  %1650 = vmatprep.subr.mxu0 %v2859_v31 }
 0x8ba   :  { %1573 = vmatprep.subr.mxu1 %v2857_v59  ;;  %1651 = vmatpush1.msra.mxu0 %v2858_v63  ;;  %v3521_v59 = vld [vmem:[%s4641_s8] sm:$0xff] }
 0x8bb   :  { %1574 = vmatpush1.msra.mxu1 %v2856_v61  ;;  %1652 = vmatprep.subr.mxu0 %v2854_v1  ;;  %v3522_v61 = vld [vmem:[%s4642_s9] sm:$0xff] }
 0x8bc   :  { %1575 = vmatprep.subr.mxu1 %v2852_v62  ;;  %1653 = vmatpush1.msra.mxu0 %v2853_v4  ;;  %v4493_v63 = vld [vmem:[%s4644_s11] ss:$0 sm:$0xff] }
 0x8bd   :  { %1576 = vmatpush1.msra.mxu1 %v2851_v0  ;;  %1654 = vmatprep.subr.mxu0 %v2849_v6 }
 0x8be   :  { %1577 = vmatprep.subr.mxu1 %v2847_v2  ;;  %1655 = vmatpush1.msra.mxu0 %v2848_v10  ;;  %v3524_v10 = vld [vmem:[%s4641_s8 + $0x8] sm:$0xff] }
 0x8bf   :  { %1578 = vmatpush1.msra.mxu1 %v2846_v5  ;;  %1656 = vmatprep.subr.mxu0 %v2844_v12  ;;  %v3525_v12 = vld [vmem:[%s4642_s9 + $0x8] sm:$0xff]  ;;  %s3720_s9 = smov [#allocation16]  }
 0x8c0   :  { %1579 = vmatprep.subr.mxu1 %v2842_v8  ;;  %1657 = vmatpush1.msra.mxu0 %v2843_v14  ;;  %s2785_s2 = sshll.u32 %s3720_s9, 4  ;;  %s2786_s2 = int_to_ptr.vmem [resolvable:$true] %s2785_s2 }
 0x8c1   :  { %1580 = vmatpush1.msra.mxu1 %v2841_v11  ;;  %1658 = vmatprep.subr.mxu0 %v2839_v45  ;;  %s3657_s26 = scalar_lea.vmem %s2786_s2, 16  ;;  %s3661_s27 = scalar_lea.vmem %s2786_s2, 32 }
 0x8c2   :  { %1581 = vmatprep.subr.mxu1 %v2837_v13  ;;  %1659 = vmatpush1.msra.mxu0 %v2838_v46  ;;  %p3658_p2 = scmp.ne.s32.totalorder %s2786_s2, %s3657_s26  ;;  %p3662_p3 = scmp.lt.s32.totalorder %s2786_s2, %s2786_s2 }
 0x8c3   :  { %1582 = vmatpush1.msra.mxu1 %v2836_v15  ;;  %1660 = vmatprep.subr.mxu0 %v2834_v18  ;;  %p3663_p4 = scmp.lt.s32.totalorder %s3661_s27, %s3657_s26 }
 0x8c4   :  { %1583 = vmatprep.subr.mxu1 %v2832_v16  ;;  %1661 = vmatpush1.msra.mxu0 %v2833_v20 }
 0x8c5   :  { %1584 = vmatpush1.msra.mxu1 %v2831_v17  ;;  %1662 = vmatprep.subr.mxu0 %v2829_v22  ;;  %p3664_p5 = por %p3663_p4, %p3662_p3 }
 0x8c6   :  { %1585 = vmatprep.subr.mxu1 %v2827_v19  ;;  %1663 = vmatpush1.msra.mxu0 %v2828_v23 }
 0x8c7   :  { %1586 = vmatpush1.msra.mxu1 %v2826_v21  ;;  %v4506_v21 = vld [vmem:[%s4644_s11 + $0x1] ss:$0 sm:$0xff]  ;;  %p3665_p6 = pnand %p3664_p5, %p3658_p2 }
 0x8c8   :  { %3270 = vmatprep.subr.mxu1 %v2905_v25 }
 0x93c   :  { %v1455_v26 = vpop.xlane.xlu0 %1454 }
 0x93d   :  { %v1458_v28 = vmul.f32 0.0078125, %v1455_v26 }
 0x93f   :  { %v1460_v30 = vadd.f32 1e-06, %v1458_v28 }
 0x940   :  { %v1457_v32 = vpop.xlane.xlu1 %1456 }
 0x941   :  { %3447 = vrsqrt.f32 %v1460_v30  ;;  %v1459_v33 = vmul.f32 0.0078125, %v1457_v32  ;;  %v4520_v30 = vld [vmem:[%s4644_s11 + $0x3] ss:$0 sm:$0xff] }
 0x943   :  { %v1461_v34 = vadd.f32 1e-06, %v1459_v33 }
 0x945   :  { %3449 = vrsqrt.f32 %v1461_v34 }
 0x94e   :  { %v3448_v35 = vpop.eup %3447 }
 0x94f   :  { %v1464_v37 = vmul.f32 %v3448_v35, %v4290_v42  ;;  %v3529_v35 = vld [vmem:[%s4643_s10 + $0x8] sm:$0xff] }
 0x951   :  { %v1472_v38 = vmul.f32 %v2825_v36, %v1464_v37 }
 0x952   :  { %v3450_v39 = vpop.eup %3449 }
 0x953   :  { %1620 = vmatmul.mubr.f32.vlgmr.msra.gmra.mxu1 %v1472_v38  ;;  %1697 = vmatmul.mubr.f32.vlgmr.msra.gmra.mxu0 %v1472_v38  ;;  %v1465_v41 = vmul.f32 %v3450_v39, %v4295_v48 }
 0x954   :  { %3271 = vmatpush3.msra.mxu1 %v2905_v25  ;;  %1625 = vmatprep.mubr.f32.mxu1 %v3719_v29  ;;  %v4513_v25 = vld [vmem:[%s4644_s11 + $0x2] ss:$0 sm:$0xff] }
 0x955   :  { %3272 = vmatprep.subr.mxu1 %v2900_v40  ;;  %1702 = vmatprep.mubr.f32.mxu0 %v3719_v29  ;;  %v1473_v44 = vmul.f32 %v2825_v36, %v1465_v41 }
 0x956   :  { %3273 = vmatpush3.msra.mxu1 %v2900_v40 }
 0x957   :  { %3274 = vmatprep.subr.mxu1 %v2895_v43  ;;  %1626 = vmatmul.mubr.f32.gmra.mxu1 %v1473_v44 }
 0x958   :  { %1703 = vmatmul.mubr.f32.gmra.mxu0 %v1473_v44  ;;  %3275 = vmatpush3.msra.mxu1 %v2895_v43  ;;  %v3531_v43 = vld [vmem:[%s4643_s10 + $0x18] sm:$0xff] }
 0x959   :  { %3276 = vmatprep.subr.mxu1 %v2890_v47  ;;  %3302 = vmatprep.mubr.f32.mxu1 %v1472_v38  ;;  %v3530_v38 = vld [vmem:[%s4643_s10] sm:$0xff] }
 0x95a   :  { %3277 = vmatpush3.msra.mxu1 %v2890_v47 }
 0x95b   :  { %3278 = vmatprep.subr.mxu1 %v2885_v49 }
 0x95c   :  { %3279 = vmatpush3.msra.mxu1 %v2885_v49 }
 0x95d   :  { %3280 = vmatprep.subr.mxu1 %v2880_v50 }
 0x95e   :  { %3281 = vmatpush3.msra.mxu1 %v2880_v50  ;;  %v3532_v50 = vld [vmem:[%s4643_s10 + $0x10] sm:$0xff] }
 0x95f   :  { %3282 = vmatprep.subr.mxu1 %v2875_v9 }
 0x960   :  { %3283 = vmatpush3.msra.mxu1 %v2875_v9 }
 0x961   :  { %3284 = vmatprep.subr.mxu1 %v2870_v7 }
 0x962   :  { %3285 = vmatpush3.msra.mxu1 %v2870_v7 }
 0x963   :  { %3286 = vmatprep.subr.mxu1 %v2865_v51 }
 0x964   :  { %3287 = vmatpush3.msra.mxu1 %v2865_v51 }
 0x965   :  { %3288 = vmatprep.subr.mxu1 %v2860_v52 }
 0x966   :  { %3289 = vmatpush3.msra.mxu1 %v2860_v52  ;;  %v3533_v52 = vld [vmem:[%s4643_s10 + $0x28] sm:$0xff] }
 0x967   :  { %3290 = vmatprep.subr.mxu1 %v2855_v53 }
 0x968   :  { %3291 = vmatpush3.msra.mxu1 %v2855_v53 }
 0x969   :  { %3292 = vmatprep.subr.mxu1 %v2850_v54 }
 0x96a   :  { %3293 = vmatpush3.msra.mxu1 %v2850_v54 }
 0x96b   :  { %3294 = vmatprep.subr.mxu1 %v2845_v24 }
 0x96c   :  { %3295 = vmatpush3.msra.mxu1 %v2845_v24 }
 0x96d   :  { %3296 = vmatprep.subr.mxu1 %v2840_v55 }
 0x96e   :  { %3297 = vmatpush3.msra.mxu1 %v2840_v55  ;;  %v3534_v55 = vld [vmem:[%s4643_s10 + $0x20] sm:$0xff] }
 0x96f   :  { %3298 = vmatprep.subr.mxu1 %v2835_v56 }
 0x970   :  { %3299 = vmatpush3.msra.mxu1 %v2835_v56 }
 0x971   :  { %3300 = vmatprep.subr.mxu1 %v2830_v3 }
 0x972   :  { %3301 = vmatpush3.msra.mxu1 %v2830_v3 }
 0x973   :  { %3303 = vmatmul.mubr.f32.vlgmr.msra.gmra.mxu1 %v1473_v44 }
 0x974   :  { %2387 = vmatprep.mubr.f32.mxu1 %v3719_v29 }
 0xa13   :  { %v1621_v57 = vpop.f32.mrf.mxu1  ;;  %v1698_v27 = vpop.f32.mrf.mxu0 }
 0xa14   :  { %v1784_v60 = vmul.f32 %v3521_v59, %v1621_v57 }
 0xa15   :  { %v1700_v58 = vpop.f32.mrf.mxu0  ;;  %v1623_v1 = vpop.f32.mrf.mxu1 }
 0xa16   :  { %v1786_v31 = vmul.f32 %v3522_v61, %v1700_v58  ;;  %v1790_v15 = vmul.f32 %v3521_v59, %v1623_v1 }
 0xa17   :  { %v1627_v2 = vpop.f32.mrf.mxu1 }
 0xa18   :  { %v1788_v62 = vadd.f32 %v1786_v31, %v1784_v60  ;;  %v1704_v4 = vpop.f32.mrf.mxu0  ;;  %v1785_v17 = vmul.f32 %v3524_v10, %v1627_v2 }
 0xa19   :  { %v1629_v5 = vpop.f32.mrf.mxu1 }
 0xa1a   :  { %v1796_v0 = vmul.f32 %v4493_v63, %v1788_v62  ;;  %v1706_v6 = vpop.f32.mrf.mxu0  ;;  %v1791_v11 = vmul.f32 %v3524_v10, %v1629_v5  ;;  %v1798_v22 = vmul.f32 %v4506_v21, %v1788_v62  ;;  %v1800_v26 = vmul.f32 %v4513_v25, %v1788_v62 }
 0xa1b   :  { %v1787_v45 = vmul.f32 %v3525_v12, %v1706_v6  ;;  %v1802_v32 = vmul.f32 %v4520_v30, %v1788_v62 }
 0xa1c   :  { %3309 = vmatprep.mubr.f32.mxu0 %v1796_v0 }
 0xa1d   :  { %v1789_v19 = vadd.f32 %v1787_v45, %v1785_v17 }
 0xa1f   :  { %v1797_v20 = vmul.f32 %v4493_v63, %v1789_v19  ;;  %v1799_v23 = vmul.f32 %v4506_v21, %v1789_v19  ;;  %v1801_v28 = vmul.f32 %v4513_v25, %v1789_v19  ;;  %v1803_v33 = vmul.f32 %v4520_v30, %v1789_v19 }
 0xa33   :  { %v3304_v8 = vpop.f32.mrf.mxu1 }
 0xa34   :  { %v1793_v13 = vmul.f32 %v3525_v12, %v3304_v8 }
 0xa35   :  { %v1775_v14 = vpop.f32.mrf.mxu1 }
 0xa36   :  { %v1795_v16 = vadd.f32 %v1793_v13, %v1791_v11  ;;  %v1792_v46 = vmul.f32 %v3522_v61, %v1775_v14  ;;  %v3536_v61 = vld [vmem:[%s4643_s10 + $0x30] sm:$0xff] }
 0xa38   :  { %v1794_v18 = vadd.f32 %v1792_v46, %v1790_v15  ;;  %3305 = vmatprep.subr.mxu0 %v1795_v16 }
 0xa39   :  { %3306 = vmatpush3.xpose.msra.mxu0 %v1795_v16 }
 0xa3a   :  { %3307 = vmatprep.subr.mxu0 %v1794_v18 }
 0xa3d   :  { %3308 = vmatpush3.xpose.msra.mxu0 %v1794_v18 }
 0xa3e   :  { %3321 = vmatprep.subr.mxu0 %v1704_v4 }
 0xa40   :  { %3310 = vmatmul.mubr.f32.vlgmr.msra.gmra.mxu0 %v1797_v20 }
 0xa41   :  { %3312 = vmatprep.mubr.f32.mxu0 %v1798_v22  ;;  %3322 = vmatpush3.msra.mxu0 %v1704_v4 }
 0xa42   :  { %3323 = vmatprep.subr.mxu0 %v1698_v27 }
 0xa43   :  { %3324 = vmatpush3.msra.mxu0 %v1698_v27  ;;  %v3535_v27 = vld [vmem:[%s4643_s10 + $0x38] sm:$0xff] }
 0xa44   :  { %3313 = vmatmul.mubr.f32.gmra.mxu0 %v1799_v23 }
 0xa45   :  { %3315 = vmatprep.mubr.f32.mxu0 %v1800_v26 }
 0xa48   :  { %3316 = vmatmul.mubr.f32.gmra.mxu0 %v1801_v28 }
 0xa49   :  { %3318 = vmatprep.mubr.f32.mxu0 %v1802_v32 }
 0xa4c   :  { %3319 = vmatmul.mubr.f32.gmra.mxu0 %v1803_v33 }
 0xb00   :  { %v3311_v34 = vpop.f32.mrf.mxu0 }
 0xb01   :  { %v1876_v36 = vadd.f32 %v3529_v35, %v3311_v34 }
 0xb02   :  { %v1870_v37 = vpop.f32.mrf.mxu0 }
 0xb03   :  { %v1871_v39 = vadd.f32 %v3530_v38, %v1870_v37  ;;  %v1912_v40 = vsel %vm743_vm0, %v1876_v36, -inf }
 0xb04   :  { %1913 = vmax.xlane.f32.xlu1 %v1912_v40  ;;  %v3314_v41 = vpop.f32.mrf.mxu0 }
 0xb05   :  { %v1886_v44 = vadd.f32 %v3531_v43, %v3314_v41  ;;  %v1909_v47 = vsel %vm743_vm0, %v1871_v39, -inf }
 0xb06   :  { %v1880_v49 = vpop.f32.mrf.mxu0  ;;  %1910 = vmax.xlane.f32.xlu0 %v1909_v47 }
 0xb07   :  { %v1881_v9 = vadd.f32 %v3532_v50, %v1880_v49  ;;  %v1918_v7 = vsel %vm743_vm0, %v1886_v44, -inf }
 0xb08   :  { %1919 = vmax.xlane.f32.xlu1 %v1918_v7  ;;  %v3317_v51 = vpop.f32.mrf.mxu0 }
 0xb09   :  { %v1896_v53 = vadd.f32 %v3533_v52, %v3317_v51  ;;  %v1915_v54 = vsel %vm743_vm0, %v1881_v9, -inf  ;;  %v2156_v51 = vld [vmem:[#allocation7 + $0xf8] sm:$0xff] }
 0xb0a   :  { %v1890_v24 = vpop.f32.mrf.mxu0  ;;  %1916 = vmax.xlane.f32.xlu0 %v1915_v54  ;;  %3337 = vmatprep.subr.mxu0 %v2156_v51 }
 0xb0b   :  { %v1891_v56 = vadd.f32 %v3534_v55, %v1890_v24  ;;  %v1924_v3 = vsel %vm743_vm0, %v1896_v53, -inf }
 0xb0c   :  { %1925 = vmax.xlane.f32.xlu1 %v1924_v3  ;;  %v3320_v57 = vpop.f32.mrf.mxu0 }
 0xb0d   :  { %v1906_v58 = vadd.f32 %v3535_v27, %v3320_v57  ;;  %v1921_v59 = vsel %vm743_vm0, %v1891_v56, -inf }
 0xb0e   :  { %v1900_v60 = vpop.f32.mrf.mxu0  ;;  %1922 = vmax.xlane.f32.xlu0 %v1921_v59 }
 0xb0f   :  { %v1901_v31 = vadd.f32 %v3536_v61, %v1900_v60  ;;  %v1930_v62 = vsel %vm743_vm0, %v1906_v58, -inf }
 0xb10   :  { %1931 = vmax.xlane.f32.xlu1 %v1930_v62 }
 0xb11   :  { %v1927_v0 = vsel %vm743_vm0, %v1901_v31, -inf }
 0xb12   :  { %1928 = vmax.xlane.f32.xlu0 %v1927_v0 }
 0xb8d   :  { %v1914_v1 = vpop.xlane.xlu1 %1913 }
 0xb8e   :  { %v1934_v2 = vsub.f32 %v1876_v36, %v1914_v1  ;;  %v2154_v1 = vld [vmem:[#allocation7 + $0xe8] sm:$0xff] }
 0xb8f   :  { %v1911_v4 = vpop.xlane.xlu0 %1910 }
 0xb90   :  { %v1943_v5 = vmul.f32 1.442695, %v1934_v2  ;;  %v1933_v6 = vsub.f32 %v1871_v39, %v1911_v4 }
 0xb91   :  { %v1920_v8 = vpop.xlane.xlu1 %1919 }
 0xb92   :  { %3451 = vpow2.f32 %v1943_v5  ;;  %v1941_v10 = vmul.f32 1.442695, %v1933_v6  ;;  %v1936_v11 = vsub.f32 %v1886_v44, %v1920_v8  ;;  %v2153_v5 = vld [vmem:[#allocation7 + $0xe0] sm:$0xff] }
 0xb93   :  { %v1917_v12 = vpop.xlane.xlu0 %1916 }
 0xb94   :  { %3453 = vpow2.f32 %v1941_v10  ;;  %v1947_v13 = vmul.f32 1.442695, %v1936_v11  ;;  %v1935_v14 = vsub.f32 %v1881_v9, %v1917_v12  ;;  %v2152_v10 = vld [vmem:[#allocation7 + $0xd8] sm:$0xff] }
 0xb95   :  { %v1926_v15 = vpop.xlane.xlu1 %1925 }
 0xb96   :  { %3455 = vpow2.f32 %v1947_v13  ;;  %v1945_v45 = vmul.f32 1.442695, %v1935_v14  ;;  %v1938_v16 = vsub.f32 %v1896_v53, %v1926_v15  ;;  %v2151_v13 = vld [vmem:[#allocation7 + $0xd0] sm:$0xff] }
 0xb97   :  { %v1923_v46 = vpop.xlane.xlu0 %1922 }
 0xb98   :  { %3457 = vpow2.f32 %v1945_v45  ;;  %v1951_v17 = vmul.f32 1.442695, %v1938_v16  ;;  %v1937_v18 = vsub.f32 %v1891_v56, %v1923_v46  ;;  %v2150_v16 = vld [vmem:[#allocation7 + $0xc8] sm:$0xff]  ;;  %v2149_v46 = vld [vmem:[#allocation7 + $0xc0] sm:$0xff] }
 0xb99   :  { %v1932_v19 = vpop.xlane.xlu1 %1931 }
 0xb9a   :  { %3459 = vpow2.f32 %v1951_v17  ;;  %v1949_v20 = vmul.f32 1.442695, %v1937_v18  ;;  %v1940_v22 = vsub.f32 %v1906_v58, %v1932_v19  ;;  %v2148_v17 = vld [vmem:[#allocation7 + $0xb8] sm:$0xff]  ;;  %v2147_v18 = vld [vmem:[#allocation7 + $0xb0] sm:$0xff]  ;;  %v2146_v19 = vld [vmem:[#allocation7 + $0xa8] sm:$0xff] }
 0xb9b   :  { %v1929_v23 = vpop.xlane.xlu0 %1928 }
 0xb9c   :  { %3461 = vpow2.f32 %v1949_v20  ;;  %v1955_v26 = vmul.f32 1.442695, %v1940_v22  ;;  %v1939_v28 = vsub.f32 %v1901_v31, %v1929_v23  ;;  %v2155_v31 = vld [vmem:[#allocation7 + $0xf0] sm:$0xff]  ;;  %v2145_v20 = vld [vmem:[#allocation7 + $0xa0] sm:$0xff]  ;;  %v2144_v22 = vld [vmem:[#allocation7 + $0x98] sm:$0xff] }
 0xb9d   :  { %v2143_v23 = vld [vmem:[#allocation7 + $0x90] sm:$0xff] }
 0xb9e   :  { %3463 = vpow2.f32 %v1955_v26  ;;  %v1953_v32 = vmul.f32 1.442695, %v1939_v28  ;;  %v2142_v26 = vld [vmem:[#allocation7 + $0x88] sm:$0xff]  ;;  %v2141_v28 = vld [vmem:[#allocation7 + $0x80] sm:$0xff] }
 0xb9f   :  { %v3452_v33 = vpop.eup %3451 }
 0xba0   :  { %3465 = vpow2.f32 %v1953_v32  ;;  %v1960_v34 = vsel %vm743_vm0, %v3452_v33, 0.0 }
 0xba1   :  { %v3454_v35 = vpop.eup %3453  ;;  %1961 = vadd.xlane.f32.xlu1 %v1960_v34 }
 0xba2   :  { %v1957_v36 = vsel %vm743_vm0, %v3454_v35, 0.0 }
 0xba3   :  { %v3456_v37 = vpop.eup %3455  ;;  %1958 = vadd.xlane.f32.xlu0 %v1957_v36 }
 0xba4   :  { %v1966_v38 = vsel %vm743_vm0, %v3456_v37, 0.0 }
 0xba5   :  { %v3458_v39 = vpop.eup %3457  ;;  %1967 = vadd.xlane.f32.xlu1 %v1966_v38 }
 0xba6   :  { %v1963_v40 = vsel %vm743_vm0, %v3458_v39, 0.0 }
 0xba7   :  { %v3460_v41 = vpop.eup %3459  ;;  %1964 = vadd.xlane.f32.xlu0 %v1963_v40 }
 0xba8   :  { %v1972_v43 = vsel %vm743_vm0, %v3460_v41, 0.0 }
 0xba9   :  { %v3462_v44 = vpop.eup %3461  ;;  %1973 = vadd.xlane.f32.xlu1 %v1972_v43 }
 0xbaa   :  { %v1969_v47 = vsel %vm743_vm0, %v3462_v44, 0.0 }
 0xbab   :  { %v3464_v49 = vpop.eup %3463  ;;  %1970 = vadd.xlane.f32.xlu0 %v1969_v47 }
 0xbac   :  { %v1978_v50 = vsel %vm743_vm0, %v3464_v49, 0.0 }
 0xbad   :  { %v3466_v9 = vpop.eup %3465  ;;  %1979 = vadd.xlane.f32.xlu1 %v1978_v50 }
 0xbae   :  { %v1975_v7 = vsel %vm743_vm0, %v3466_v9, 0.0 }
 0xbaf   :  { %1976 = vadd.xlane.f32.xlu0 %v1975_v7 }
 0xc2a   :  { %v1962_v52 = vpop.xlane.xlu1 %1961 }
 0xc2b   :  { %3467 = vrcp.f32 %v1962_v52 }
 0xc2c   :  { %v1959_v53 = vpop.xlane.xlu0 %1958 }
 0xc2d   :  { %3469 = vrcp.f32 %v1959_v53 }
 0xc2e   :  { %v1968_v54 = vpop.xlane.xlu1 %1967 }
 0xc2f   :  { %3471 = vrcp.f32 %v1968_v54 }
 0xc30   :  { %v1965_v24 = vpop.xlane.xlu0 %1964 }
 0xc31   :  { %3473 = vrcp.f32 %v1965_v24  ;;  %v2320_v24 = vld [vmem:[#allocation9 + $0x3e8] sm:$0xff] }
 0xc32   :  { %v1974_v55 = vpop.xlane.xlu1 %1973  ;;  %2323 = vmatprep.subr.mxu1 %v2320_v24  ;;  %v2266_v24 = vld [vmem:[#allocation9 + $0x238] sm:$0xff] }
 0xc33   :  { %3475 = vrcp.f32 %v1974_v55  ;;  %v2319_v55 = vld [vmem:[#allocation9 + $0x3e0] sm:$0xff] }
 0xc34   :  { %v1971_v56 = vpop.xlane.xlu0 %1970  ;;  %2324 = vmatpush1.msra.mxu1 %v2319_v55  ;;  %v2265_v55 = vld [vmem:[#allocation9 + $0x230] sm:$0xff] }
 0xc35   :  { %3477 = vrcp.f32 %v1971_v56  ;;  %v2316_v56 = vld [vmem:[#allocation9 + $0x3c8] sm:$0xff] }
 0xc36   :  { %v1980_v3 = vpop.xlane.xlu1 %1979  ;;  %2325 = vmatprep.subr.mxu1 %v2316_v56  ;;  %v2262_v56 = vld [vmem:[#allocation9 + $0x218] sm:$0xff] }
 0xc37   :  { %3479 = vrcp.f32 %v1980_v3  ;;  %v2318_v3 = vld [vmem:[#allocation9 + $0x3d8] sm:$0xff] }
 0xc38   :  { %v1977_v57 = vpop.xlane.xlu0 %1976  ;;  %v3468_v27 = vpop.eup %3467 }
 0xc39   :  { %3481 = vrcp.f32 %v1977_v57  ;;  %v1990_v60 = vmul.f32 %v3468_v27, %v3452_v33  ;;  %v2315_v57 = vld [vmem:[#allocation9 + $0x3c0] sm:$0xff]  ;;  %v2317_v27 = vld [vmem:[#allocation9 + $0x3d0] sm:$0xff] }
 0xc3a   :  { %v3470_v58 = vpop.eup %3469  ;;  %2326 = vmatpush1.msra.mxu1 %v2315_v57  ;;  %v2261_v57 = vld [vmem:[#allocation9 + $0x210] sm:$0xff] }
 0xc3b   :  { %v1989_v59 = vmul.f32 %v3470_v58, %v3454_v35  ;;  %v2314_v58 = vld [vmem:[#allocation9 + $0x3b8] sm:$0xff] }
 0xc3c   :  { %v3472_v61 = vpop.eup %3471 }
 0xc3d   :  { %3325 = vmatprep.mubr.msk.f32.mxu0 %vm743_vm0, %v1989_v59  ;;  %v1992_v2 = vmul.f32 %v3472_v61, %v3456_v37  ;;  %v2311_v59 = vld [vmem:[#allocation9 + $0x3a0] sm:$0xff]  ;;  %v2308_v61 = vld [vmem:[#allocation9 + $0x388] sm:$0xff] }
 0xc3e   :  { %v3474_v62 = vpop.eup %3473  ;;  %3326 = vmatmul.mubr.msk.f32.vlgmr.msra.gmra.mxu0 %vm743_vm0, %v1990_v60  ;;  %v2313_v60 = vld [vmem:[#allocation9 + $0x3b0] sm:$0xff] }
 0xc3f   :  { %v1991_v0 = vmul.f32 %v3474_v62, %v3458_v39  ;;  %3338 = vmatpush3.msra.mxu0 %v2156_v51  ;;  %v2307_v62 = vld [vmem:[#allocation9 + $0x380] sm:$0xff] }
 0xc40   :  { %3339 = vmatprep.subr.mxu0 %v2155_v31  ;;  %v3476_v4 = vpop.eup %3475 }
 0xc41   :  { %3328 = vmatprep.mubr.msk.f32.mxu0 %vm743_vm0, %v1991_v0  ;;  %3340 = vmatpush3.msra.mxu0 %v2155_v31  ;;  %v1994_v11 = vmul.f32 %v3476_v4, %v3460_v41  ;;  %v2310_v31 = vld [vmem:[#allocation9 + $0x398] sm:$0xff]  ;;  %v2309_v0 = vld [vmem:[#allocation9 + $0x390] sm:$0xff] }
 0xc42   :  { %v3478_v6 = vpop.eup %3477  ;;  %3329 = vmatmul.mubr.msk.f32.gmra.mxu0 %vm743_vm0, %v1992_v2  ;;  %3341 = vmatprep.subr.mxu0 %v2154_v1 }
 0xc43   :  { %v1993_v8 = vmul.f32 %v3478_v6, %v3462_v44  ;;  %3342 = vmatpush3.msra.mxu0 %v2154_v1 }
 0xc44   :  { %3343 = vmatprep.subr.mxu0 %v2153_v5  ;;  %v3480_v12 = vpop.eup %3479 }
 0xc45   :  { %3331 = vmatprep.mubr.msk.f32.mxu0 %vm743_vm0, %v1993_v8  ;;  %3344 = vmatpush3.msra.mxu0 %v2153_v5  ;;  %v1996_v45 = vmul.f32 %v3480_v12, %v3464_v49  ;;  %v2303_v12 = vld [vmem:[#allocation9 + $0x360] sm:$0xff] }
 0xc46   :  { %v3482_v14 = vpop.eup %3481  ;;  %3332 = vmatmul.mubr.msk.f32.gmra.mxu0 %vm743_vm0, %v1994_v11  ;;  %3345 = vmatprep.subr.mxu0 %v2152_v10  ;;  %v2306_v11 = vld [vmem:[#allocation9 + $0x378] sm:$0xff] }
 0xc47   :  { %v1995_v15 = vmul.f32 %v3482_v14, %v3466_v9  ;;  %3346 = vmatpush3.msra.mxu0 %v2152_v10  ;;  %v2304_v10 = vld [vmem:[#allocation9 + $0x368] sm:$0xff]  ;;  %v2302_v14 = vld [vmem:[#allocation9 + $0x358] sm:$0xff] }
 0xc48   :  { %3347 = vmatprep.subr.mxu0 %v2151_v13 }
 0xc49   :  { %3334 = vmatprep.mubr.msk.f32.mxu0 %vm743_vm0, %v1995_v15  ;;  %3348 = vmatpush3.msra.mxu0 %v2151_v13  ;;  %v2305_v13 = vld [vmem:[#allocation9 + $0x370] sm:$0xff] }
 0xc4a   :  { %3335 = vmatmul.mubr.msk.f32.gmra.mxu0 %vm743_vm0, %v1996_v45  ;;  %3349 = vmatprep.subr.mxu0 %v2150_v16  ;;  %v2301_v15 = vld [vmem:[#allocation9 + $0x350] sm:$0xff]  ;;  %v2296_v45 = vld [vmem:[#allocation9 + $0x328] sm:$0xff] }
 0xc4b   :  { %3350 = vmatpush3.msra.mxu0 %v2150_v16  ;;  %v2298_v16 = vld [vmem:[#allocation9 + $0x338] sm:$0xff] }
 0xc4c   :  { %3351 = vmatprep.subr.mxu0 %v2149_v46 }
 0xc4d   :  { %3352 = vmatpush3.msra.mxu0 %v2149_v46  ;;  %v2295_v46 = vld [vmem:[#allocation9 + $0x320] sm:$0xff] }
 0xc4e   :  { %3353 = vmatprep.subr.mxu0 %v2148_v17 }
 0xc4f   :  { %3354 = vmatpush3.msra.mxu0 %v2148_v17  ;;  %v2297_v17 = vld [vmem:[#allocation9 + $0x330] sm:$0xff] }
 0xc50   :  { %3355 = vmatprep.subr.mxu0 %v2147_v18 }
 0xc51   :  { %3356 = vmatpush3.msra.mxu0 %v2147_v18  ;;  %v2292_v18 = vld [vmem:[#allocation9 + $0x308] sm:$0xff] }
 0xc52   :  { %3357 = vmatprep.subr.mxu0 %v2146_v19 }
 0xc53   :  { %3358 = vmatpush3.msra.mxu0 %v2146_v19  ;;  %v2294_v19 = vld [vmem:[#allocation9 + $0x318] sm:$0xff] }
 0xc54   :  { %3359 = vmatprep.subr.mxu0 %v2145_v20 }
 0xc55   :  { %3360 = vmatpush3.msra.mxu0 %v2145_v20  ;;  %v2291_v20 = vld [vmem:[#allocation9 + $0x300] sm:$0xff] }
 0xc56   :  { %3361 = vmatprep.subr.mxu0 %v2144_v22 }
 0xc57   :  { %3362 = vmatpush3.msra.mxu0 %v2144_v22  ;;  %v2293_v22 = vld [vmem:[#allocation9 + $0x310] sm:$0xff] }
 0xc58   :  { %3363 = vmatprep.subr.mxu0 %v2143_v23 }
 0xc59   :  { %3364 = vmatpush3.msra.mxu0 %v2143_v23  ;;  %v2288_v23 = vld [vmem:[#allocation9 + $0x2e8] sm:$0xff] }
 0xc5a   :  { %3365 = vmatprep.subr.mxu0 %v2142_v26 }
 0xc5b   :  { %3366 = vmatpush3.msra.mxu0 %v2142_v26  ;;  %v2290_v26 = vld [vmem:[#allocation9 + $0x2f8] sm:$0xff] }
 0xc5c   :  { %3367 = vmatprep.subr.mxu0 %v2141_v28 }
 0xc5d   :  { %3368 = vmatpush3.msra.mxu0 %v2141_v28  ;;  %v2287_v28 = vld [vmem:[#allocation9 + $0x2e0] sm:$0xff] }
 0xcfe   :  { %v3327_v32 = vpop.f32.mrf.mxu0 }
 0xcff   :  { %v2127_v43 = vmul.f32 %v4493_v63, %v3327_v32  ;;  %v2289_v32 = vld [vmem:[#allocation9 + $0x2f0] sm:$0xff] }
 0xd00   :  { %v2087_v33 = vpop.f32.mrf.mxu0 }
 0xd01   :  { %v2126_v40 = vmul.f32 %v4493_v63, %v2087_v33  ;;  %v2322_v63 = vld [vmem:[#allocation9 + $0x3f8] sm:$0xff]  ;;  %v2284_v33 = vld [vmem:[#allocation9 + $0x2c8] sm:$0xff] }
 0xd02   :  { %v3330_v34 = vpop.f32.mrf.mxu0  ;;  %2400 = vmatprep.subr.mxu0 %v2322_v63  ;;  %v2263_v63 = vld [vmem:[#allocation9 + $0x220] sm:$0xff] }
 0xd03   :  { %v2129_v38 = vmul.f32 %v4506_v21, %v3330_v34  ;;  %v2286_v34 = vld [vmem:[#allocation9 + $0x2d8] sm:$0xff] }
 0xd04   :  { %v2097_v35 = vpop.f32.mrf.mxu0 }
 0xd05   :  { %v2128_v37 = vmul.f32 %v4506_v21, %v2097_v35  ;;  %v2131_v50 = vadd.f32 %v2129_v38, %v2127_v43  ;;  %v2283_v35 = vld [vmem:[#allocation9 + $0x2c0] sm:$0xff]  ;;  %v2282_v38 = vld [vmem:[#allocation9 + $0x2b8] sm:$0xff] }
 0xd06   :  { %v3333_v36 = vpop.f32.mrf.mxu0  ;;  %v2278_v43 = vld [vmem:[#allocation9 + $0x298] sm:$0xff] }
 0xd07   :  { %v2133_v44 = vmul.f32 %v4513_v25, %v3333_v36  ;;  %v2130_v49 = vadd.f32 %v2128_v37, %v2126_v40  ;;  %v2285_v36 = vld [vmem:[#allocation9 + $0x2d0] sm:$0xff]  ;;  %v2280_v37 = vld [vmem:[#allocation9 + $0x2a8] sm:$0xff] }
 0xd08   :  { %v2107_v39 = vpop.f32.mrf.mxu0  ;;  %v2281_v40 = vld [vmem:[#allocation9 + $0x2b0] sm:$0xff] }
 0xd09   :  { %v2132_v41 = vmul.f32 %v4513_v25, %v2107_v39  ;;  %v2135_v53 = vadd.f32 %v2133_v44, %v2131_v50  ;;  %v2321_v25 = vld [vmem:[#allocation9 + $0x3f0] sm:$0xff]  ;;  %v2279_v39 = vld [vmem:[#allocation9 + $0x2a0] sm:$0xff]  ;;  %v2274_v50 = vld [vmem:[#allocation9 + $0x278] sm:$0xff] }
 0xd0a   :  { %v3336_v47 = vpop.f32.mrf.mxu0  ;;  %v2275_v44 = vld [vmem:[#allocation9 + $0x280] sm:$0xff] }
 0xd0b   :  { %v2137_v9 = vmul.f32 %v4520_v30, %v3336_v47  ;;  %v2134_v51 = vadd.f32 %v2132_v41, %v2130_v49  ;;  %v2276_v41 = vld [vmem:[#allocation9 + $0x288] sm:$0xff]  ;;  %v2277_v47 = vld [vmem:[#allocation9 + $0x290] sm:$0xff] }
 0xd0c   :  { %v2117_v7 = vpop.f32.mrf.mxu0  ;;  %v2272_v49 = vld [vmem:[#allocation9 + $0x268] sm:$0xff] }
 0xd0d   :  { %v2136_v52 = vmul.f32 %v4520_v30, %v2117_v7  ;;  %v2139_v54 = vadd.f32 %v2137_v9, %v2135_v53  ;;  %v2312_v30 = vld [vmem:[#allocation9 + $0x3a8] sm:$0xff]  ;;  %v2271_v9 = vld [vmem:[#allocation9 + $0x260] sm:$0xff]  ;;  %v2273_v7 = vld [vmem:[#allocation9 + $0x270] sm:$0xff] }
 0xd0e   :  { %2327 = vmatprep.subr.mxu1 %v2312_v30  ;;  %v2267_v53 = vld [vmem:[#allocation9 + $0x240] sm:$0xff] }
 0xd0f   :  { %v2138_v21 = vadd.f32 %v2136_v52, %v2134_v51  ;;  %2328 = vmatpush1.msra.mxu1 %v2311_v59  ;;  %v2268_v51 = vld [vmem:[#allocation9 + $0x248] sm:$0xff]  ;;  %v2270_v52 = vld [vmem:[#allocation9 + $0x258] sm:$0xff] }
 0xd10   :  { %2329 = vmatprep.subr.mxu1 %v2308_v61 }
 0xd11   :  { %3369 = vmatprep.mubr.f32.mxu0 %v2138_v21  ;;  %2330 = vmatpush1.msra.mxu1 %v2307_v62  ;;  %v2269_v21 = vld [vmem:[#allocation9 + $0x250] sm:$0xff] }
 0xd12   :  { %3370 = vmatmul.mubr.f32.vlgmr.msra.gmra.mxu0 %v2139_v54  ;;  %2331 = vmatprep.subr.mxu1 %v2304_v10  ;;  %v2264_v54 = vld [vmem:[#allocation9 + $0x228] sm:$0xff]  ;;  %v2541_v10 = vld [vmem:[#allocation10 + $0x1f8] sm:$0xff] }
 0xd13   :  { %2464 = vmatprep.mubr.f32.mxu0 %v3719_v29  ;;  %2401 = vmatpush1.msra.mxu0 %v2321_v25  ;;  %v2260_v25 = vld [vmem:[#allocation9 + $0x208] sm:$0xff] }
 0xd14   :  { %2402 = vmatprep.subr.mxu0 %v2318_v3  ;;  %2332 = vmatpush1.msra.mxu1 %v2303_v12  ;;  %v2259_v3 = vld [vmem:[#allocation9 + $0x200] sm:$0xff]  ;;  %v2540_v12 = vld [vmem:[#allocation10 + $0x1f0] sm:$0xff] }
 0xd15   :  { %2403 = vmatpush1.msra.mxu0 %v2317_v27 }
 0xd16   :  { %2404 = vmatprep.subr.mxu0 %v2314_v58 }
 0xd17   :  { %2405 = vmatpush1.msra.mxu0 %v2313_v60 }
 0xd18   :  { %2406 = vmatprep.subr.mxu0 %v2310_v31 }
 0xd19   :  { %2407 = vmatpush1.msra.mxu0 %v2309_v0 }
 0xd1a   :  { %2408 = vmatprep.subr.mxu0 %v2306_v11  ;;  %v2525_v11 = vld [vmem:[#allocation10 + $0x178] sm:$0xff] }
 0xd1b   :  { %2409 = vmatpush1.msra.mxu0 %v2305_v13  ;;  %v2524_v13 = vld [vmem:[#allocation10 + $0x170] sm:$0xff] }
 0xd1c   :  { %2410 = vmatprep.subr.mxu0 %v2302_v14  ;;  %v2523_v14 = vld [vmem:[#allocation10 + $0x168] sm:$0xff] }
 0xd1d   :  { %2411 = vmatpush1.msra.mxu0 %v2301_v15  ;;  %v2522_v15 = vld [vmem:[#allocation10 + $0x160] sm:$0xff] }
 0xd1e   :  { %2412 = vmatprep.subr.mxu0 %v2298_v16  ;;  %v2521_v16 = vld [vmem:[#allocation10 + $0x158] sm:$0xff] }
 0xd1f   :  { %2413 = vmatpush1.msra.mxu0 %v2297_v17  ;;  %v2520_v17 = vld [vmem:[#allocation10 + $0x150] sm:$0xff] }
 0xd20   :  { %2414 = vmatprep.subr.mxu0 %v2294_v19  ;;  %v2519_v19 = vld [vmem:[#allocation10 + $0x148] sm:$0xff] }
 0xd21   :  { %2415 = vmatpush1.msra.mxu0 %v2293_v22  ;;  %v2518_v22 = vld [vmem:[#allocation10 + $0x140] sm:$0xff] }
 0xd22   :  { %2416 = vmatprep.subr.mxu0 %v2290_v26  ;;  %v2517_v26 = vld [vmem:[#allocation10 + $0x138] sm:$0xff] }
 0xd23   :  { %2417 = vmatpush1.msra.mxu0 %v2289_v32  ;;  %v2516_v32 = vld [vmem:[#allocation10 + $0x130] sm:$0xff] }
 0xd24   :  { %2418 = vmatprep.subr.mxu0 %v2286_v34  ;;  %v2515_v34 = vld [vmem:[#allocation10 + $0x128] sm:$0xff] }
 0xd25   :  { %2419 = vmatpush1.msra.mxu0 %v2285_v36  ;;  %v2514_v36 = vld [vmem:[#allocation10 + $0x120] sm:$0xff] }
 0xd26   :  { %2420 = vmatprep.subr.mxu0 %v2282_v38  ;;  %v2513_v38 = vld [vmem:[#allocation10 + $0x118] sm:$0xff] }
 0xd27   :  { %2421 = vmatpush1.msra.mxu0 %v2281_v40  ;;  %v2512_v40 = vld [vmem:[#allocation10 + $0x110] sm:$0xff] }
 0xd28   :  { %2422 = vmatprep.subr.mxu0 %v2278_v43  ;;  %v2511_v43 = vld [vmem:[#allocation10 + $0x108] sm:$0xff] }
 0xd29   :  { %2423 = vmatpush1.msra.mxu0 %v2277_v47  ;;  %v2510_v47 = vld [vmem:[#allocation10 + $0x100] sm:$0xff] }
 0xd2a   :  { %2424 = vmatprep.subr.mxu0 %v2274_v50 }
 0xd2b   :  { %2425 = vmatpush1.msra.mxu0 %v2273_v7 }
 0xd2c   :  { %2426 = vmatprep.subr.mxu0 %v2270_v52 }
 0xd2d   :  { %2427 = vmatpush1.msra.mxu0 %v2269_v21 }
 0xd2e   :  { %2428 = vmatprep.subr.mxu0 %v2266_v24 }
 0xd2f   :  { %2429 = vmatpush1.msra.mxu0 %v2265_v55 }
 0xd30   :  { %2430 = vmatprep.subr.mxu0 %v2262_v56 }
 0xd31   :  { %2431 = vmatpush1.msra.mxu0 %v2261_v57 }
 0xdd2   :  { %v3371_v1 = vpop.f32.mrf.mxu0 }
 0xdd3   :  { %v4582_v2 = vadd.f32 %v3371_v1, %v4295_v48  ;;  %v2300_v48 = vld [vmem:[#allocation9 + $0x348] sm:$0xff]  ;;  %v2915_v1 = vld [vmem:[%s4638_s5 + $0x1] ss:$0 sm:$0xff] }
 0xdd4   :  { %v2223_v4 = vpop.f32.mrf.mxu0  ;;  %2333 = vmatprep.subr.mxu1 %v2300_v48  ;;  %v2539_v48 = vld [vmem:[#allocation10 + $0x1e8] sm:$0xff] }
 0xdd5   :  { %v4585_v5 = vadd.f32 %v2223_v4, %v4290_v42  ;;  %v2237_v6 = vmul.f32 %v4582_v2, %v4582_v2  ;;  %v2299_v42 = vld [vmem:[#allocation9 + $0x340] sm:$0xff] }
 0xdd6   :  { %2334 = vmatpush1.msra.mxu1 %v2299_v42  ;;  %v2538_v42 = vld [vmem:[#allocation10 + $0x1e0] sm:$0xff] }
 0xdd7   :  { %2240 = vadd.xlane.f32.xlu1 %v2237_v6  ;;  %v2236_v8 = vmul.f32 %v4585_v5, %v4585_v5  ;;  %2335 = vmatprep.subr.mxu1 %v2296_v45  ;;  %v2537_v45 = vld [vmem:[#allocation10 + $0x1d8] sm:$0xff] }
 0xdd8   :  { %2336 = vmatpush1.msra.mxu1 %v2295_v46  ;;  %v2536_v46 = vld [vmem:[#allocation10 + $0x1d0] sm:$0xff] }
 0xdd9   :  { %2238 = vadd.xlane.f32.xlu0 %v2236_v8  ;;  %2337 = vmatprep.subr.mxu1 %v2292_v18  ;;  %v2535_v18 = vld [vmem:[#allocation10 + $0x1c8] sm:$0xff] }
 0xdda   :  { %2338 = vmatpush1.msra.mxu1 %v2291_v20  ;;  %v2534_v20 = vld [vmem:[#allocation10 + $0x1c0] sm:$0xff] }
 0xddb   :  { %2339 = vmatprep.subr.mxu1 %v2288_v23  ;;  %v2533_v23 = vld [vmem:[#allocation10 + $0x1b8] sm:$0xff] }
 0xddc   :  { %2340 = vmatpush1.msra.mxu1 %v2287_v28  ;;  %v2532_v28 = vld [vmem:[#allocation10 + $0x1b0] sm:$0xff] }
 0xddd   :  { %2341 = vmatprep.subr.mxu1 %v2284_v33  ;;  %v2531_v33 = vld [vmem:[#allocation10 + $0x1a8] sm:$0xff] }
 0xdde   :  { %2342 = vmatpush1.msra.mxu1 %v2283_v35  ;;  %v2530_v35 = vld [vmem:[#allocation10 + $0x1a0] sm:$0xff] }
 0xddf   :  { %2343 = vmatprep.subr.mxu1 %v2280_v37  ;;  %v2529_v37 = vld [vmem:[#allocation10 + $0x198] sm:$0xff] }
 0xde0   :  { %2344 = vmatpush1.msra.mxu1 %v2279_v39  ;;  %v2528_v39 = vld [vmem:[#allocation10 + $0x190] sm:$0xff] }
 0xde1   :  { %2345 = vmatprep.subr.mxu1 %v2276_v41  ;;  %v2527_v41 = vld [vmem:[#allocation10 + $0x188] sm:$0xff] }
 0xde2   :  { %2346 = vmatpush1.msra.mxu1 %v2275_v44  ;;  %v2526_v44 = vld [vmem:[#allocation10 + $0x180] sm:$0xff] }
 0xde3   :  { %2347 = vmatprep.subr.mxu1 %v2272_v49 }
 0xde4   :  { %2348 = vmatpush1.msra.mxu1 %v2271_v9 }
 0xde5   :  { %2349 = vmatprep.subr.mxu1 %v2268_v51 }
 0xde6   :  { %2350 = vmatpush1.msra.mxu1 %v2267_v53 }
 0xde7   :  { %2351 = vmatprep.subr.mxu1 %v2264_v54 }
 0xde8   :  { %2352 = vmatpush1.msra.mxu1 %v2263_v63 }
 0xde9   :  { %2353 = vmatprep.subr.mxu1 %v2260_v25 }
 0xdea   :  { %2354 = vmatpush1.msra.mxu1 %v2259_v3 }
 0xdeb   :  { %3095 = vmatprep.subr.mxu1 %v2541_v10 }
 0xe60   :  { %v2241_v27 = vpop.xlane.xlu1 %2240 }
 0xe61   :  { %v2243_v30 = vmul.f32 0.0078125, %v2241_v27 }
 0xe62   :  { %v2239_v58 = vpop.xlane.xlu0 %2238 }
 0xe63   :  { %v2245_v59 = vadd.f32 1e-06, %v2243_v30  ;;  %v2242_v60 = vmul.f32 0.0078125, %v2239_v58 }
 0xe65   :  { %v2244_v61 = vadd.f32 1e-06, %v2242_v60  ;;  %3483 = vrsqrt.f32 %v2245_v59 }
 0xe67   :  { %3485 = vrsqrt.f32 %v2244_v61 }
 0xe72   :  { %v3484_v31 = vpop.eup %3483 }
 0xe73   :  { %v2249_v6 = vmul.f32 %v3484_v31, %v4582_v2 }
 0xe74   :  { %v3486_v62 = vpop.eup %3485 }
 0xe75   :  { %v2248_v0 = vmul.f32 %v3486_v62, %v4585_v5  ;;  %v2257_v8 = vmul.f32 %v2915_v1, %v2249_v6 }
 0xe77   :  { %v2256_v4 = vmul.f32 %v2915_v1, %v2248_v0 }
 0xe79   :  { %2388 = vmatmul.mubr.f32.vlgmr.msra.gmra.mxu1 %v2256_v4  ;;  %2465 = vmatmul.mubr.f32.vlgmr.msra.gmra.mxu0 %v2256_v4 }
 0xe7a   :  { %2393 = vmatprep.mubr.f32.mxu1 %v3719_v29  ;;  %2470 = vmatprep.mubr.f32.mxu0 %v3719_v29 }
 0xe7b   :  { %3096 = vmatpush3.msra.mxu1 %v2525_v11 }
 0xe7c   :  { %3097 = vmatprep.subr.mxu1 %v2540_v12 }
 0xe7d   :  { %2394 = vmatmul.mubr.f32.gmra.mxu1 %v2257_v8  ;;  %2471 = vmatmul.mubr.f32.gmra.mxu0 %v2257_v8 }
 0xe7e   :  { %3098 = vmatpush3.msra.mxu1 %v2524_v13 }
 0xe7f   :  { %3099 = vmatprep.subr.mxu1 %v2539_v48 }
 0xe80   :  { %3100 = vmatpush3.msra.mxu1 %v2523_v14 }
 0xe81   :  { %3101 = vmatprep.subr.mxu1 %v2538_v42 }
 0xe82   :  { %3102 = vmatpush3.msra.mxu1 %v2522_v15 }
 0xe83   :  { %3103 = vmatprep.subr.mxu1 %v2537_v45 }
 0xe84   :  { %3104 = vmatpush3.msra.mxu1 %v2521_v16 }
 0xe85   :  { %3105 = vmatprep.subr.mxu1 %v2536_v46 }
 0xe86   :  { %3106 = vmatpush3.msra.mxu1 %v2520_v17 }
 0xe87   :  { %3107 = vmatprep.subr.mxu1 %v2535_v18 }
 0xe88   :  { %3108 = vmatpush3.msra.mxu1 %v2519_v19 }
 0xe89   :  { %3109 = vmatprep.subr.mxu1 %v2534_v20 }
 0xe8a   :  { %3110 = vmatpush3.msra.mxu1 %v2518_v22 }
 0xe8b   :  { %3111 = vmatprep.subr.mxu1 %v2533_v23 }
 0xe8c   :  { %3112 = vmatpush3.msra.mxu1 %v2517_v26 }
 0xe8d   :  { %3113 = vmatprep.subr.mxu1 %v2532_v28 }
 0xe8e   :  { %3114 = vmatpush3.msra.mxu1 %v2516_v32 }
 0xe8f   :  { %3115 = vmatprep.subr.mxu1 %v2531_v33 }
 0xe90   :  { %3116 = vmatpush3.msra.mxu1 %v2515_v34  ;;  %v2921_v34 = vld [vmem:[#allocation12] ss:$0 sm:$0xff] }
 0xe91   :  { %3117 = vmatprep.subr.mxu1 %v2530_v35 }
 0xe92   :  { %3118 = vmatpush3.msra.mxu1 %v2514_v36 }
 0xe93   :  { %3119 = vmatprep.subr.mxu1 %v2529_v37 }
 0xe94   :  { %3120 = vmatpush3.msra.mxu1 %v2513_v38  ;;  %v2923_v38 = vld [vmem:[#allocation13] ss:$0 sm:$0xff] }
 0xe95   :  { %3121 = vmatprep.subr.mxu1 %v2528_v39 }
 0xe96   :  { %3122 = vmatpush3.msra.mxu1 %v2512_v40 }
 0xe97   :  { %3123 = vmatprep.subr.mxu1 %v2527_v41 }
 0xe98   :  { %3124 = vmatpush3.msra.mxu1 %v2511_v43 }
 0xe99   :  { %3125 = vmatprep.subr.mxu1 %v2526_v44  ;;  %v4606_v44 = vld [vmem:[%s4649_s17] sm:$0xff] }
 0xe9a   :  { %3126 = vmatpush3.msra.mxu1 %v2510_v47  ;;  %v4611_v47 = vld [vmem:[%s4649_s17 + $0x8] sm:$0xff] }
 0xf39   :  { %v2389_v49 = vpop.f32.mrf.mxu1  ;;  %v2466_v27 = vpop.f32.mrf.mxu0 }
 0xf3a   :  { %v2916_v50 = vmul.f32 -1.442695, %v2389_v49 }
 0xf3b   :  { %v2391_v9 = vpop.f32.mrf.mxu1  ;;  %v2468_v58 = vpop.f32.mrf.mxu0 }
 0xf3c   :  { %3487 = vpow2.f32 %v2916_v50  ;;  %v2917_v7 = vmul.f32 -1.442695, %v2391_v9  ;;  %v2720_v50 = vsel %vm2718_vm1, %v4611_v47, 0.0 }
 0xf3d   :  { %v2395_v51 = vpop.f32.mrf.mxu1  ;;  %v2472_v62 = vpop.f32.mrf.mxu0 }
 0xf3e   :  { %3489 = vpow2.f32 %v2917_v7  ;;  %v2918_v52 = vmul.f32 -1.442695, %v2395_v51 }
 0xf3f   :  { %v2397_v53 = vpop.f32.mrf.mxu1  ;;  %v2474_v10 = vpop.f32.mrf.mxu0 }
 0xf40   :  { %3491 = vpow2.f32 %v2918_v52  ;;  %v2919_v21 = vmul.f32 -1.442695, %v2397_v53  ;;  %v2924_v52 = vld [vmem:[#allocation3] ss:$0 sm:$0xff] }
 0xf42   :  { %3493 = vpow2.f32 %v2919_v21 }
 0xf49   :  { %v3488_v54 = vpop.eup %3487 }
 0xf4a   :  { %v2489_v24 = vadd.f32 1.0, %v3488_v54 }
 0xf4b   :  { %v3490_v63 = vpop.eup %3489 }
 0xf4c   :  { %3495 = vrcp.f32 %v2489_v24  ;;  %v2490_v55 = vadd.f32 1.0, %v3490_v63 }
 0xf4d   :  { %v3492_v25 = vpop.eup %3491 }
 0xf4e   :  { %3497 = vrcp.f32 %v2490_v55  ;;  %v2491_v56 = vadd.f32 1.0, %v3492_v25 }
 0xf4f   :  { %v3494_v3 = vpop.eup %3493 }
 0xf50   :  { %3499 = vrcp.f32 %v2491_v56  ;;  %v2492_v57 = vadd.f32 1.0, %v3494_v3 }
 0xf52   :  { %3501 = vrcp.f32 %v2492_v57 }
 0xf59   :  { %v3496_v30 = vpop.eup %3495 }
 0xf5a   :  { %v2501_v60 = vmul.f32 %v3496_v30, %v2389_v49  ;;  %v2719_v49 = vsel %vm2718_vm1, %v4606_v44, 0.0 }
 0xf5b   :  { %v3498_v59 = vpop.eup %3497 }
 0xf5c   :  { %v2502_v61 = vmul.f32 %v3498_v59, %v2391_v9  ;;  %v2505_v4 = vmul.f32 %v2501_v60, %v2466_v27  ;;  %v2721_v9 = vadd.f32 %v2720_v50, %v2719_v49 }
 0xf5d   :  { %v3500_v31 = vpop.eup %3499 }
 0xf5e   :  { %v2506_v0 = vmul.f32 %v2502_v61, %v2468_v58  ;;  %v2503_v6 = vmul.f32 %v3500_v31, %v2395_v51  ;;  %v2922_v51 = vld [vmem:[#allocation2] ss:$0 sm:$0xff] }
 0xf5f   :  { %v3502_v1 = vpop.eup %3501 }
 0xf60   :  { %v2504_v8 = vmul.f32 %v3502_v1, %v2397_v53  ;;  %2606 = vmatprep.mubr.f32.mxu1 %v2506_v0  ;;  %v2507_v12 = vmul.f32 %v2503_v6, %v2472_v62 }
 0xf61   :  { %2607 = vmatmul.mubr.f32.vlgmr.msra.gmra.mxu1 %v2505_v4 }
 0xf62   :  { %v2508_v11 = vmul.f32 %v2504_v8, %v2474_v10 }
 0xf64   :  { %2611 = vmatprep.mubr.f32.mxu1 %v2508_v11 }
 0xf65   :  { %2612 = vmatmul.mubr.f32.gmra.mxu1 %v2507_v12 }
0x1021   :  { %v3127_v13 = vpop.f32.mrf.mxu1 }
0x1023   :  { %v3128_v48 = vpop.f32.mrf.mxu1 }
0x1024   :  { %v3129_v14 = vadd.f32 %v3128_v48, %v3127_v13 }
0x1025   :  { %v3130_v42 = vpop.f32.mrf.mxu1 }
0x1026   :  { %v2617_v15 = vadd.f32 %v3129_v14, %v4585_v5  ;;  %v2920_v5 = vld [vmem:[%s4645_s12] ss:$0 sm:$0xff] }
0x1027   :  { %v3131_v45 = vpop.f32.mrf.mxu1 }
0x1028   :  { %v3132_v16 = vadd.f32 %v3131_v45, %v3130_v42  ;;  %v2620_v46 = vmul.f32 %v2617_v15, %v2617_v15 }
0x102a   :  { %v2618_v17 = vadd.f32 %v3132_v16, %v4582_v2  ;;  %2622 = vadd.xlane.f32.xlu0 %v2620_v46 }
0x102c   :  { %v2621_v18 = vmul.f32 %v2618_v17, %v2618_v17 }
0x102e   :  { %2624 = vadd.xlane.f32.xlu1 %v2621_v18 }
0x10b3   :  { %v2623_v19 = vpop.xlane.xlu0 %2622 }
0x10b4   :  { %v2626_v20 = vmul.f32 0.0078125, %v2623_v19 }
0x10b6   :  { %v2628_v22 = vadd.f32 1e-06, %v2626_v20 }
0x10b7   :  { %v2625_v23 = vpop.xlane.xlu1 %2624 }
0x10b8   :  { %3503 = vrsqrt.f32 %v2628_v22  ;;  %v2627_v26 = vmul.f32 0.0078125, %v2625_v23 }
0x10ba   :  { %v2629_v28 = vadd.f32 1e-06, %v2627_v26 }
0x10bc   :  { %3505 = vrsqrt.f32 %v2629_v28 }
0x10c5   :  { %v3504_v32 = vpop.eup %3503 }
0x10c6   :  { %v2632_v33 = vmul.f32 %v3504_v32, %v2617_v15 }
0x10c8   :  { %v2640_v35 = vmul.f32 %v2920_v5, %v2632_v33 }
0x10c9   :  { %v3506_v2 = vpop.eup %3505 }
0x10ca   :  { %v2649_v36 = vmul.f32 %v2921_v34, %v2640_v35  ;;  %v2633_v37 = vmul.f32 %v3506_v2, %v2618_v17  ;;  %v2671_v40 = vmul.f32 %v2923_v38, %v2640_v35 }
0x10cc   :  { %2651 = vadd.xlane.f32.xlu0 %v2649_v36  ;;  %v2641_v39 = vmul.f32 %v2920_v5, %v2633_v37 }
0x10ce   :  { %v2650_v41 = vmul.f32 %v2921_v34, %v2641_v39  ;;  %v2672_v43 = vmul.f32 %v2923_v38, %v2641_v39 }
0x10d0   :  { %2673 = vadd.xlane.f32.xlu0 %v2671_v40  ;;  %2653 = vadd.xlane.f32.xlu1 %v2650_v41 }
0x10d4   :  { %2675 = vadd.xlane.f32.xlu1 %v2672_v43  ;;  %2722 = vadd.xlane.f32.xlu0 %v2721_v9 }
0x1155   :  { %v2652_v7 = vpop.xlane.xlu0 %2651 }
0x1156   :  { %v2662_v54 = vadd.f32 %v2922_v51, %v2652_v7 }
0x1159   :  { %v2674_v53 = vpop.xlane.xlu0 %2673  ;;  %v2654_v21 = vpop.xlane.xlu1 %2653 }
0x115a   :  { %v2684_v24 = vadd.f32 %v2924_v52, %v2674_v53  ;;  %v2663_v57 = vadd.f32 %v2922_v51, %v2654_v21 }
0x115c   :  { %v2686_v63 = vmax.f32 %v2662_v54, %v2684_v24  ;;  %vm2710_vm2 = vcmp.gt.f32.partialorder %v2684_v24, %v2662_v54 }
0x115d   :  { %v2676_v55 = vpop.xlane.xlu1 %2675  ;;  %v2925_v25 = vsel %vm2710_vm2, 1.0, %v3719_v29  ;;  %v2723_v11 = vpop.xlane.xlu0 %2722 }
0x115e   :  { %v2688_v56 = vsub.f32 %v2662_v54, %v2686_v63  ;;  %v2694_v3 = vsub.f32 %v2684_v24, %v2686_v63  ;;  %v2685_v27 = vadd.f32 %v2924_v52, %v2676_v55  ;;  %v2752_v30 = vmul.f32 %v2925_v25, %v4606_v44 }
0x115f   :  { %v2724_v12 = vrot.slane %v2723_v11, 4 }
0x1160   :  { %v2690_v58 = vmul.f32 1.442695, %v2688_v56  ;;  %v2696_v59 = vmul.f32 1.442695, %v2694_v3  ;;  %v2687_v60 = vmax.f32 %v2663_v57, %v2685_v27  ;;  %vm2711_vm3 = vcmp.gt.f32.partialorder %v2685_v27, %v2663_v57 }
0x1161   :  { %v2926_v61 = vsel %vm2711_vm3, 1.0, %v3719_v29  ;;  %v2754_v6 = vsel %vm2718_vm1, %v2752_v30, 0.0  ;;  %v2725_v48 = vadd.f32 %v2724_v12, %v2723_v11 }
0x1162   :  { %3507 = vpow2.f32 %v2690_v58  ;;  %v2689_v31 = vsub.f32 %v2663_v57, %v2687_v60  ;;  %v2695_v62 = vsub.f32 %v2685_v27, %v2687_v60  ;;  %v2753_v0 = vmul.f32 %v2926_v61, %v4611_v47 }
0x1163   :  { %3509 = vpow2.f32 %v2696_v59  ;;  %v2726_v15 = vrot.slane %v2725_v48, 2 }
0x1164   :  { %v2692_v1 = vmul.f32 1.442695, %v2689_v31  ;;  %v2698_v4 = vmul.f32 1.442695, %v2695_v62  ;;  %v2755_v8 = vsel %vm2718_vm1, %v2753_v0, 0.0 }
0x1165   :  { %v2756_v10 = vadd.f32 %v2755_v8, %v2754_v6  ;;  %v2727_v46 = vadd.f32 %v2726_v15, %v2725_v48 }
0x1166   :  { %3511 = vpow2.f32 %v2692_v1 }
0x1167   :  { %3513 = vpow2.f32 %v2698_v4  ;;  %2757 = vadd.xlane.f32.xlu0 %v2756_v10  ;;  %v2728_v17 = vrot.slane %v2727_v46, 1 }
0x1169   :  { %v2729_v18 = vadd.f32 %v2728_v17, %v2727_v46 }
0x116b   :  { %3372 = vpush %v2729_v18 }
0x116f   :  { %v3508_v13 = vpop.eup %3507 }
0x1170   :  { %v3510_v29 = vpop.eup %3509 }
0x1171   :  { %v2700_v14 = vadd.f32 %v3510_v29, %v3508_v13 }
0x1173   :  { %v3512_v42 = vpop.eup %3511  ;;  %3515 = vlog2.f32 %v2700_v14 }
0x1174   :  { %v3514_v45 = vpop.eup %3513 }
0x1175   :  { %v2701_v16 = vadd.f32 %v3514_v45, %v3512_v42 }
0x1177   :  { %3517 = vlog2.f32 %v2701_v16 }
0x1180   :  { %v3516_v19 = vpop.eup %3515 }
0x1181   :  { %v2703_v20 = vmul.f32 0.6931472, %v3516_v19 }
0x1183   :  { %v2706_v22 = vadd.f32 %v2703_v20, %v2686_v63 }
0x1184   :  { %v3518_v23 = vpop.eup %3517 }
0x1185   :  { %v2705_v26 = vmul.f32 0.6931472, %v3518_v23  ;;  %v2708_v28 = vsub.f32 %v2706_v22, %v2684_v24 }
0x1187   :  { %v2707_v32 = vadd.f32 %v2705_v26, %v2687_v60  ;;  %v2734_v33 = vmul.f32 %v4606_v44, %v2708_v28 }
0x1189   :  { %v2709_v5 = vsub.f32 %v2707_v32, %v2685_v27  ;;  %v2736_v35 = vsel %vm2718_vm1, %v2734_v33, 0.0 }
0x118b   :  { %v2735_v34 = vmul.f32 %v4611_v47, %v2709_v5 }
0x118d   :  { %v2737_v2 = vsel %vm2718_vm1, %v2735_v34, 0.0 }
0x118e   :  { %v2738_v36 = vadd.f32 %v2737_v2, %v2736_v35 }
0x1190   :  { %2739 = vadd.xlane.f32.xlu1 %v2738_v36 }
0x119c   :  { %s3373_s17 = spop %3372 }
0x119d   :  { %v2731_v53 = vstv %s3373_s17 }
0x119e   :  { %v2732_v21 = vadd.f32 1e-08, %v2731_v53 }
0x11a0   :  { %3519 = vrcp.f32 %v2732_v21 }
0x11ad   :  { %v3520_v54 = vpop.eup %3519 }
0x11f0   :  { %v2758_v37 = vpop.xlane.xlu0 %2757 }
0x11f1   :  { %v2759_v38 = vrot.slane %v2758_v37, 4 }
0x11f3   :  { %v2760_v39 = vadd.f32 %v2759_v38, %v2758_v37 }
0x11f5   :  { %v2761_v40 = vrot.slane %v2760_v39, 2 }
0x11f7   :  { %v2762_v50 = vadd.f32 %v2761_v40, %v2760_v39 }
0x11f9   :  { %v2763_v51 = vrot.slane %v2762_v50, 1 }
0x11fb   :  { %v2764_v47 = vadd.f32 %v2763_v51, %v2762_v50 }
0x1219   :  { %v2740_v41 = vpop.xlane.xlu1 %2739 }
0x121a   :  { %v2741_v43 = vrot.slane %v2740_v41, 4 }
0x121c   :  { %v2742_v49 = vadd.f32 %v2741_v43, %v2740_v41 }
0x121e   :  { %v2743_v9 = vrot.slane %v2742_v49, 2 }
0x1220   :  { %v2744_v7 = vadd.f32 %v2743_v9, %v2742_v49 }
0x1222   :  { %v2745_v44 = vrot.slane %v2744_v7, 1 }
0x1224   :  { %v2746_v52 = vadd.f32 %v2745_v44, %v2744_v7 }
0x1226   :  { %3374 = vpush %v2746_v52 }
0x1227   :  { %3376 = vpush %v2764_v47 }
0x1257   :  { %s3375_s7 = spop %3374 }
0x1258   :  { %v2748_v24 = vstv %s3375_s7  ;;  %s3377_s3 = spop %3376 }
0x1259   :  { %v2749_v63 = vmul.f32 %v3520_v54, %v2748_v24  ;;  %v2766_v55 = vstv %s3377_s3 }
0x125a   :  { %v2767_v25 = vmul.f32 %v3520_v54, %v2766_v55 }
0x125b   :  { %2751 = vst.msk [vmem:[#allocation16] sm:$0x1] %vm2750_vm4, %v2749_v63 }
0x125c   :  { %2768 = vst.msk [vmem:[#allocation15] sm:$0x1] %vm2750_vm4, %v2767_v25 }
0x125d   :  { %3668 = shalt.err (!%p3665_p6)
}
0x125e   :  { %2788 = dma.vmem_to_hbm [thread:$0]  %s2786_s2, 16, %s4651_s19, [#allocation17]  }
0x125f   :  { %s3677_s15 = scalar_lea.vmem %s2776_s25, 16  ;;  %s3681_s16 = scalar_lea.vmem %s2776_s25, 32 }
0x1260   :  { %p3678_p7 = scmp.ne.s32.totalorder %s2776_s25, %s3677_s15  ;;  %p3682_p8 = scmp.lt.s32.totalorder %s2776_s25, %s2776_s25 }
0x1261   :  { %p3683_p9 = scmp.lt.s32.totalorder %s3681_s16, %s3677_s15 }
0x1263   :  { %p3684_p10 = por %p3683_p9, %p3682_p8 }
0x1265   :  { %p3685_p11 = pnand %p3684_p10, %p3678_p7 }
0x1267   :  { %3688 = shalt.err (!%p3685_p11)
}
0x1268   :  { %2778 = dma.vmem_to_hbm [thread:$0]  %s2776_s25, 16, %s4650_s18, [#allocation6]  }
0x1269   :  { %3705 = dma.done.wait [#allocation6], 16  }
0x126a   :  { %3706 = vsyncadd [#allocation6], 4294967280 }
0x126b   :  { %3707 = dma.done.wait [#allocation17], 16  }
0x126c   :  { %3708 = vsyncadd [#allocation17], 4294967280 }
0x126d   :  { %2795 = vsyncpa [#allocation5], 1 }
0x126e   :  { %2796 = vsyncpa [#allocation8], 1 }
0x126f   :  { %2797 = vsyncpa [#allocation11], 1 }
0x1270   :  { %2798 = vsyncpa [#allocation14], 1 }
0x1271   :  { %2799 = vsyncpa [#allocation6], 1 }
0x1272   :  { %2800 = vsyncpa [#allocation17], 1 }

</bundles_post_ra>
